<compile_context>
chip_gen: v7x
topology: tpu7x:2x2x1
jax: 0.10.0
libtpu: 0.0.40
codegen_flags: <defaults>
</compile_context>

<pallas_src>
import math

import jax
import jax.numpy as jnp
from jax import lax
from jax.experimental import pallas as pl
from jax.experimental.pallas import tpu as pltpu

HIDDEN_DIM = 512
KH = KW = 7
BN_EPS = 1e-5


def _round_up(x, m):
    return (x + m - 1) // m * m


def _cdiv(a, b):
    return (a + b - 1) // b


# --------------------------------------------------------------------------- #
# Pallas kernel: fused [im2col-matmul (7x7 conv, BN scale folded) -> shift+ReLU
#                       -> 1x1 conv matmul + bias], one row tile per grid step.
# --------------------------------------------------------------------------- #
def _head_kernel(patch_ref, w1_ref, shift_ref, w2_ref, b2_ref, o_ref):
    """
    patch_ref : (TILE_N, K)         bf16  im2col rows (K = 49*Cin, unpadded)
    w1_ref    : (K, 512)            bf16  dense 7x7 conv weight, BN scale folded
    shift_ref : (1, 512)            f32   folded BN shift (includes conv1 bias)
    w2_ref    : (512, Cout_pad)     bf16  1x1 conv weight (lane-padded to 128)
    b2_ref    : (1, Cout_pad)       f32   1x1 conv bias   (lane-padded)
    o_ref     : (TILE_N, Cout_pad)  bf16  lane-dense output tile
    """
    # 7x7 grouped conv == one MXU matmul over the full im2col K axis.
    acc = jnp.dot(patch_ref[...], w1_ref[...], preferred_element_type=jnp.float32)
    # folded BatchNorm (shift only; scale already in w1 columns) + ReLU (VPU).
    act = jnp.maximum(acc + shift_ref[...], 0.0)
    # 1x1 conv == plain matmul (MXU) + bias; Cout_pad % 128 == 0 -> unmasked vst.
    out = jnp.dot(act.astype(w2_ref.dtype), w2_ref[...],
                  preferred_element_type=jnp.float32) + b2_ref[...]
    o_ref[...] = out.astype(o_ref.dtype)


# --------------------------------------------------------------------------- #
# JAX glue
# --------------------------------------------------------------------------- #
def resize_bilinear_align_corners(x, out_h, out_w):
    """F.interpolate(x, size=(out_h,out_w), mode='bilinear', align_corners=True), NCHW."""
    b, c, h, w = x.shape
    ys = jnp.linspace(0.0, h - 1.0, out_h) if h > 1 else jnp.zeros((out_h,), jnp.float32)
    xs = jnp.linspace(0.0, w - 1.0, out_w) if w > 1 else jnp.zeros((out_w,), jnp.float32)
    y0 = jnp.clip(jnp.floor(ys), 0, h - 1).astype(jnp.int32)
    x0 = jnp.clip(jnp.floor(xs), 0, w - 1).astype(jnp.int32)
    y1 = jnp.minimum(y0 + 1, h - 1)
    x1 = jnp.minimum(x0 + 1, w - 1)
    wy = (ys - y0.astype(jnp.float32))[:, None]
    wx = (xs - x0.astype(jnp.float32))[None, :]
    g = lambda yi, xi: x[:, :, yi, :][:, :, :, xi]     # (B, C, out_h, out_w)
    top = g(y0, x0) * (1.0 - wx) + g(y0, x1) * wx
    bot = g(y1, x0) * (1.0 - wx) + g(y1, x1) * wx
    return top * (1.0 - wy) + bot * wy


def _im2col_nhwc(x_nhwc, pad):
    """Zero-pad + extract 7x7 patches. Returns (B, H*W, KH*KW*C), (kh, kw, c)-major."""
    B, H, W, C = x_nhwc.shape
    xp = jnp.pad(x_nhwc, ((0, 0), (pad, pad), (pad, pad), (0, 0)))
    cols = []
    for i in range(KH):
        for j in range(KW):
            cols.append(xp[:, i:i + H, j:j + W, :])
    patches = jnp.concatenate(cols, axis=-1)           # (B, H, W, 49*C)
    return patches.reshape(B, H * W, KH * KW * C)


def init_params(key, input_nc, output_nc):
    """Deterministic synthetic parameters with the module's shapes."""
    groups = math.gcd(input_nc, HIDDEN_DIM)
    in_pg = input_nc // groups
    ks = jax.random.split(key, 8)
    return dict(
        groups=groups,
        w1=jax.random.normal(ks[0], (HIDDEN_DIM, in_pg, KH, KW), jnp.float32) * 0.05,
        b1=jax.random.normal(ks[1], (HIDDEN_DIM,), jnp.float32) * 0.05,
        gamma=1.0 + 0.1 * jax.random.normal(ks[2], (HIDDEN_DIM,), jnp.float32),
        beta=0.1 * jax.random.normal(ks[3], (HIDDEN_DIM,), jnp.float32),
        mean=0.1 * jax.random.normal(ks[4], (HIDDEN_DIM,), jnp.float32),
        var=jax.random.uniform(ks[5], (HIDDEN_DIM,), jnp.float32, 0.5, 1.5),
        w2=jax.random.normal(ks[6], (output_nc, HIDDEN_DIM, 1, 1), jnp.float32) * 0.05,
        b2=jax.random.normal(ks[7], (output_nc,), jnp.float32) * 0.05,
    )


def multiscale_classification_head(x_list, params):
    """Forward pass of MultiscaleClassificationHead. Inputs/outputs are NCHW."""
    B, _, H, W = x_list[0].shape

    # Multiscale fuse (glue): bilinear upsample coarser scales to (H, W), concat on C.
    feats = [x_list[0]]
    for xi in x_list[1:]:
        feats.append(resize_bilinear_align_corners(xi, H, W))
    feats = jnp.concatenate(feats, axis=1)                        # (B, Cin, H, W)
    Cin = feats.shape[1]

    groups = params["groups"]
    in_pg = Cin // groups
    out_pg = HIDDEN_DIM // groups

    # ---- fold weights (all in f32, then cast to bf16) ------------------------
    # grouped (512, Cin/groups, 7, 7) -> dense (512, Cin, 7, 7) -> (49*Cin, 512)
    # TODO(synk): when in_pg is large, switch to per-group block matmuls instead
    #             of the densified (mostly-zero) weight; at this config in_pg is
    #             tiny so per-group K=49*in_pg would pad to 128 and cost more.
    og = jnp.arange(HIDDEN_DIM) // out_pg
    cg = jnp.arange(Cin) // in_pg
    mask = (og[:, None] == cg[None, :]).astype(jnp.float32)       # (512, Cin)
    w1_dense = params["w1"][:, jnp.arange(Cin) % in_pg, :, :] * mask[:, :, None, None]
    w1_mat = jnp.transpose(w1_dense, (2, 3, 1, 0)).reshape(KH * KW * Cin, HIDDEN_DIM)

    # eval-mode BN: scale folded into w1 columns, shift stays as an f32 add.
    scale = params["gamma"] / jnp.sqrt(params["var"] + BN_EPS)
    shift = (params["beta"] - params["mean"] * scale
             + scale * params["b1"]).reshape(1, HIDDEN_DIM)       # f32
    w1_mat = (w1_mat * scale[None, :]).astype(jnp.bfloat16)       # (K, 512) bf16

    w2 = jnp.transpose(params["w2"][:, :, 0, 0], (1, 0))          # (512, Cout)
    Cout = w2.shape[1]
    cout_pad = _round_up(Cout, 128)                               # lane-dense output
    w2_p = jnp.pad(w2, ((0, 0), (0, cout_pad - Cout))).astype(jnp.bfloat16)
    b2_p = jnp.pad(params["b2"].reshape(1, -1), ((0, 0), (0, cout_pad - Cout)))  # f32

    # ---- activations: bf16 im2col, rows flattened across batch, K unpadded ---
    K = KH * KW * Cin
    x_nhwc = jnp.transpose(feats, (0, 2, 3, 1)).astype(jnp.bfloat16)
    patches = _im2col_nhwc(x_nhwc, pad=3).reshape(B * H * W, K)   # (B*H*W, K) bf16

    rows = B * H * W
    tile_n = 512
    try:  # bigger row tiles on 128-MiB-VMEM parts (v5e/v6e); keep 512 on v7x.
        if pltpu.get_tpu_info().vmem_capacity_bytes >= 100 * (1 << 20):
            tile_n = 1024
    except Exception:
        pass
    if rows <= 2 * tile_n:
        # keep >= 2 grid steps when possible (v7x has 2 TensorCores per chip);
        # round to 128-row (vreg / MXU friendly) tiles.
        tile_n = max(128, _round_up(_cdiv(rows, 2), 128))
    n_tiles = _cdiv(rows, tile_n)
    rows_pad = n_tiles * tile_n
    patches = jnp.pad(patches, ((0, rows_pad - rows), (0, 0)))

    # ---- VMEM budget (conservative: assume consts may stay double-buffered) ---
    need = (2 * tile_n * K * 2                                    # patch blocks
            + 2 * tile_n * cout_pad * 2                           # output blocks
            + 2 * (K * HIDDEN_DIM * 2 + HIDDEN_DIM * cout_pad * 2
                   + HIDDEN_DIM * 4 + cout_pad * 4)               # constant operands
            + tile_n * HIDDEN_DIM * 6                             # f32 acc + bf16 act
            + tile_n * cout_pad * 4)                              # f32 pre-store tile
    vmem_limit = int(min(max(need * 3 // 2 + (4 << 20), 32 << 20), 56 << 20))

    flops = 2 * rows_pad * K * HIDDEN_DIM + 2 * rows_pad * HIDDEN_DIM * cout_pad
    bytes_accessed = (patches.size * 2 + w1_mat.size * 2 + w2_p.size * 2
                      + shift.size * 4 + b2_p.size * 4 + rows_pad * cout_pad * 2)

    def _call(single_buffer_consts):
        def cspec(shape):
            kw = {"pipeline_mode": pl.Buffered(1)} if single_buffer_consts else {}
            return pl.BlockSpec(shape, lambda t: (0, 0), **kw)

        return pl.pallas_call(
            _head_kernel,
            out_shape=jax.ShapeDtypeStruct((rows_pad, cout_pad), jnp.bfloat16),
            grid=(n_tiles,),
            in_specs=[
                pl.BlockSpec((tile_n, K), lambda t: (t, 0)),
                cspec((K, HIDDEN_DIM)),
                cspec((1, HIDDEN_DIM)),
                cspec((HIDDEN_DIM, cout_pad)),
                cspec((1, cout_pad)),
            ],
            out_specs=pl.BlockSpec((tile_n, cout_pad), lambda t: (t, 0)),
            compiler_params=pltpu.CompilerParams(
                dimension_semantics=("parallel",),
                vmem_limit_bytes=vmem_limit,
            ),
            cost_estimate=pl.CostEstimate(
                flops=flops, transcendentals=0, bytes_accessed=bytes_accessed),
        )(patches, w1_mat, shift, w2_p, b2_p)

    try:
        out_flat = _call(True)           # constants single-buffered (saves VMEM)
    except Exception:                    # fallback if Buffered(1) is unsupported
        out_flat = _call(False)

    out = out_flat[:rows, :Cout].astype(jnp.float32).reshape(B, H, W, Cout)
    return jnp.transpose(out, (0, 3, 1, 2))                       # NCHW (PyTorch layout)


# --------------------------------------------------------------------------- #
# Pure-JAX reference (for correctness only)
# --------------------------------------------------------------------------- #
def reference_forward(x_list, params):
    B, _, H, W = x_list[0].shape
    feats = [x_list[0]] + [resize_bilinear_align_corners(xi, H, W) for xi in x_list[1:]]
    feats = jnp.concatenate(feats, axis=1)
    z = lax.conv_general_dilated(
        feats, params["w1"], window_strides=(1, 1), padding=((3, 3), (3, 3)),
        dimension_numbers=("NCHW", "OIHW", "NCHW"),
        feature_group_count=params["groups"],
        precision=lax.Precision.HIGHEST) + params["b1"][None, :, None, None]
    z = (z - params["mean"][None, :, None, None]) / jnp.sqrt(
        params["var"][None, :, None, None] + BN_EPS)
    z = z * params["gamma"][None, :, None, None] + params["beta"][None, :, None, None]
    z = jnp.maximum(z, 0.0)
    out = lax.conv_general_dilated(
        z, params["w2"], window_strides=(1, 1), padding="VALID",
        dimension_numbers=("NCHW", "OIHW", "NCHW"),
        precision=lax.Precision.HIGHEST) + params["b2"][None, :, None, None]
    return out


if __name__ == "__main__":
    key = jax.random.PRNGKey(0)
    k_x0, k_x1, k_p = jax.random.split(key, 3)

    B = 2
    x0 = jax.random.normal(k_x0, (B, 4, 16, 16), jnp.float32)     # finest scale
    x1 = jax.random.normal(k_x1, (B, 4, 8, 8), jnp.float32)       # coarser scale
    x_list = [x0, x1]

    input_nc = x0.shape[1] + x1.shape[1]                          # 8
    output_nc = 8
    params = init_params(k_p, input_nc, output_nc)

    out = jax.block_until_ready(multiscale_classification_head(x_list, params))
    ref = jax.block_until_ready(reference_forward(x_list, params))

    assert out.shape == (B, output_nc, 16, 16), out.shape
    err = float(jnp.max(jnp.abs(out - ref)))
    # bf16 weights/activations/output with f32 accumulation -> looser tolerance.
    assert err < 5e-2, f"max abs err {err}"
    print("KERNEL_OK")
</pallas_src>

<mosaic_0001>
module attributes {stable_mosaic.version = 11 : i64} {
  func.func @_head_kernel(%arg0: i32, %arg1: memref<256x392xbf16, #tpu.memory_space<vmem>>, %arg2: memref<392x512xbf16, #tpu.memory_space<vmem>>, %arg3: memref<1x512xf32, #tpu.memory_space<vmem>>, %arg4: memref<512x128xbf16, #tpu.memory_space<vmem>>, %arg5: memref<1x128xf32, #tpu.memory_space<vmem>>, %arg6: memref<256x128xbf16, #tpu.memory_space<vmem>>) attributes {dimension_semantics = [#tpu.dimension_semantics<parallel>], iteration_bounds = array<i64: 2>, scalar_prefetch = 0 : i64, scratch_operands = 0 : i64, tpu.core_type = #tpu.core_type<tc>, window_params = [{transform_indices = @transform_0, window_bounds = array<i64: 256, 392>}, {pipeline_mode = #tpu.pipeline_mode<synchronous>, transform_indices = @transform_1, window_bounds = array<i64: 392, 512>}, {pipeline_mode = #tpu.pipeline_mode<synchronous>, transform_indices = @transform_2, window_bounds = array<i64: 1, 512>}, {pipeline_mode = #tpu.pipeline_mode<synchronous>, transform_indices = @transform_3, window_bounds = array<i64: 512, 128>}, {pipeline_mode = #tpu.pipeline_mode<synchronous>, transform_indices = @transform_4, window_bounds = array<i64: 1, 128>}, {transform_indices = @transform_5, window_bounds = array<i64: 256, 128>}]} {
    %c0 = arith.constant 0 : index
    %c0_0 = arith.constant 0 : index
    %0 = vector.load %arg1[%c0, %c0_0] : memref<256x392xbf16, #tpu.memory_space<vmem>>, vector<256x392xbf16>
    %c0_1 = arith.constant 0 : index
    %c0_2 = arith.constant 0 : index
    %1 = vector.load %arg2[%c0_1, %c0_2] : memref<392x512xbf16, #tpu.memory_space<vmem>>, vector<392x512xbf16>
    %cst = arith.constant dense<0.000000e+00> : vector<256x512xf32>
    %2 = tpu.matmul %0, %1, %cst {dimension_numbers = #tpu.dot_dimension_numbers<[1], [0], [0], [1], [0, 0, 1, 1], [], []>} : vector<256x392xbf16>, vector<392x512xbf16>, vector<256x512xf32> -> vector<256x512xf32>
    %c0_3 = arith.constant 0 : index
    %c0_4 = arith.constant 0 : index
    %3 = vector.load %arg3[%c0_3, %c0_4] : memref<1x512xf32, #tpu.memory_space<vmem>>, vector<1x512xf32>
    %4 = vector.broadcast %3 : vector<1x512xf32> to vector<256x512xf32>
    %5 = arith.addf %2, %4 : vector<256x512xf32>
    %cst_5 = arith.constant 0.000000e+00 : f32
    %6 = vector.broadcast %cst_5 : f32 to vector<256x512xf32>
    %7 = arith.maximumf %5, %6 : vector<256x512xf32>
    %8 = arith.truncf %7 : vector<256x512xf32> to vector<256x512xbf16>
    %c0_6 = arith.constant 0 : index
    %c0_7 = arith.constant 0 : index
    %9 = vector.load %arg4[%c0_6, %c0_7] : memref<512x128xbf16, #tpu.memory_space<vmem>>, vector<512x128xbf16>
    %cst_8 = arith.constant dense<0.000000e+00> : vector<256x128xf32>
    %10 = tpu.matmul %8, %9, %cst_8 {dimension_numbers = #tpu.dot_dimension_numbers<[1], [0], [0], [1], [0, 0, 1, 1], [], []>} : vector<256x512xbf16>, vector<512x128xbf16>, vector<256x128xf32> -> vector<256x128xf32>
    %c0_9 = arith.constant 0 : index
    %c0_10 = arith.constant 0 : index
    %11 = vector.load %arg5[%c0_9, %c0_10] : memref<1x128xf32, #tpu.memory_space<vmem>>, vector<1x128xf32>
    %12 = vector.broadcast %11 : vector<1x128xf32> to vector<256x128xf32>
    %13 = arith.addf %10, %12 : vector<256x128xf32>
    %14 = arith.truncf %13 : vector<256x128xf32> to vector<256x128xbf16>
    %c0_11 = arith.constant 0 : index
    %c0_12 = arith.constant 0 : index
    %15 = vector.load %arg6[%c0_11, %c0_12] : memref<256x128xbf16, #tpu.memory_space<vmem>>, vector<256x128xbf16>
    tpu.vector_store %arg6[%c0_11, %c0_12], %14 {strides = array<i32>} : memref<256x128xbf16, #tpu.memory_space<vmem>>, vector<256x128xbf16>,
    return
  }
  func.func @transform_0(%arg0: i32) -> (i32, i32) {
    %c0_i32 = arith.constant 0 : i32
    %c0_i32_0 = arith.constant 0 : i32
    return %arg0, %c0_i32 : i32, i32
  }
  func.func @transform_1(%arg0: i32) -> (i32, i32) {
    %c0_i32 = arith.constant 0 : i32
    %c0_i32_0 = arith.constant 0 : i32
    %c0_i32_1 = arith.constant 0 : i32
    return %c0_i32, %c0_i32_0 : i32, i32
  }
  func.func @transform_2(%arg0: i32) -> (i32, i32) {
    %c0_i32 = arith.constant 0 : i32
    %c0_i32_0 = arith.constant 0 : i32
    %c0_i32_1 = arith.constant 0 : i32
    return %c0_i32, %c0_i32_0 : i32, i32
  }
  func.func @transform_3(%arg0: i32) -> (i32, i32) {
    %c0_i32 = arith.constant 0 : i32
    %c0_i32_0 = arith.constant 0 : i32
    %c0_i32_1 = arith.constant 0 : i32
    return %c0_i32, %c0_i32_0 : i32, i32
  }
  func.func @transform_4(%arg0: i32) -> (i32, i32) {
    %c0_i32 = arith.constant 0 : i32
    %c0_i32_0 = arith.constant 0 : i32
    %c0_i32_1 = arith.constant 0 : i32
    return %c0_i32, %c0_i32_0 : i32, i32
  }
  func.func @transform_5(%arg0: i32) -> (i32, i32) {
    %c0_i32 = arith.constant 0 : i32
    %c0_i32_0 = arith.constant 0 : i32
    return %arg0, %c0_i32 : i32, i32
  }
}

module attributes {stable_mosaic.version = 11 : i64} {
  func.func @_head_kernel(%arg0: i32, %arg1: memref<256x392xbf16, #tpu.memory_space<vmem>>, %arg2: memref<392x512xbf16, #tpu.memory_space<vmem>>, %arg3: memref<1x512xf32, #tpu.memory_space<vmem>>, %arg4: memref<512x128xbf16, #tpu.memory_space<vmem>>, %arg5: memref<1x128xf32, #tpu.memory_space<vmem>>, %arg6: memref<256x128xbf16, #tpu.memory_space<vmem>>) attributes {dimension_semantics = [#tpu.dimension_semantics<parallel>], iteration_bounds = array<i64: 2>, scalar_prefetch = 0 : i64, scratch_operands = 0 : i64, tpu.core_type = #tpu.core_type<tc>, window_params = [{transform_indices = @transform_0, window_bounds = array<i64: 256, 392>}, {pipeline_mode = #tpu.pipeline_mode<synchronous>, transform_indices = @transform_1, window_bounds = array<i64: 392, 512>}, {pipeline_mode = #tpu.pipeline_mode<synchronous>, transform_indices = @transform_2, window_bounds = array<i64: 1, 512>}, {pipeline_mode = #tpu.pipeline_mode<synchronous>, transform_indices = @transform_3, window_bounds = array<i64: 512, 128>}, {pipeline_mode = #tpu.pipeline_mode<synchronous>, transform_indices = @transform_4, window_bounds = array<i64: 1, 128>}, {transform_indices = @transform_5, window_bounds = array<i64: 256, 128>}]} {
    %c0 = arith.constant 0 : index
    %c0_0 = arith.constant 0 : index
    %0 = vector.load %arg1[%c0, %c0_0] : memref<256x392xbf16, #tpu.memory_space<vmem>>, vector<256x392xbf16>
    %c0_1 = arith.constant 0 : index
    %c0_2 = arith.constant 0 : index
    %1 = vector.load %arg2[%c0_1, %c0_2] : memref<392x512xbf16, #tpu.memory_space<vmem>>, vector<392x512xbf16>
    %cst = arith.constant dense<0.000000e+00> : vector<256x512xf32>
    %2 = tpu.matmul %0, %1, %cst {dimension_numbers = #tpu.dot_dimension_numbers<[1], [0], [0], [1], [0, 0, 1, 1], [], []>} : vector<256x392xbf16>, vector<392x512xbf16>, vector<256x512xf32> -> vector<256x512xf32>
    %c0_3 = arith.constant 0 : index
    %c0_4 = arith.constant 0 : index
    %3 = vector.load %arg3[%c0_3, %c0_4] : memref<1x512xf32, #tpu.memory_space<vmem>>, vector<1x512xf32>
    %4 = vector.broadcast %3 : vector<1x512xf32> to vector<256x512xf32>
    %5 = arith.addf %2, %4 : vector<256x512xf32>
    %cst_5 = arith.constant 0.000000e+00 : f32
    %6 = vector.broadcast %cst_5 : f32 to vector<256x512xf32>
    %7 = arith.maximumf %5, %6 : vector<256x512xf32>
    %8 = arith.truncf %7 : vector<256x512xf32> to vector<256x512xbf16>
    %c0_6 = arith.constant 0 : index
    %c0_7 = arith.constant 0 : index
    %9 = vector.load %arg4[%c0_6, %c0_7] : memref<512x128xbf16, #tpu.memory_space<vmem>>, vector<512x128xbf16>
    %cst_8 = arith.constant dense<0.000000e+00> : vector<256x128xf32>
    %10 = tpu.matmul %8, %9, %cst_8 {dimension_numbers = #tpu.dot_dimension_numbers<[1], [0], [0], [1], [0, 0, 1, 1], [], []>} : vector<256x512xbf16>, vector<512x128xbf16>, vector<256x128xf32> -> vector<256x128xf32>
    %c0_9 = arith.constant 0 : index
    %c0_10 = arith.constant 0 : index
    %11 = vector.load %arg5[%c0_9, %c0_10] : memref<1x128xf32, #tpu.memory_space<vmem>>, vector<1x128xf32>
    %12 = vector.broadcast %11 : vector<1x128xf32> to vector<256x128xf32>
    %13 = arith.addf %10, %12 : vector<256x128xf32>
    %14 = arith.truncf %13 : vector<256x128xf32> to vector<256x128xbf16>
    %c0_11 = arith.constant 0 : index
    %c0_12 = arith.constant 0 : index
    %15 = vector.load %arg6[%c0_11, %c0_12] : memref<256x128xbf16, #tpu.memory_space<vmem>>, vector<256x128xbf16>
    tpu.vector_store %arg6[%c0_11, %c0_12], %14 {strides = array<i32>} : memref<256x128xbf16, #tpu.memory_space<vmem>>, vector<256x128xbf16>,
    return
  }
  func.func @transform_0(%arg0: i32) -> (i32, i32) {
    %c0_i32 = arith.constant 0 : i32
    %c0_i32_0 = arith.constant 0 : i32
    return %arg0, %c0_i32 : i32, i32
  }
  func.func @transform_1(%arg0: i32) -> (i32, i32) {
    %c0_i32 = arith.constant 0 : i32
    %c0_i32_0 = arith.constant 0 : i32
    %c0_i32_1 = arith.constant 0 : i32
    return %c0_i32, %c0_i32_0 : i32, i32
  }
  func.func @transform_2(%arg0: i32) -> (i32, i32) {
    %c0_i32 = arith.constant 0 : i32
    %c0_i32_0 = arith.constant 0 : i32
    %c0_i32_1 = arith.constant 0 : i32
    return %c0_i32, %c0_i32_0 : i32, i32
  }
  func.func @transform_3(%arg0: i32) -> (i32, i32) {
    %c0_i32 = arith.constant 0 : i32
    %c0_i32_0 = arith.constant 0 : i32
    %c0_i32_1 = arith.constant 0 : i32
    return %c0_i32, %c0_i32_0 : i32, i32
  }
  func.func @transform_4(%arg0: i32) -> (i32, i32) {
    %c0_i32 = arith.constant 0 : i32
    %c0_i32_0 = arith.constant 0 : i32
    %c0_i32_1 = arith.constant 0 : i32
    return %c0_i32, %c0_i32_0 : i32, i32
  }
  func.func @transform_5(%arg0: i32) -> (i32, i32) {
    %c0_i32 = arith.constant 0 : i32
    %c0_i32_0 = arith.constant 0 : i32
    return %arg0, %c0_i32 : i32, i32
  }
}

</mosaic_0001>

<bundles_post_ra>
// kernel: tpu_custom_call.1
= control target key start
LH: loop header
LB: loop body
LE: loop exit
PB: predicated region body
PF: predicated region fallthrough
CT: control target
= control target key end

     0   :  { %10 = vsyncpa [#allocation3], 0  ;;  %s5143_s0 = inlined_call_operand.vmem [shape: bf16[512,392], index: 0, kind: input, shape index: {}]   ;;  %s5144_s1 = inlined_call_operand.vmem [shape: bf16[392,512], index: 1, kind: input, shape index: {}]   ;;  %s5145_s2 = inlined_call_operand.vmem [shape: f32[1,512], index: 2, kind: input, shape index: {}]   ;;  %s5146_s3 = inlined_call_operand.vmem [shape: bf16[512,128], index: 3, kind: input, shape index: {}]   ;;  %s5147_s4 = inlined_call_operand.vmem [shape: f32[1,128], index: 4, kind: input, shape index: {}]   ;;  %s5148_s5 = inlined_call_operand.hbm [shape: bf16[512,128], index: 5, kind: output, shape index: {}]  }
   0x1   :  { %12 = vsyncpa [#allocation3 + $0x1], 0  ;;  %s4354_s18 = smov 0   ;;  %s4356_s19 = smov 0  }
   0x2   :  { %s4358_s20 = smov 0   ;;  %s4360_s21 = smov 0  }
   0x3 LB: > { %s4375_s22 = sadd.s32 4294967295, %s4319_s21   ;;  %s3055_s23 = sadd.s32 4294967294, %s4319_s21   ;;  %s4319_s21 = sphi %s4360_s21, %s5154_s21   ;;  %s4315_s20 = sphi %s4358_s20, %s5153_s20   ;;  %s4311_s19 = sphi %s4356_s19, %s5152_s19   ;;  %s4307_s18 = sphi %s4354_s18, %s5151_s18  }
   0x4   : > { %s4379_s24 = sadd.s32 1, %s4319_s21   ;;  %s135_s25 = sadd.s32 1, %s4315_s20 }
   0x5   : > { %s132_s26 = ssub.s32 %s4319_s21, %s4379_s24  ;;  %p145_p0 = scmp.ne.s32.totalorder %s4315_s20, %s4311_s19 }
   0x6   : > { %p133_p1 = scmp.eq.s32.totalorder %s132_s26, 0  ;;  %p146_p2 = scmp.eq.s32.totalorder %s4375_s22, 1 }
   0x7   : > { %p151_p3 = scmp.ne.s32.totalorder %s4311_s19, %s4307_s18  ;;  %p152_p4 = scmp.eq.s32.totalorder %s3055_s23, 1 }
   0x8   : > { %s4390_s27 = scalar_select %p133_p1, %s4315_s20, %s135_s25  }
   0x9   : > { %p4392_p5 = por %p146_p2, %p145_p0  ;;  %p4396_p6 = por %p152_p4, %p151_p3 }
   0xa   : > { %p3058_p7 = scmp.ge.s32.totalorder %s4319_s21, 1  ;;  %p192_p8 = scmp.lt.s32.totalorder %s4319_s21, 3 }
   0xc   : > { %p193_p9 = pnand %p3058_p7, %p192_p8 }
   0xd   : > { %v3981_v0 = vld [vmem:[%s5144_s1 + $0x4] ss:$16 sps:$4 sm:$0xff] (!%p193_p9)   ;;  %v3983_v1 = vld [vmem:[%s5144_s1 + $0xc] ss:$16 sps:$4 sm:$0xff] (!%p193_p9)   ;;  %v3985_v2 = vld [vmem:[%s5144_s1] ss:$16 sps:$4 sm:$0xff] (!%p193_p9)  }
   0xe   : > { %196 = sbr.rel (%p193_p9) target bundleno = 786 (0x312), region = 40  ;;  %1270 = vmatprep.subr.bf16.mxu0 (!%p193_p9), %v3981_v0  ;;  %v3986_v3 = vld [vmem:[%s5144_s1 + $0x8] ss:$16 sps:$4 sm:$0xff] (!%p193_p9)   ;;  %1656 = vmatprep.subr.bf16.mxu1 (!%p193_p9), %v3983_v1  ;;  %v3987_v4 = vld [vmem:[%s5144_s1 + $0x24] ss:$16 sps:$4 sm:$0xff] (!%p193_p9)   ;;  %s3060_s17 = sshll.u32 (!%p193_p9), %s4375_s22, 5 }
   0xf   : > { %1271 = vmatpush1.bf16.msra.mxu0 (!%p193_p9), %v3985_v2  ;;  %1657 = vmatpush1.bf16.msra.mxu1 (!%p193_p9), %v3986_v3  ;;  %v3989_v5 = vld [vmem:[%s5144_s1 + $0x2c] ss:$16 sps:$4 sm:$0xff] (!%p193_p9)   ;;  %v3991_v6 = vld [vmem:[%s5144_s1 + $0x20] ss:$16 sps:$4 sm:$0xff] (!%p193_p9)   ;;  %v3992_v7 = vld [vmem:[%s5144_s1 + $0x28] ss:$16 sps:$4 sm:$0xff] (!%p193_p9)  }
  0x10   : > { %1272 = vmatprep.subr.bf16.mxu0 (!%p193_p9), %v3987_v4  ;;  %1658 = vmatprep.subr.bf16.mxu1 (!%p193_p9), %v3989_v5  ;;  %v3993_v8 = vld [vmem:[%s5144_s1 + $0x44] ss:$16 sps:$4 sm:$0xff] (!%p193_p9)   ;;  %v3995_v9 = vld [vmem:[%s5144_s1 + $0x4c] ss:$16 sps:$4 sm:$0xff] (!%p193_p9)   ;;  %v3997_v10 = vld [vmem:[%s5144_s1 + $0x40] ss:$16 sps:$4 sm:$0xff] (!%p193_p9)  }
  0x11   : > { %v3998_v11 = vld [vmem:[%s5144_s1 + $0x48] ss:$16 sps:$4 sm:$0xff] (!%p193_p9)   ;;  %v3999_v12 = vld [vmem:[%s5144_s1 + $0x64] ss:$16 sps:$4 sm:$0xff] (!%p193_p9)   ;;  %v4001_v13 = vld [vmem:[%s5144_s1 + $0x6c] ss:$16 sps:$4 sm:$0xff] (!%p193_p9)  }
  0x12   : > { %v4003_v14 = vld [vmem:[%s5144_s1 + $0x60] ss:$16 sps:$4 sm:$0xff] (!%p193_p9)   ;;  %v4004_v15 = vld [vmem:[%s5144_s1 + $0x68] ss:$16 sps:$4 sm:$0xff] (!%p193_p9)   ;;  %v4005_v16 = vld [vmem:[%s5144_s1 + $0x84] ss:$16 sps:$4 sm:$0xff] (!%p193_p9)  }
  0x13   : > { %1273 = vmatpush1.bf16.msra.mxu0 (!%p193_p9), %v3991_v6  ;;  %1659 = vmatpush1.bf16.msra.mxu1 (!%p193_p9), %v3992_v7  ;;  %v4007_v17 = vld [vmem:[%s5144_s1 + $0x8c] ss:$16 sps:$4 sm:$0xff] (!%p193_p9)   ;;  %v4009_v18 = vld [vmem:[%s5144_s1 + $0x80] ss:$16 sps:$4 sm:$0xff] (!%p193_p9)   ;;  %v4010_v19 = vld [vmem:[%s5144_s1 + $0x88] ss:$16 sps:$4 sm:$0xff] (!%p193_p9)  }
  0x14   : > { %1274 = vmatprep.subr.bf16.mxu0 (!%p193_p9), %v3993_v8  ;;  %1660 = vmatprep.subr.bf16.mxu1 (!%p193_p9), %v3995_v9  ;;  %v4011_v20 = vld [vmem:[%s5144_s1 + $0xa4] ss:$16 sps:$4 sm:$0xff] (!%p193_p9)   ;;  %v4013_v21 = vld [vmem:[%s5144_s1 + $0xac] ss:$16 sps:$4 sm:$0xff] (!%p193_p9)   ;;  %v4015_v22 = vld [vmem:[%s5144_s1 + $0xa0] ss:$16 sps:$4 sm:$0xff] (!%p193_p9)  }
  0x15   : > { %v4016_v23 = vld [vmem:[%s5144_s1 + $0xa8] ss:$16 sps:$4 sm:$0xff]   ;;  %v4017_v24 = vld [vmem:[%s5144_s1 + $0xc4] ss:$16 sps:$4 sm:$0xff]   ;;  %v4019_v25 = vld [vmem:[%s5144_s1 + $0xcc] ss:$16 sps:$4 sm:$0xff]  }
  0x16   : > { %v4021_v26 = vld [vmem:[%s5144_s1 + $0xc0] ss:$16 sps:$4 sm:$0xff]   ;;  %v4022_v27 = vld [vmem:[%s5144_s1 + $0xc8] ss:$16 sps:$4 sm:$0xff]   ;;  %v4023_v28 = vld [vmem:[%s5144_s1 + $0xe4] ss:$16 sps:$4 sm:$0xff]  }
  0x17   : > { %1275 = vmatpush1.bf16.msra.mxu0 %v3997_v10  ;;  %1661 = vmatpush1.bf16.msra.mxu1 %v3998_v11  ;;  %v4025_v29 = vld [vmem:[%s5144_s1 + $0xec] ss:$16 sps:$4 sm:$0xff]   ;;  %v4027_v30 = vld [vmem:[%s5144_s1 + $0xe0] ss:$16 sps:$4 sm:$0xff]   ;;  %v4028_v31 = vld [vmem:[%s5144_s1 + $0xe8] ss:$16 sps:$4 sm:$0xff]  }
  0x18   : > { %1276 = vmatprep.subr.bf16.mxu0 %v3999_v12  ;;  %1662 = vmatprep.subr.bf16.mxu1 %v4001_v13  ;;  %v4029_v32 = vld [vmem:[%s5144_s1 + $0x104] ss:$16 sps:$4 sm:$0xff]   ;;  %v4031_v33 = vld [vmem:[%s5144_s1 + $0x10c] ss:$16 sps:$4 sm:$0xff]   ;;  %p222_p10 = scmp.lt.s32.totalorder %s3060_s17, 63  ;;  %vm1257_vm0 = vcmask 1043456  }
  0x19   : > { %v4033_v34 = vld [vmem:[%s5144_s1 + $0x100] ss:$16 sps:$4 sm:$0xff]   ;;  %v4034_v35 = vld [vmem:[%s5144_s1 + $0x108] ss:$16 sps:$4 sm:$0xff]   ;;  %v4035_v36 = vld [vmem:[%s5144_s1 + $0x124] ss:$16 sps:$4 sm:$0xff]  }
  0x1a   : > { %v4037_v37 = vld [vmem:[%s5144_s1 + $0x12c] ss:$16 sps:$4 sm:$0xff]   ;;  %s5156_s17 = smov (!%p222_p10, %s3060_s17), 63  ;;  %v4039_v38 = vld [vmem:[%s5144_s1 + $0x120] ss:$16 sps:$4 sm:$0xff]   ;;  %vm1208_vm1 = vcmask 64512  }
  0x1b   : > { %1277 = vmatpush1.bf16.msra.mxu0 %v4003_v14  ;;  %1663 = vmatpush1.bf16.msra.mxu1 %v4004_v15  ;;  %v4040_v39 = vld [vmem:[%s5144_s1 + $0x128] ss:$16 sps:$4 sm:$0xff]   ;;  %v4041_v40 = vld [vmem:[%s5144_s1 + $0x144] ss:$16 sps:$4 sm:$0xff]   ;;  %v4043_v41 = vld [vmem:[%s5144_s1 + $0x14c] ss:$16 sps:$4 sm:$0xff]  }
  0x1c   : > { %1278 = vmatprep.subr.bf16.mxu0 %v4005_v16  ;;  %1664 = vmatprep.subr.bf16.mxu1 %v4007_v17  ;;  %s3331_s11 = sshll.u32 %s5156_s17, 4  ;;  %v4045_v42 = vld [vmem:[%s5144_s1 + $0x140] ss:$16 sps:$4 sm:$0xff]   ;;  %v4046_v43 = vld [vmem:[%s5144_s1 + $0x148] ss:$16 sps:$4 sm:$0xff]   ;;  %s218_s13 = sand.u32 1, %s4311_s19  }
  0x1d   : > { %v4047_v44 = vld [vmem:[%s5144_s1 + $0x164] ss:$16 sps:$4 sm:$0xff]   ;;  %s4541_s30 = scalar_lea.vmem %s5143_s0, %s3331_s11  ;;  %v4049_v45 = vld [vmem:[%s5144_s1 + $0x16c] ss:$16 sps:$4 sm:$0xff]   ;;  %v4051_v46 = vld [vmem:[%s5144_s1 + $0x160] ss:$16 sps:$4 sm:$0xff]  }
  0x1e   : > { %v4052_v47 = vld [vmem:[%s5144_s1 + $0x168] ss:$16 sps:$4 sm:$0xff]   ;;  %v4079_v48 = vld [vmem:[%s4541_s30 + $0x4] ss:$16 sps:$4 sm:$0xff]   ;;  %v4055_v50 = vld [vmem:[%s5144_s1 + $0x18c] ss:$16 sps:$4 sm:$0xff]  }
  0x1f   : > { %1279 = vmatpush1.bf16.msra.mxu0 %v4009_v18  ;;  %1665 = vmatpush1.bf16.msra.mxu1 %v4010_v19  ;;  %v4053_v49 = vld [vmem:[%s5144_s1 + $0x184] ss:$16 sps:$4 sm:$0xff]   ;;  %v4057_v51 = vld [vmem:[%s5144_s1 + $0x180] ss:$16 sps:$4 sm:$0xff]   ;;  %v4058_v52 = vld [vmem:[%s5144_s1 + $0x188] ss:$16 sps:$4 sm:$0xff]  }
  0x20   : > { %1280 = vmatprep.subr.bf16.mxu0 %v4011_v20  ;;  %1666 = vmatprep.subr.bf16.mxu1 %v4013_v21  ;;  %v4059_v53 = vld [vmem:[%s5144_s1 + $0x1a4] ss:$16 sps:$4 sm:$0xff]   ;;  %v4061_v54 = vld [vmem:[%s5144_s1 + $0x1ac] ss:$16 sps:$4 sm:$0xff]   ;;  %v4063_v55 = vld [vmem:[%s5144_s1 + $0x1a0] ss:$16 sps:$4 sm:$0xff]  }
  0x21   : > { %1302 = vmatprep.mubr.bf16.mxu0 %v4079_v48  ;;  %1688 = vmatprep.mubr.bf16.mxu1 %v4079_v48  ;;  %v4064_v56 = vld [vmem:[%s5144_s1 + $0x1a8] ss:$16 sps:$4 sm:$0xff]   ;;  %v4065_v57 = vld [vmem:[%s5144_s1 + $0x1c4] ss:$16 sps:$4 sm:$0xff]   ;;  %v4067_v58 = vld [vmem:[%s5144_s1 + $0x1cc] ss:$16 sps:$4 sm:$0xff]  }
  0x22   : > { %v4069_v59 = vld [vmem:[%s5144_s1 + $0x1c0] ss:$16 sps:$4 sm:$0xff]   ;;  %v4070_v60 = vld [vmem:[%s5144_s1 + $0x1c8] ss:$16 sps:$4 sm:$0xff]   ;;  %v4071_v61 = vld [vmem:[%s5144_s1 + $0x1e4] ss:$16 sps:$4 sm:$0xff]  }
  0x23   : > { %1281 = vmatpush1.bf16.msra.mxu0 %v4015_v22  ;;  %1667 = vmatpush1.bf16.msra.mxu1 %v4016_v23  ;;  %v4073_v62 = vld [vmem:[%s5144_s1 + $0x1ec] ss:$16 sps:$4 sm:$0xff]   ;;  %v4075_v63 = vld [vmem:[%s5144_s1 + $0x1e0] ss:$16 sps:$4 sm:$0xff]   ;;  %v4076_v0 = vld [vmem:[%s5144_s1 + $0x1e8] ss:$16 sps:$4 sm:$0xff]  }
  0x24   : > { %1282 = vmatprep.subr.bf16.mxu0 %v4017_v24  ;;  %1668 = vmatprep.subr.bf16.mxu1 %v4019_v25  ;;  %v4082_v1 = vld [vmem:[%s5144_s1 + $0x204] ss:$16 sps:$4 sm:$0xff]   ;;  %v4085_v2 = vld [vmem:[%s5144_s1 + $0x20c] ss:$16 sps:$4 sm:$0xff]   ;;  %v4077_v3 = vld [vmem:[%s4541_s30] ss:$16 sps:$4 sm:$0xff]  }
  0x25   : > { %v4080_v4 = vld [vmem:[%s5144_s1 + $0x200] ss:$16 sps:$4 sm:$0xff]   ;;  %v4083_v5 = vld [vmem:[%s5144_s1 + $0x208] ss:$16 sps:$4 sm:$0xff]   ;;  %v4086_v6 = vld [vmem:[%s4541_s30 + $0x24] ss:$16 sps:$4 sm:$0xff]  }
  0x26   : > { %v4093_v7 = vld [vmem:[%s5144_s1 + $0x224] ss:$16 sps:$4 sm:$0xff]   ;;  %v4097_v8 = vld [vmem:[%s5144_s1 + $0x22c] ss:$16 sps:$4 sm:$0xff]   ;;  %v4091_v9 = vld [vmem:[%s5144_s1 + $0x220] ss:$16 sps:$4 sm:$0xff]  }
  0x27   : > { %1283 = vmatpush1.bf16.msra.mxu0 %v4021_v26  ;;  %1669 = vmatpush1.bf16.msra.mxu1 %v4022_v27  ;;  %v4095_v10 = vld [vmem:[%s5144_s1 + $0x228] ss:$16 sps:$4 sm:$0xff]   ;;  %v4103_v11 = vld [vmem:[%s5144_s1 + $0x244] ss:$16 sps:$4 sm:$0xff]   ;;  %v4108_v12 = vld [vmem:[%s5144_s1 + $0x24c] ss:$16 sps:$4 sm:$0xff]  }
  0x28   : > { %1284 = vmatprep.subr.bf16.mxu0 %v4023_v28  ;;  %1670 = vmatprep.subr.bf16.mxu1 %v4025_v29  ;;  %v4088_v13 = vld [vmem:[%s4541_s30 + $0x20] ss:$16 sps:$4 sm:$0xff]   ;;  %v4089_v14 = vld [vmem:[%s4541_s30 + $0x44] ss:$16 sps:$4 sm:$0xff]   ;;  %v4106_v16 = vld [vmem:[%s5144_s1 + $0x248] ss:$16 sps:$4 sm:$0xff]  }
  0x29   : > { %v4101_v15 = vld [vmem:[%s5144_s1 + $0x240] ss:$16 sps:$4 sm:$0xff]   ;;  %v4115_v17 = vld [vmem:[%s5144_s1 + $0x264] ss:$16 sps:$4 sm:$0xff]   ;;  %v4118_v18 = vld [vmem:[%s5144_s1 + $0x26c] ss:$16 sps:$4 sm:$0xff]  }
  0x2a   : > { %v4113_v19 = vld [vmem:[%s5144_s1 + $0x260] ss:$16 sps:$4 sm:$0xff]   ;;  %v4116_v20 = vld [vmem:[%s5144_s1 + $0x268] ss:$16 sps:$4 sm:$0xff]   ;;  %v4127_v21 = vld [vmem:[%s5144_s1 + $0x284] ss:$16 sps:$4 sm:$0xff]  }
  0x2b   : > { %1285 = vmatpush1.bf16.msra.mxu0 %v4027_v30  ;;  %1671 = vmatpush1.bf16.msra.mxu1 %v4028_v31  ;;  %v4130_v22 = vld [vmem:[%s5144_s1 + $0x28c] ss:$16 sps:$4 sm:$0xff]   ;;  %v4094_v23 = vld [vmem:[%s4541_s30 + $0x40] ss:$16 sps:$4 sm:$0xff]   ;;  %v4098_v24 = vld [vmem:[%s4541_s30 + $0x64] ss:$16 sps:$4 sm:$0xff]  }
  0x2c   : > { %1286 = vmatprep.subr.bf16.mxu0 %v4029_v32  ;;  %1672 = vmatprep.subr.bf16.mxu1 %v4031_v33  ;;  %v4125_v25 = vld [vmem:[%s5144_s1 + $0x280] ss:$16 sps:$4 sm:$0xff]   ;;  %v4128_v26 = vld [vmem:[%s5144_s1 + $0x288] ss:$16 sps:$4 sm:$0xff]   ;;  %v4139_v27 = vld [vmem:[%s5144_s1 + $0x2a4] ss:$16 sps:$4 sm:$0xff]  }
  0x2d   : > { %v4142_v28 = vld [vmem:[%s5144_s1 + $0x2ac] ss:$16 sps:$4 sm:$0xff]   ;;  %v4137_v29 = vld [vmem:[%s5144_s1 + $0x2a0] ss:$16 sps:$4 sm:$0xff]   ;;  %v4140_v31 = vld [vmem:[%s5144_s1 + $0x2a8] ss:$16 sps:$4 sm:$0xff]  }
  0x2e   : > { %v4100_v30 = vld [vmem:[%s4541_s30 + $0x60] ss:$16 sps:$4 sm:$0xff]   ;;  %v4148_v32 = vld [vmem:[%s5144_s1 + $0x2c4] ss:$16 sps:$4 sm:$0xff]   ;;  %v4154_v33 = vld [vmem:[%s5144_s1 + $0x2cc] ss:$16 sps:$4 sm:$0xff]  }
  0x2f   : > { %1287 = vmatpush1.bf16.msra.mxu0 %v4033_v34  ;;  %1673 = vmatpush1.bf16.msra.mxu1 %v4034_v35  ;;  %v4104_v34 = vld [vmem:[%s4541_s30 + $0x84] ss:$16 sps:$4 sm:$0xff]   ;;  %v4146_v35 = vld [vmem:[%s5144_s1 + $0x2c0] ss:$16 sps:$4 sm:$0xff]   ;;  %s3059_s14 = sshll.u32 %s218_s13, 7  ;;  %s3364_s16 = sshll.u32 %s4375_s22, 11 }
  0x30   : > { %1288 = vmatprep.subr.bf16.mxu0 %v4035_v36  ;;  %1674 = vmatprep.subr.bf16.mxu1 %v4037_v37  ;;  %v4152_v36 = vld [vmem:[%s5144_s1 + $0x2c8] ss:$16 sps:$4 sm:$0xff]   ;;  %v4160_v37 = vld [vmem:[%s5144_s1 + $0x2e4] ss:$16 sps:$4 sm:$0xff]   ;;  %s5043_s15 = scalar_lea.vmem [#allocation2], %s3059_s14  ;;  %s5095_s17 = scalar_lea.hbm %s5148_s5, %s3364_s16 }
  0x31   : > { %s2993_s23 = sshll.u32 %s5043_s15, 4  ;;  %s5102_s6 = scalar_lea.sflag [#allocation3], %s218_s13  ;;  %s5097_s23 = int_to_ptr.vmem [resolvable:$true] %s2993_s23 }
  0x32   : > { %s4257_s7 = scalar_lea.vmem %s5097_s23, 2048  ;;  %s4321_s22 = smov [#allocation2]  }
  0x33   : > { %1289 = vmatpush1.bf16.msra.mxu0 %v4039_v38  ;;  %1675 = vmatpush1.bf16.msra.mxu1 %v4040_v39  ;;  %v4163_v38 = vld [vmem:[%s5144_s1 + $0x2ec] ss:$16 sps:$4 sm:$0xff]   ;;  %v390_v39 = vld [vmem:[%s5144_s1 + $0x300] sm:$0xff]  ;;  %p4258_p11 = scmp.ne.s32.totalorder %s5097_s23, %s4257_s7  ;;  %s4261_s8 = sshll.u32 %s4321_s22, 4  ;;  %s4262_s8 = int_to_ptr.vmem [resolvable:$false] %s4261_s8 }
  0x34   : > { %1290 = vmatprep.subr.bf16.mxu0 %v4041_v40  ;;  %1676 = vmatprep.subr.bf16.mxu1 %v4043_v41  ;;  %v391_v40 = vld [vmem:[%s5144_s1 + $0x308] sm:$0xff]  ;;  %v4158_v41 = vld [vmem:[%s5144_s1 + $0x2e0] ss:$16 sps:$4 sm:$0xff]   ;;  %s4263_s9 = scalar_lea.vmem %s4262_s8, 4096  ;;  %p4264_p0 = scmp.lt.s32.totalorder %s5097_s23, %s4262_s8 }
  0x35   : > { %v3225_v48 = vcombine.low %v391_v40, %v391_v40  ;;  %p4259_p12 = pnand %p4258_p11, %p4392_p5  ;;  %p4265_p1 = scmp.lt.s32.totalorder %s4263_s9, %s4257_s7 }
  0x37   : > { %1291 = vmatpush1.bf16.msra.mxu0 %v4045_v42  ;;  %1677 = vmatpush1.bf16.msra.mxu1 %v4046_v43  ;;  %v4161_v42 = vld [vmem:[%s5144_s1 + $0x2e8] ss:$16 sps:$4 sm:$0xff]   ;;  %v4109_v43 = vld [vmem:[%s4541_s30 + $0x80] ss:$16 sps:$4 sm:$0xff]   ;;  %p4260_p13 = pneg %p4259_p12  ;;  %p4266_p2 = por %p4265_p1, %p4264_p0 }
  0x38   : > { %1292 = vmatprep.subr.bf16.mxu0 %v4047_v44  ;;  %1678 = vmatprep.subr.bf16.mxu1 %v4049_v45  ;;  %v3224_v44 = vcombine.high %v390_v39, %v390_v39  ;;  %v4110_v45 = vld [vmem:[%s4541_s30 + $0xa4] ss:$16 sps:$4 sm:$0xff]  }
  0x39   : > { %p4267_p3 = pnand %p4266_p2, %p4260_p13 }
  0x3b   : > { %1293 = vmatpush1.bf16.msra.mxu0 %v4051_v46  ;;  %1679 = vmatpush1.bf16.msra.mxu1 %v4052_v47  ;;  %v3223_v46 = vcombine.low %v390_v39, %v390_v39  ;;  %v3226_v47 = vcombine.high %v391_v40, %v391_v40  ;;  %v4249_v39 = vld [vmem:[%s5146_s3 + $0x70] sm:$0xff]  }
  0x3c   : > { %1294 = vmatprep.subr.bf16.mxu0 %v4053_v49  ;;  %1680 = vmatprep.subr.bf16.mxu1 %v4055_v50  ;;  %v1265_v50 = vsel %vm1257_vm0, %v3225_v48, 0  ;;  %v4251_v40 = vld [vmem:[%s5146_s3 + $0xf0] sm:$0xff]   ;;  %v4256_v48 = vld [vmem:[%s5146_s3 + $0xb8] sm:$0xff]  }
  0x3d   : > { %v1259_v49 = vsel %vm1257_vm0, %v3223_v46, 0  ;;  %v4255_v46 = vld [vmem:[%s5146_s3 + $0xf8] sm:$0xff]  }
  0x3f   : > { %1295 = vmatpush1.bf16.msra.mxu0 %v4057_v51  ;;  %1681 = vmatpush1.bf16.msra.mxu1 %v4058_v52  ;;  %v4112_v51 = vld [vmem:[%s4541_s30 + $0xa0] ss:$16 sps:$4 sm:$0xff]   ;;  %v4119_v52 = vld [vmem:[%s4541_s30 + $0xc4] ss:$16 sps:$4 sm:$0xff]  }
  0x40   : > { %1296 = vmatprep.subr.bf16.mxu0 %v4059_v53  ;;  %1682 = vmatprep.subr.bf16.mxu1 %v4061_v54  ;;  %v4121_v53 = vld [vmem:[%s4541_s30 + $0xc0] ss:$16 sps:$4 sm:$0xff]   ;;  %v4122_v54 = vld [vmem:[%s4541_s30 + $0xe4] ss:$16 sps:$4 sm:$0xff]  }
  0x43   : > { %1297 = vmatpush1.bf16.msra.mxu0 %v4063_v55  ;;  %1683 = vmatpush1.bf16.msra.mxu1 %v4064_v56  ;;  %v4124_v55 = vld [vmem:[%s4541_s30 + $0xe0] ss:$16 sps:$4 sm:$0xff]   ;;  %v4131_v56 = vld [vmem:[%s4541_s30 + $0x104] ss:$16 sps:$4 sm:$0xff]  }
  0x44   : > { %1298 = vmatprep.subr.bf16.mxu0 %v4065_v57  ;;  %1684 = vmatprep.subr.bf16.mxu1 %v4067_v58  ;;  %v4133_v57 = vld [vmem:[%s4541_s30 + $0x100] ss:$16 sps:$4 sm:$0xff]   ;;  %v4134_v58 = vld [vmem:[%s4541_s30 + $0x124] ss:$16 sps:$4 sm:$0xff]  }
  0x47   : > { %1299 = vmatpush1.bf16.msra.mxu0 %v4069_v59  ;;  %1685 = vmatpush1.bf16.msra.mxu1 %v4070_v60  ;;  %v4136_v59 = vld [vmem:[%s4541_s30 + $0x120] ss:$16 sps:$4 sm:$0xff]   ;;  %v4143_v60 = vld [vmem:[%s4541_s30 + $0x144] ss:$16 sps:$4 sm:$0xff]  }
  0x48   : > { %1300 = vmatprep.subr.bf16.mxu0 %v4071_v61  ;;  %1686 = vmatprep.subr.bf16.mxu1 %v4073_v62  ;;  %v4145_v61 = vld [vmem:[%s4541_s30 + $0x140] ss:$16 sps:$4 sm:$0xff]   ;;  %v4149_v62 = vld [vmem:[%s4541_s30 + $0x164] ss:$16 sps:$4 sm:$0xff]  }
  0x4b   : > { %1301 = vmatpush1.bf16.msra.mxu0 %v4075_v63  ;;  %1687 = vmatpush1.bf16.msra.mxu1 %v4076_v0  ;;  %v4151_v63 = vld [vmem:[%s4541_s30 + $0x160] ss:$16 sps:$4 sm:$0xff]   ;;  %v4155_v0 = vld [vmem:[%s4541_s30 + $0x184] ss:$16 sps:$4 sm:$0xff]  }
  0x4c   : > { %1463 = vmatprep.subr.bf16.mxu0 %v4082_v1  ;;  %1849 = vmatprep.subr.bf16.mxu1 %v4085_v2  ;;  %v4213_v1 = vld [vmem:[%s5146_s3 + $0x40] sm:$0xff]  }
  0x4d   : > { %v4157_v2 = vld [vmem:[%s4541_s30 + $0x180] ss:$16 sps:$4 sm:$0xff]  }
  0x4e   : > { %1303 = vmatmul.mubr.bf16.vlgmr.msra.gmra.mrb[0].mxu0 %v4077_v3  ;;  %1689 = vmatmul.mubr.bf16.vlgmr.msra.gmra.mrb[0].mxu1 %v4077_v3  ;;  %v4164_v3 = vld [vmem:[%s4541_s30 + $0x1a4] ss:$16 sps:$4 sm:$0xff]  }
  0x4f   : > { %1464 = vmatpush1.bf16.msra.mxu0 %v4080_v4  ;;  %1850 = vmatpush1.bf16.msra.mxu1 %v4083_v5  ;;  %v4218_v4 = vld [vmem:[%s5146_s3 + $0xc0] sm:$0xff]  }
  0x50   : > { %1312 = vmatprep.mubr.bf16.mxu0 %v4086_v6  ;;  %1698 = vmatprep.mubr.bf16.mxu1 %v4086_v6  ;;  %v4166_v5 = vld [vmem:[%s4541_s30 + $0x1a0] ss:$16 sps:$4 sm:$0xff]   ;;  %v4167_v6 = vld [vmem:[%s4541_s30 + $0x1c4] ss:$16 sps:$4 sm:$0xff]  }
  0x51   : > { %1465 = vmatprep.subr.bf16.mxu0 %v4093_v7  ;;  %1851 = vmatprep.subr.bf16.mxu1 %v4097_v8  ;;  %v4169_v7 = vld [vmem:[%s4541_s30 + $0x1c0] ss:$16 sps:$4 sm:$0xff]   ;;  %v4174_v8 = vld [vmem:[%s4541_s30 + $0x1e4] ss:$16 sps:$4 sm:$0xff]  }
  0x53   : > { %1466 = vmatpush1.bf16.msra.mxu0 %v4091_v9  ;;  %1852 = vmatpush1.bf16.msra.mxu1 %v4095_v10  ;;  %v4176_v9 = vld [vmem:[%s4541_s30 + $0x1e0] ss:$16 sps:$4 sm:$0xff]   ;;  %v4179_v10 = vld [vmem:[%s4541_s30 + $0xc] ss:$16 sps:$4 sm:$0xff]  }
  0x54   : > { %1467 = vmatprep.subr.bf16.mxu0 %v4103_v11  ;;  %1853 = vmatprep.subr.bf16.mxu1 %v4108_v12  ;;  %v4177_v11 = vld [vmem:[%s4541_s30 + $0x8] ss:$16 sps:$4 sm:$0xff]   ;;  %v4180_v12 = vld [vmem:[%s4541_s30 + $0x2c] ss:$16 sps:$4 sm:$0xff]  }
  0x56   : > { %1313 = vmatmul.mubr.bf16.gmra.mrb[4].mxu0 %v4088_v13  ;;  %1699 = vmatmul.mubr.bf16.gmra.mrb[4].mxu1 %v4088_v13  ;;  %v4216_v13 = vld [vmem:[%s5146_s3] sm:$0xff]  }
  0x57   : > { %1322 = vmatprep.mubr.bf16.mxu0 %v4089_v14  ;;  %1708 = vmatprep.mubr.bf16.mxu1 %v4089_v14  ;;  %v4219_v14 = vld [vmem:[%s5146_s3 + $0x80] sm:$0xff]  }
  0x58   : > { %1468 = vmatpush1.bf16.msra.mxu0 %v4101_v15  ;;  %1854 = vmatpush1.bf16.msra.mxu1 %v4106_v16  ;;  %v4223_v15 = vld [vmem:[%s5146_s3 + $0x48] sm:$0xff]  }
  0x59   : > { %1469 = vmatprep.subr.bf16.mxu0 %v4115_v17  ;;  %1855 = vmatprep.subr.bf16.mxu1 %v4118_v18  ;;  %v4228_v16 = vld [vmem:[%s5146_s3 + $0xc8] sm:$0xff]  }
  0x5a   : > { %v4226_v17 = vld [vmem:[%s5146_s3 + $0x8] sm:$0xff]  }
  0x5b   : > { %v4229_v18 = vld [vmem:[%s5146_s3 + $0x88] sm:$0xff]  }
  0x5c   : > { %1470 = vmatpush1.bf16.msra.mxu0 %v4113_v19  ;;  %1856 = vmatpush1.bf16.msra.mxu1 %v4116_v20  ;;  %v4233_v19 = vld [vmem:[%s5146_s3 + $0x50] sm:$0xff]  }
  0x5d   : > { %1471 = vmatprep.subr.bf16.mxu0 %v4127_v21  ;;  %1857 = vmatprep.subr.bf16.mxu1 %v4130_v22  ;;  %v4235_v20 = vld [vmem:[%s5146_s3 + $0xd0] sm:$0xff]   ;;  %v4182_v21 = vld [vmem:[%s4541_s30 + $0x28] ss:$16 sps:$4 sm:$0xff]   ;;  %v4183_v22 = vld [vmem:[%s4541_s30 + $0x4c] ss:$16 sps:$4 sm:$0xff]  }
  0x5e   : > { %1323 = vmatmul.mubr.bf16.gmra.mrb[8].mxu0 %v4094_v23  ;;  %1709 = vmatmul.mubr.bf16.gmra.mrb[8].mxu1 %v4094_v23  ;;  %v4234_v23 = vld [vmem:[%s5146_s3 + $0x10] sm:$0xff]  }
  0x5f   : > { %1332 = vmatprep.mubr.bf16.mxu0 %v4098_v24  ;;  %1718 = vmatprep.mubr.bf16.mxu1 %v4098_v24  ;;  %v4236_v24 = vld [vmem:[%s5146_s3 + $0x90] sm:$0xff]  }
  0x60   : > { %1472 = vmatpush1.bf16.msra.mxu0 %v4125_v25  ;;  %1858 = vmatpush1.bf16.msra.mxu1 %v4128_v26  ;;  %v4237_v25 = vld [vmem:[%s5146_s3 + $0x58] sm:$0xff]  }
  0x61   : > { %1473 = vmatprep.subr.bf16.mxu0 %v4139_v27  ;;  %1859 = vmatprep.subr.bf16.mxu1 %v4142_v28  ;;  %v4239_v26 = vld [vmem:[%s5146_s3 + $0xd8] sm:$0xff]  }
  0x62   : > { %v4238_v27 = vld [vmem:[%s5146_s3 + $0x18] sm:$0xff]  }
  0x63   : > { %v4240_v28 = vld [vmem:[%s5146_s3 + $0x98] sm:$0xff]  }
  0x64   : > { %1474 = vmatpush1.bf16.msra.mxu0 %v4137_v29  ;;  %1860 = vmatpush1.bf16.msra.mxu1 %v4140_v31  ;;  %v4241_v29 = vld [vmem:[%s5146_s3 + $0x60] sm:$0xff]   ;;  %v4185_v31 = vld [vmem:[%s4541_s30 + $0x48] ss:$16 sps:$4 sm:$0xff]  }
  0x65   : > { %1475 = vmatprep.subr.bf16.mxu0 %v4148_v32  ;;  %1861 = vmatprep.subr.bf16.mxu1 %v4154_v33  ;;  %v4186_v32 = vld [vmem:[%s4541_s30 + $0x6c] ss:$16 sps:$4 sm:$0xff]   ;;  %v4242_v33 = vld [vmem:[%s5146_s3 + $0x20] sm:$0xff]  }
  0x66   : > { %1333 = vmatmul.mubr.bf16.gmra.mrb[12].mxu0 %v4100_v30  ;;  %1719 = vmatmul.mubr.bf16.gmra.mrb[12].mxu1 %v4100_v30  ;;  %v4243_v30 = vld [vmem:[%s5146_s3 + $0xe0] sm:$0xff]  }
  0x67   : > { %1342 = vmatprep.mubr.bf16.mxu0 %v4104_v34  ;;  %1728 = vmatprep.mubr.bf16.mxu1 %v4104_v34  ;;  %v4244_v34 = vld [vmem:[%s5146_s3 + $0xa0] sm:$0xff]  }
  0x68   : > { %1476 = vmatpush1.bf16.msra.mxu0 %v4146_v35  ;;  %1862 = vmatpush1.bf16.msra.mxu1 %v4152_v36  ;;  %v4245_v35 = vld [vmem:[%s5146_s3 + $0x68] sm:$0xff]  }
  0x69   : > { %1477 = vmatprep.subr.bf16.mxu0 %v4160_v37  ;;  %1863 = vmatprep.subr.bf16.mxu1 %v4163_v38  ;;  %v4247_v36 = vld [vmem:[%s5146_s3 + $0xe8] sm:$0xff]  }
  0x6a   : > { %v4246_v37 = vld [vmem:[%s5146_s3 + $0x28] sm:$0xff]  }
  0x6b   : > { %v4248_v38 = vld [vmem:[%s5146_s3 + $0xa8] sm:$0xff]  }
  0x6c   : > { %1478 = vmatpush1.bf16.msra.mxu0 %v4158_v41  ;;  %1864 = vmatpush1.bf16.msra.mxu1 %v4161_v42  ;;  %v4188_v41 = vld [vmem:[%s4541_s30 + $0x68] ss:$16 sps:$4 sm:$0xff]   ;;  %v4189_v42 = vld [vmem:[%s4541_s30 + $0x8c] ss:$16 sps:$4 sm:$0xff]  }
  0x6d   : > { %3227 = vmatprep.subr.msk.bf16.mxu0 %vm1257_vm0, %v3224_v44  ;;  %3244 = vmatprep.subr.msk.bf16.mxu1 %vm1257_vm0, %v3226_v47  ;;  %v4252_v44 = vld [vmem:[%s5146_s3 + $0xb0] sm:$0xff]   ;;  %v4254_v47 = vld [vmem:[%s5146_s3 + $0x38] sm:$0xff]  }
  0x6e   : > { %1343 = vmatmul.mubr.bf16.gmra.mrb[16].mxu0 %v4109_v43  ;;  %1729 = vmatmul.mubr.bf16.gmra.mrb[16].mxu1 %v4109_v43  ;;  %v4250_v43 = vld [vmem:[%s5146_s3 + $0x30] sm:$0xff]  }
  0x6f   : > { %1352 = vmatprep.mubr.bf16.mxu0 %v4110_v45  ;;  %1738 = vmatprep.mubr.bf16.mxu1 %v4110_v45  ;;  %v4253_v45 = vld [vmem:[%s5146_s3 + $0x78] sm:$0xff]  }
  0x70   : > { %1480 = vmatpush1.bf16.msra.mxu0 %v1259_v49  ;;  %1866 = vmatpush1.bf16.msra.mxu1 %v1265_v50  ;;  %v4191_v49 = vld [vmem:[%s4541_s30 + $0x88] ss:$16 sps:$4 sm:$0xff]   ;;  %v4192_v50 = vld [vmem:[%s4541_s30 + $0xac] ss:$16 sps:$4 sm:$0xff]  }
  0x71   : > { %3460 = vmatprep.subr.bf16.mxu0 %v4213_v1  ;;  %3572 = vmatprep.subr.bf16.mxu1 %v4218_v4  ;;  %v4217_v1 = vld [vmem:[%s4541_s30 + $0x188] ss:$16 sps:$4 sm:$0xff]   ;;  %v4224_v4 = vld [vmem:[%s4541_s30 + $0x1cc] ss:$16 sps:$4 sm:$0xff]  }
  0x76   : > { %1353 = vmatmul.mubr.bf16.gmra.mrb[20].mxu0 %v4112_v51  ;;  %1739 = vmatmul.mubr.bf16.gmra.mrb[20].mxu1 %v4112_v51  ;;  %v4194_v51 = vld [vmem:[%s4541_s30 + $0xa8] ss:$16 sps:$4 sm:$0xff]  }
  0x77   : > { %1362 = vmatprep.mubr.bf16.mxu0 %v4119_v52  ;;  %1748 = vmatprep.mubr.bf16.mxu1 %v4119_v52  ;;  %v4195_v52 = vld [vmem:[%s4541_s30 + $0xcc] ss:$16 sps:$4 sm:$0xff]  }
  0x7e   : > { %1363 = vmatmul.mubr.bf16.gmra.mrb[24].mxu0 %v4121_v53  ;;  %1749 = vmatmul.mubr.bf16.gmra.mrb[24].mxu1 %v4121_v53  ;;  %v4197_v53 = vld [vmem:[%s4541_s30 + $0xc8] ss:$16 sps:$4 sm:$0xff]  }
  0x7f   : > { %1372 = vmatprep.mubr.bf16.mxu0 %v4122_v54  ;;  %1758 = vmatprep.mubr.bf16.mxu1 %v4122_v54  ;;  %v4198_v54 = vld [vmem:[%s4541_s30 + $0xec] ss:$16 sps:$4 sm:$0xff]  }
  0x86   : > { %1373 = vmatmul.mubr.bf16.gmra.mrb[28].mxu0 %v4124_v55  ;;  %1759 = vmatmul.mubr.bf16.gmra.mrb[28].mxu1 %v4124_v55  ;;  %v4200_v55 = vld [vmem:[%s4541_s30 + $0xe8] ss:$16 sps:$4 sm:$0xff]  }
  0x87   : > { %1382 = vmatprep.mubr.bf16.mxu0 %v4131_v56  ;;  %1768 = vmatprep.mubr.bf16.mxu1 %v4131_v56  ;;  %v4201_v56 = vld [vmem:[%s4541_s30 + $0x10c] ss:$16 sps:$4 sm:$0xff]  }
  0x8e   : > { %1383 = vmatmul.mubr.bf16.gmra.mrb[32].mxu0 %v4133_v57  ;;  %1769 = vmatmul.mubr.bf16.gmra.mrb[32].mxu1 %v4133_v57  ;;  %v4203_v57 = vld [vmem:[%s4541_s30 + $0x108] ss:$16 sps:$4 sm:$0xff]  }
  0x8f   : > { %1392 = vmatprep.mubr.bf16.mxu0 %v4134_v58  ;;  %1778 = vmatprep.mubr.bf16.mxu1 %v4134_v58  ;;  %v4204_v58 = vld [vmem:[%s4541_s30 + $0x12c] ss:$16 sps:$4 sm:$0xff]  }
  0x96   : > { %1393 = vmatmul.mubr.bf16.gmra.mrb[36].mxu0 %v4136_v59  ;;  %1779 = vmatmul.mubr.bf16.gmra.mrb[36].mxu1 %v4136_v59  ;;  %v4206_v59 = vld [vmem:[%s4541_s30 + $0x128] ss:$16 sps:$4 sm:$0xff]  }
  0x97   : > { %1402 = vmatprep.mubr.bf16.mxu0 %v4143_v60  ;;  %1788 = vmatprep.mubr.bf16.mxu1 %v4143_v60  ;;  %v4207_v60 = vld [vmem:[%s4541_s30 + $0x14c] ss:$16 sps:$4 sm:$0xff]  }
  0x9e   : > { %1403 = vmatmul.mubr.bf16.gmra.mrb[40].mxu0 %v4145_v61  ;;  %1789 = vmatmul.mubr.bf16.gmra.mrb[40].mxu1 %v4145_v61  ;;  %v4209_v61 = vld [vmem:[%s4541_s30 + $0x148] ss:$16 sps:$4 sm:$0xff]  }
  0x9f   : > { %1412 = vmatprep.mubr.bf16.mxu0 %v4149_v62  ;;  %1798 = vmatprep.mubr.bf16.mxu1 %v4149_v62  ;;  %v4210_v62 = vld [vmem:[%s4541_s30 + $0x16c] ss:$16 sps:$4 sm:$0xff]  }
  0xa6   : > { %1413 = vmatmul.mubr.bf16.gmra.mrb[44].mxu0 %v4151_v63  ;;  %1799 = vmatmul.mubr.bf16.gmra.mrb[44].mxu1 %v4151_v63  ;;  %v4212_v63 = vld [vmem:[%s4541_s30 + $0x168] ss:$16 sps:$4 sm:$0xff]  }
  0xa7   : > { %1422 = vmatprep.mubr.bf16.mxu0 %v4155_v0  ;;  %1808 = vmatprep.mubr.bf16.mxu1 %v4155_v0  ;;  %v4214_v0 = vld [vmem:[%s4541_s30 + $0x18c] ss:$16 sps:$4 sm:$0xff]  }
  0xae   : > { %1423 = vmatmul.mubr.bf16.gmra.mrb[48].mxu0 %v4157_v2  ;;  %1809 = vmatmul.mubr.bf16.gmra.mrb[48].mxu1 %v4157_v2  ;;  %v4220_v2 = vld [vmem:[%s4541_s30 + $0x1ac] ss:$16 sps:$4 sm:$0xff]  }
  0xaf   : > { %1432 = vmatprep.mubr.bf16.mxu0 %v4164_v3  ;;  %1818 = vmatprep.mubr.bf16.mxu1 %v4164_v3  ;;  %v4222_v3 = vld [vmem:[%s4541_s30 + $0x1a8] ss:$16 sps:$4 sm:$0xff]  }
  0xb6   : > { %1433 = vmatmul.mubr.bf16.gmra.mrb[52].mxu0 %v4166_v5  ;;  %1819 = vmatmul.mubr.bf16.gmra.mrb[52].mxu1 %v4166_v5  ;;  %v4227_v5 = vld [vmem:[%s4541_s30 + $0x1c8] ss:$16 sps:$4 sm:$0xff]  }
  0xb7   : > { %1442 = vmatprep.mubr.bf16.mxu0 %v4167_v6  ;;  %1828 = vmatprep.mubr.bf16.mxu1 %v4167_v6  ;;  %v4230_v6 = vld [vmem:[%s4541_s30 + $0x1ec] ss:$16 sps:$4 sm:$0xff]  }
  0xbe   : > { %1443 = vmatmul.mubr.bf16.gmra.mrb[56].mxu0 %v4169_v7  ;;  %1829 = vmatmul.mubr.bf16.gmra.mrb[56].mxu1 %v4169_v7  ;;  %v4232_v7 = vld [vmem:[%s4541_s30 + $0x1e8] ss:$16 sps:$4 sm:$0xff]  }
  0xbf   : > { %1452 = vmatprep.mubr.bf16.mxu0 %v4174_v8  ;;  %1838 = vmatprep.mubr.bf16.mxu1 %v4174_v8  ;;  %v394_v8 = vlaneseq }
  0xc6   : > { %1453 = vmatmul.mubr.bf16.gmra.mrb[60].mxu0 %v4176_v9  ;;  %1839 = vmatmul.mubr.bf16.gmra.mrb[60].mxu1 %v4176_v9  ;;  %v395_v9 = vshrl.u32 %v394_v8, 7 }
  0xc7   : > { %3228 = vmatprep.mubr.msk.bf16.mxu0 %vm1208_vm1, %v4179_v10  ;;  %3245 = vmatprep.mubr.msk.bf16.mxu1 %vm1208_vm1, %v4179_v10 }
  0xc8   : > { %v396_v10 = vsub.s32 0, %v395_v9 }
  0xce   : > { %1496 = vmatmul.mubr.bf16.vlgmr.msra.gmra.mrb[0].mxu0 %v4177_v11  ;;  %1882 = vmatmul.mubr.bf16.vlgmr.msra.gmra.mrb[0].mxu1 %v4177_v11  ;;  %v404_v11 = vsub.s32 2, %v395_v9 }
  0xcf   : > { %3229 = vmatprep.mubr.msk.bf16.mxu0 %vm1208_vm1, %v4180_v12  ;;  %3246 = vmatprep.mubr.msk.bf16.mxu1 %vm1208_vm1, %v4180_v12  ;;  %v392_v12 = vld [vmem:[%s5145_s2] sm:$0xf] }
  0xd0   : > { %3461 = vmatpush3.bf16.msra.mxu0 %v4216_v13  ;;  %3573 = vmatpush3.bf16.msra.mxu1 %v4219_v14  ;;  %v400_v13 = vsub.s32 1, %v395_v9  ;;  %v408_v14 = vsub.s32 3, %v395_v9 }
  0xd1   : > { %3462 = vmatprep.subr.bf16.mxu0 %v4223_v15  ;;  %3574 = vmatprep.subr.bf16.mxu1 %v4228_v16  ;;  %v4897_v15 = vrot.slane %v392_v12, %v396_v10  ;;  %v4899_v16 = vrot.slane %v392_v12, %v404_v11 }
  0xd4   : > { %3463 = vmatpush3.bf16.msra.mxu0 %v4226_v17  ;;  %3575 = vmatpush3.bf16.msra.mxu1 %v4229_v18  ;;  %v4901_v17 = vrot.slane %v392_v12, %v400_v13  ;;  %v4903_v18 = vrot.slane %v392_v12, %v408_v14 }
  0xd5   : > { %3464 = vmatprep.subr.bf16.mxu0 %v4233_v19  ;;  %3576 = vmatprep.subr.bf16.mxu1 %v4235_v20 }
  0xd6   : > { %1506 = vmatmul.mubr.bf16.gmra.mrb[4].mxu0 %v4182_v21  ;;  %1892 = vmatmul.mubr.bf16.gmra.mrb[4].mxu1 %v4182_v21 }
  0xd7   : > { %3230 = vmatprep.mubr.msk.bf16.mxu0 %vm1208_vm1, %v4183_v22  ;;  %3247 = vmatprep.mubr.msk.bf16.mxu1 %vm1208_vm1, %v4183_v22 }
  0xd8   : > { %3465 = vmatpush3.bf16.msra.mxu0 %v4234_v23  ;;  %3577 = vmatpush3.bf16.msra.mxu1 %v4236_v24 }
  0xd9   : > { %3466 = vmatprep.subr.bf16.mxu0 %v4237_v25  ;;  %3578 = vmatprep.subr.bf16.mxu1 %v4239_v26 }
  0xdc   : > { %3467 = vmatpush3.bf16.msra.mxu0 %v4238_v27  ;;  %3579 = vmatpush3.bf16.msra.mxu1 %v4240_v28 }
  0xdd   : > { %3468 = vmatprep.subr.bf16.mxu0 %v4241_v29  ;;  %3580 = vmatprep.subr.bf16.mxu1 %v4243_v30 }
  0xde   : > { %1516 = vmatmul.mubr.bf16.gmra.mrb[8].mxu0 %v4185_v31  ;;  %1902 = vmatmul.mubr.bf16.gmra.mrb[8].mxu1 %v4185_v31 }
  0xdf   : > { %3231 = vmatprep.mubr.msk.bf16.mxu0 %vm1208_vm1, %v4186_v32  ;;  %3248 = vmatprep.mubr.msk.bf16.mxu1 %vm1208_vm1, %v4186_v32 }
  0xe0   : > { %3469 = vmatpush3.bf16.msra.mxu0 %v4242_v33  ;;  %3581 = vmatpush3.bf16.msra.mxu1 %v4244_v34 }
  0xe1   : > { %3470 = vmatprep.subr.bf16.mxu0 %v4245_v35  ;;  %3582 = vmatprep.subr.bf16.mxu1 %v4247_v36 }
  0xe4   : > { %3471 = vmatpush3.bf16.msra.mxu0 %v4246_v37  ;;  %3583 = vmatpush3.bf16.msra.mxu1 %v4248_v38 }
  0xe5   : > { %3472 = vmatprep.subr.bf16.mxu0 %v4249_v39  ;;  %3584 = vmatprep.subr.bf16.mxu1 %v4251_v40 }
  0xe6   : > { %1526 = vmatmul.mubr.bf16.gmra.mrb[12].mxu0 %v4188_v41  ;;  %1912 = vmatmul.mubr.bf16.gmra.mrb[12].mxu1 %v4188_v41 }
  0xe7   : > { %3232 = vmatprep.mubr.msk.bf16.mxu0 %vm1208_vm1, %v4189_v42  ;;  %3249 = vmatprep.mubr.msk.bf16.mxu1 %vm1208_vm1, %v4189_v42 }
  0xe8   : > { %3473 = vmatpush3.bf16.msra.mxu0 %v4250_v43  ;;  %3585 = vmatpush3.bf16.msra.mxu1 %v4252_v44 }
  0xe9   : > { %3474 = vmatprep.subr.bf16.mxu0 %v4253_v45  ;;  %3586 = vmatprep.subr.bf16.mxu1 %v4255_v46 }
  0xec   : > { %3475 = vmatpush3.bf16.msra.mxu0 %v4254_v47  ;;  %3587 = vmatpush3.bf16.msra.mxu1 %v4256_v48 }
  0xee   : > { %1536 = vmatmul.mubr.bf16.gmra.mrb[16].mxu0 %v4191_v49  ;;  %1922 = vmatmul.mubr.bf16.gmra.mrb[16].mxu1 %v4191_v49 }
  0xef   : > { %3233 = vmatprep.mubr.msk.bf16.mxu0 %vm1208_vm1, %v4192_v50  ;;  %3250 = vmatprep.mubr.msk.bf16.mxu1 %vm1208_vm1, %v4192_v50 }
  0xf6   : > { %1546 = vmatmul.mubr.bf16.gmra.mrb[20].mxu0 %v4194_v51  ;;  %1932 = vmatmul.mubr.bf16.gmra.mrb[20].mxu1 %v4194_v51 }
  0xf7   : > { %3234 = vmatprep.mubr.msk.bf16.mxu0 %vm1208_vm1, %v4195_v52  ;;  %3251 = vmatprep.mubr.msk.bf16.mxu1 %vm1208_vm1, %v4195_v52 }
  0xfe   : > { %1556 = vmatmul.mubr.bf16.gmra.mrb[24].mxu0 %v4197_v53  ;;  %1942 = vmatmul.mubr.bf16.gmra.mrb[24].mxu1 %v4197_v53 }
  0xff   : > { %3235 = vmatprep.mubr.msk.bf16.mxu0 %vm1208_vm1, %v4198_v54  ;;  %3252 = vmatprep.mubr.msk.bf16.mxu1 %vm1208_vm1, %v4198_v54 }
 0x106   : > { %1566 = vmatmul.mubr.bf16.gmra.mrb[28].mxu0 %v4200_v55  ;;  %1952 = vmatmul.mubr.bf16.gmra.mrb[28].mxu1 %v4200_v55 }
 0x107   : > { %3236 = vmatprep.mubr.msk.bf16.mxu0 %vm1208_vm1, %v4201_v56  ;;  %3253 = vmatprep.mubr.msk.bf16.mxu1 %vm1208_vm1, %v4201_v56 }
 0x10e   : > { %1576 = vmatmul.mubr.bf16.gmra.mrb[32].mxu0 %v4203_v57  ;;  %1962 = vmatmul.mubr.bf16.gmra.mrb[32].mxu1 %v4203_v57 }
 0x10f   : > { %3237 = vmatprep.mubr.msk.bf16.mxu0 %vm1208_vm1, %v4204_v58  ;;  %3254 = vmatprep.mubr.msk.bf16.mxu1 %vm1208_vm1, %v4204_v58 }
 0x116   : > { %1586 = vmatmul.mubr.bf16.gmra.mrb[36].mxu0 %v4206_v59  ;;  %1972 = vmatmul.mubr.bf16.gmra.mrb[36].mxu1 %v4206_v59 }
 0x117   : > { %3238 = vmatprep.mubr.msk.bf16.mxu0 %vm1208_vm1, %v4207_v60  ;;  %3255 = vmatprep.mubr.msk.bf16.mxu1 %vm1208_vm1, %v4207_v60 }
 0x11e   : > { %1596 = vmatmul.mubr.bf16.gmra.mrb[40].mxu0 %v4209_v61  ;;  %1982 = vmatmul.mubr.bf16.gmra.mrb[40].mxu1 %v4209_v61 }
 0x11f   : > { %3239 = vmatprep.mubr.msk.bf16.mxu0 %vm1208_vm1, %v4210_v62  ;;  %3256 = vmatprep.mubr.msk.bf16.mxu1 %vm1208_vm1, %v4210_v62 }
 0x126   : > { %1606 = vmatmul.mubr.bf16.gmra.mrb[44].mxu0 %v4212_v63  ;;  %1992 = vmatmul.mubr.bf16.gmra.mrb[44].mxu1 %v4212_v63 }
 0x127   : > { %3240 = vmatprep.mubr.msk.bf16.mxu0 %vm1208_vm1, %v4214_v0  ;;  %3257 = vmatprep.mubr.msk.bf16.mxu1 %vm1208_vm1, %v4214_v0 }
 0x12e   : > { %1616 = vmatmul.mubr.bf16.gmra.mrb[48].mxu0 %v4217_v1  ;;  %2002 = vmatmul.mubr.bf16.gmra.mrb[48].mxu1 %v4217_v1 }
 0x12f   : > { %3241 = vmatprep.mubr.msk.bf16.mxu0 %vm1208_vm1, %v4220_v2  ;;  %3258 = vmatprep.mubr.msk.bf16.mxu1 %vm1208_vm1, %v4220_v2 }
 0x136   : > { %1626 = vmatmul.mubr.bf16.gmra.mrb[52].mxu0 %v4222_v3  ;;  %2012 = vmatmul.mubr.bf16.gmra.mrb[52].mxu1 %v4222_v3 }
 0x137   : > { %3242 = vmatprep.mubr.msk.bf16.mxu0 %vm1208_vm1, %v4224_v4  ;;  %3259 = vmatprep.mubr.msk.bf16.mxu1 %vm1208_vm1, %v4224_v4 }
 0x13e   : > { %1636 = vmatmul.mubr.bf16.gmra.mrb[56].mxu0 %v4227_v5  ;;  %2022 = vmatmul.mubr.bf16.gmra.mrb[56].mxu1 %v4227_v5 }
 0x13f   : > { %3243 = vmatprep.mubr.msk.bf16.mxu0 %vm1208_vm1, %v4230_v6  ;;  %3260 = vmatprep.mubr.msk.bf16.mxu1 %vm1208_vm1, %v4230_v6 }
 0x146   : > { %1646 = vmatmul.mubr.bf16.gmra.mrb[60].mxu0 %v4232_v7  ;;  %2032 = vmatmul.mubr.bf16.gmra.mrb[60].mxu1 %v4232_v7 }
 0x1a1   : > { %v1497_v19 = vpop.f32.mrb[0].mxu0  ;;  %v1883_v20 = vpop.f32.mrb[0].mxu1 }
 0x1a2   : > { %v3684_v21 = vadd.f32 %v1497_v19, %v4897_v15  ;;  %v3748_v22 = vadd.f32 %v1883_v20, %v4899_v16  ;;  %v1499_v23 = vpop.f32.mrb[1].mxu0  ;;  %v1885_v24 = vpop.f32.mrb[1].mxu1 }
 0x1a3   : > { %v3685_v25 = vadd.f32 %v1499_v23, %v4901_v17  ;;  %v3749_v26 = vadd.f32 %v1885_v24, %v4903_v18  ;;  %v1501_v27 = vpop.f32.mrb[2].mxu0  ;;  %v1887_v28 = vpop.f32.mrb[2].mxu1 }
 0x1a4   : > { %v3686_v29 = vadd.f32 %v1501_v27, %v4897_v15  ;;  %v3750_v30 = vadd.f32 %v1887_v28, %v4899_v16  ;;  %v1503_v31 = vpop.f32.mrb[3].mxu0  ;;  %v1889_v32 = vpop.f32.mrb[3].mxu1  ;;  %v2042_v35 = vmax.f32 %v3684_v21, 0.0  ;;  %v2044_v36 = vmax.f32 %v3748_v22, 0.0 }
 0x1a5   : > { %v3687_v33 = vadd.f32 %v1503_v31, %v4901_v17  ;;  %v3751_v34 = vadd.f32 %v1889_v32, %v4903_v18  ;;  %v2043_v39 = vmax.f32 %v3685_v25, 0.0  ;;  %v2045_v40 = vmax.f32 %v3749_v26, 0.0 }
 0x1a6   : > { %v2046_v37 = vmax.f32 %v3686_v29, 0.0  ;;  %v2048_v38 = vmax.f32 %v3750_v30, 0.0 }
 0x1a7   : > { %v2047_v41 = vmax.f32 %v3687_v33, 0.0  ;;  %v2049_v42 = vmax.f32 %v3751_v34, 0.0 }
 0x1a8   : > { %v2170_v43 = vpack.c.bf16 %v2046_v37, %v2042_v35  ;;  %v2172_v44 = vpack.c.bf16 %v2048_v38, %v2044_v36 }
 0x1a9   : > { %v2171_v45 = vpack.c.bf16 %v2047_v41, %v2043_v39  ;;  %v2173_v46 = vpack.c.bf16 %v2049_v42, %v2045_v40  ;;  %v1507_v47 = vpop.f32.mrb[4].mxu0  ;;  %v1893_v48 = vpop.f32.mrb[4].mxu1 }
 0x1aa   : > { %v3688_v49 = vadd.f32 %v1507_v47, %v4897_v15  ;;  %v3752_v50 = vadd.f32 %v1893_v48, %v4899_v16  ;;  %v1509_v51 = vpop.f32.mrb[5].mxu0  ;;  %v1895_v52 = vpop.f32.mrb[5].mxu1 }
 0x1ab   : > { %v3689_v53 = vadd.f32 %v1509_v51, %v4901_v17  ;;  %v3753_v54 = vadd.f32 %v1895_v52, %v4903_v18  ;;  %v1511_v55 = vpop.f32.mrb[6].mxu0  ;;  %v1897_v56 = vpop.f32.mrb[6].mxu1  ;;  %2529 = vmatprep.mubr.bf16.mxu0 %v2171_v45  ;;  %2690 = vmatprep.mubr.bf16.mxu1 %v2173_v46 }
 0x1ac   : > { %v3690_v57 = vadd.f32 %v1511_v55, %v4897_v15  ;;  %v3754_v58 = vadd.f32 %v1897_v56, %v4899_v16  ;;  %v1513_v59 = vpop.f32.mrb[7].mxu0  ;;  %v1899_v60 = vpop.f32.mrb[7].mxu1  ;;  %2530 = vmatmul.mubr.bf16.vlgmr.msra.gmra.mrb[64].mxu0 %v2170_v43  ;;  %2691 = vmatmul.mubr.bf16.vlgmr.msra.gmra.mrb[64].mxu1 %v2172_v44  ;;  %v2050_v63 = vmax.f32 %v3688_v49, 0.0  ;;  %v2052_v0 = vmax.f32 %v3752_v50, 0.0 }
 0x1ad   : > { %v3691_v61 = vadd.f32 %v1513_v59, %v4901_v17  ;;  %v3755_v62 = vadd.f32 %v1899_v60, %v4903_v18  ;;  %v2051_v3 = vmax.f32 %v3689_v53, 0.0  ;;  %v2053_v4 = vmax.f32 %v3753_v54, 0.0 }
 0x1ae   : > { %v2054_v1 = vmax.f32 %v3690_v57, 0.0  ;;  %v2056_v2 = vmax.f32 %v3754_v58, 0.0 }
 0x1af   : > { %v2055_v5 = vmax.f32 %v3691_v61, 0.0  ;;  %v2057_v6 = vmax.f32 %v3755_v62, 0.0 }
 0x1b0   : > { %v2174_v7 = vpack.c.bf16 %v2054_v1, %v2050_v63  ;;  %v2176_v8 = vpack.c.bf16 %v2056_v2, %v2052_v0 }
 0x1b1   : > { %v2175_v9 = vpack.c.bf16 %v2055_v5, %v2051_v3  ;;  %v2177_v10 = vpack.c.bf16 %v2057_v6, %v2053_v4  ;;  %v1517_v11 = vpop.f32.mrb[8].mxu0  ;;  %v1903_v12 = vpop.f32.mrb[8].mxu1 }
 0x1b2   : > { %v3692_v13 = vadd.f32 %v1517_v11, %v4897_v15  ;;  %v3756_v14 = vadd.f32 %v1903_v12, %v4899_v16  ;;  %v1519_v19 = vpop.f32.mrb[9].mxu0  ;;  %v1905_v20 = vpop.f32.mrb[9].mxu1 }
 0x1b3   : > { %v3693_v21 = vadd.f32 %v1519_v19, %v4901_v17  ;;  %v3757_v22 = vadd.f32 %v1905_v20, %v4903_v18  ;;  %v1521_v23 = vpop.f32.mrb[10].mxu0  ;;  %v1907_v24 = vpop.f32.mrb[10].mxu1  ;;  %2537 = vmatprep.mubr.bf16.mxu0 %v2175_v9  ;;  %2698 = vmatprep.mubr.bf16.mxu1 %v2177_v10 }
 0x1b4   : > { %v3694_v25 = vadd.f32 %v1521_v23, %v4897_v15  ;;  %v3758_v26 = vadd.f32 %v1907_v24, %v4899_v16  ;;  %v1523_v27 = vpop.f32.mrb[11].mxu0  ;;  %v1909_v28 = vpop.f32.mrb[11].mxu1  ;;  %2538 = vmatmul.mubr.bf16.gmra.mrb[68].mxu0 %v2174_v7  ;;  %2699 = vmatmul.mubr.bf16.gmra.mrb[68].mxu1 %v2176_v8  ;;  %v2058_v31 = vmax.f32 %v3692_v13, 0.0  ;;  %v2060_v32 = vmax.f32 %v3756_v14, 0.0 }
 0x1b5   : > { %v3695_v29 = vadd.f32 %v1523_v27, %v4901_v17  ;;  %v3759_v30 = vadd.f32 %v1909_v28, %v4903_v18  ;;  %v2059_v35 = vmax.f32 %v3693_v21, 0.0  ;;  %v2061_v36 = vmax.f32 %v3757_v22, 0.0 }
 0x1b6   : > { %v2062_v33 = vmax.f32 %v3694_v25, 0.0  ;;  %v2064_v34 = vmax.f32 %v3758_v26, 0.0 }
 0x1b7   : > { %v2063_v37 = vmax.f32 %v3695_v29, 0.0  ;;  %v2065_v38 = vmax.f32 %v3759_v30, 0.0 }
 0x1b8   : > { %v2178_v39 = vpack.c.bf16 %v2062_v33, %v2058_v31  ;;  %v2180_v40 = vpack.c.bf16 %v2064_v34, %v2060_v32 }
 0x1b9   : > { %v2179_v41 = vpack.c.bf16 %v2063_v37, %v2059_v35  ;;  %v2181_v42 = vpack.c.bf16 %v2065_v38, %v2061_v36  ;;  %v1527_v43 = vpop.f32.mrb[12].mxu0  ;;  %v1913_v44 = vpop.f32.mrb[12].mxu1 }
 0x1ba   : > { %v3696_v45 = vadd.f32 %v1527_v43, %v4897_v15  ;;  %v3760_v46 = vadd.f32 %v1913_v44, %v4899_v16  ;;  %v1529_v47 = vpop.f32.mrb[13].mxu0  ;;  %v1915_v48 = vpop.f32.mrb[13].mxu1 }
 0x1bb   : > { %v3697_v49 = vadd.f32 %v1529_v47, %v4901_v17  ;;  %v3761_v50 = vadd.f32 %v1915_v48, %v4903_v18  ;;  %v1531_v51 = vpop.f32.mrb[14].mxu0  ;;  %v1917_v52 = vpop.f32.mrb[14].mxu1  ;;  %2545 = vmatprep.mubr.bf16.mxu0 %v2179_v41  ;;  %2706 = vmatprep.mubr.bf16.mxu1 %v2181_v42 }
 0x1bc   : > { %v3698_v53 = vadd.f32 %v1531_v51, %v4897_v15  ;;  %v3762_v54 = vadd.f32 %v1917_v52, %v4899_v16  ;;  %v1533_v55 = vpop.f32.mrb[15].mxu0  ;;  %v1919_v56 = vpop.f32.mrb[15].mxu1  ;;  %2546 = vmatmul.mubr.bf16.gmra.mrb[72].mxu0 %v2178_v39  ;;  %2707 = vmatmul.mubr.bf16.gmra.mrb[72].mxu1 %v2180_v40  ;;  %v2066_v59 = vmax.f32 %v3696_v45, 0.0  ;;  %v2068_v60 = vmax.f32 %v3760_v46, 0.0 }
 0x1bd   : > { %v3699_v57 = vadd.f32 %v1533_v55, %v4901_v17  ;;  %v3763_v58 = vadd.f32 %v1919_v56, %v4903_v18  ;;  %v2067_v63 = vmax.f32 %v3697_v49, 0.0  ;;  %v2069_v0 = vmax.f32 %v3761_v50, 0.0 }
 0x1be   : > { %v2070_v61 = vmax.f32 %v3698_v53, 0.0  ;;  %v2072_v62 = vmax.f32 %v3762_v54, 0.0 }
 0x1bf   : > { %v2071_v1 = vmax.f32 %v3699_v57, 0.0  ;;  %v2073_v2 = vmax.f32 %v3763_v58, 0.0 }
 0x1c0   : > { %v2182_v3 = vpack.c.bf16 %v2070_v61, %v2066_v59  ;;  %v2184_v4 = vpack.c.bf16 %v2072_v62, %v2068_v60 }
 0x1c1   : > { %v2183_v5 = vpack.c.bf16 %v2071_v1, %v2067_v63  ;;  %v2185_v6 = vpack.c.bf16 %v2073_v2, %v2069_v0  ;;  %v1537_v7 = vpop.f32.mrb[16].mxu0  ;;  %v1923_v8 = vpop.f32.mrb[16].mxu1 }
 0x1c2   : > { %v3700_v9 = vadd.f32 %v1537_v7, %v4897_v15  ;;  %v3764_v10 = vadd.f32 %v1923_v8, %v4899_v16  ;;  %v1539_v11 = vpop.f32.mrb[17].mxu0  ;;  %v1925_v12 = vpop.f32.mrb[17].mxu1 }
 0x1c3   : > { %v3701_v13 = vadd.f32 %v1539_v11, %v4901_v17  ;;  %v3765_v14 = vadd.f32 %v1925_v12, %v4903_v18  ;;  %v1541_v19 = vpop.f32.mrb[18].mxu0  ;;  %v1927_v20 = vpop.f32.mrb[18].mxu1  ;;  %2553 = vmatprep.mubr.bf16.mxu0 %v2183_v5  ;;  %2714 = vmatprep.mubr.bf16.mxu1 %v2185_v6 }
 0x1c4   : > { %v3702_v21 = vadd.f32 %v1541_v19, %v4897_v15  ;;  %v3766_v22 = vadd.f32 %v1927_v20, %v4899_v16  ;;  %v1543_v23 = vpop.f32.mrb[19].mxu0  ;;  %v1929_v24 = vpop.f32.mrb[19].mxu1  ;;  %2554 = vmatmul.mubr.bf16.gmra.mrb[76].mxu0 %v2182_v3  ;;  %2715 = vmatmul.mubr.bf16.gmra.mrb[76].mxu1 %v2184_v4  ;;  %v2074_v27 = vmax.f32 %v3700_v9, 0.0  ;;  %v2076_v28 = vmax.f32 %v3764_v10, 0.0 }
 0x1c5   : > { %v3703_v25 = vadd.f32 %v1543_v23, %v4901_v17  ;;  %v3767_v26 = vadd.f32 %v1929_v24, %v4903_v18  ;;  %v2075_v31 = vmax.f32 %v3701_v13, 0.0  ;;  %v2077_v32 = vmax.f32 %v3765_v14, 0.0 }
 0x1c6   : > { %v2078_v29 = vmax.f32 %v3702_v21, 0.0  ;;  %v2080_v30 = vmax.f32 %v3766_v22, 0.0 }
 0x1c7   : > { %v2079_v33 = vmax.f32 %v3703_v25, 0.0  ;;  %v2081_v34 = vmax.f32 %v3767_v26, 0.0 }
 0x1c8   : > { %v2186_v35 = vpack.c.bf16 %v2078_v29, %v2074_v27  ;;  %v2188_v36 = vpack.c.bf16 %v2080_v30, %v2076_v28 }
 0x1c9   : > { %v2187_v37 = vpack.c.bf16 %v2079_v33, %v2075_v31  ;;  %v2189_v38 = vpack.c.bf16 %v2081_v34, %v2077_v32  ;;  %v1547_v39 = vpop.f32.mrb[20].mxu0  ;;  %v1933_v40 = vpop.f32.mrb[20].mxu1 }
 0x1ca   : > { %v3704_v41 = vadd.f32 %v1547_v39, %v4897_v15  ;;  %v3768_v42 = vadd.f32 %v1933_v40, %v4899_v16  ;;  %v1549_v43 = vpop.f32.mrb[21].mxu0  ;;  %v1935_v44 = vpop.f32.mrb[21].mxu1 }
 0x1cb   : > { %v3705_v45 = vadd.f32 %v1549_v43, %v4901_v17  ;;  %v3769_v46 = vadd.f32 %v1935_v44, %v4903_v18  ;;  %v1551_v47 = vpop.f32.mrb[22].mxu0  ;;  %v1937_v48 = vpop.f32.mrb[22].mxu1  ;;  %2561 = vmatprep.mubr.bf16.mxu0 %v2187_v37  ;;  %2722 = vmatprep.mubr.bf16.mxu1 %v2189_v38 }
 0x1cc   : > { %v3706_v49 = vadd.f32 %v1551_v47, %v4897_v15  ;;  %v3770_v50 = vadd.f32 %v1937_v48, %v4899_v16  ;;  %v1553_v51 = vpop.f32.mrb[23].mxu0  ;;  %v1939_v52 = vpop.f32.mrb[23].mxu1  ;;  %2562 = vmatmul.mubr.bf16.gmra.mrb[80].mxu0 %v2186_v35  ;;  %2723 = vmatmul.mubr.bf16.gmra.mrb[80].mxu1 %v2188_v36  ;;  %v2082_v55 = vmax.f32 %v3704_v41, 0.0  ;;  %v2084_v56 = vmax.f32 %v3768_v42, 0.0 }
 0x1cd   : > { %v3707_v53 = vadd.f32 %v1553_v51, %v4901_v17  ;;  %v3771_v54 = vadd.f32 %v1939_v52, %v4903_v18  ;;  %v2083_v59 = vmax.f32 %v3705_v45, 0.0  ;;  %v2085_v60 = vmax.f32 %v3769_v46, 0.0 }
 0x1ce   : > { %v2086_v57 = vmax.f32 %v3706_v49, 0.0  ;;  %v2088_v58 = vmax.f32 %v3770_v50, 0.0 }
 0x1cf   : > { %v2087_v61 = vmax.f32 %v3707_v53, 0.0  ;;  %v2089_v62 = vmax.f32 %v3771_v54, 0.0 }
 0x1d0   : > { %v2190_v63 = vpack.c.bf16 %v2086_v57, %v2082_v55  ;;  %v2192_v0 = vpack.c.bf16 %v2088_v58, %v2084_v56 }
 0x1d1   : > { %v2191_v1 = vpack.c.bf16 %v2087_v61, %v2083_v59  ;;  %v2193_v2 = vpack.c.bf16 %v2089_v62, %v2085_v60  ;;  %v1557_v3 = vpop.f32.mrb[24].mxu0  ;;  %v1943_v4 = vpop.f32.mrb[24].mxu1 }
 0x1d2   : > { %v3708_v5 = vadd.f32 %v1557_v3, %v4897_v15  ;;  %v3772_v6 = vadd.f32 %v1943_v4, %v4899_v16  ;;  %v1559_v7 = vpop.f32.mrb[25].mxu0  ;;  %v1945_v8 = vpop.f32.mrb[25].mxu1 }
 0x1d3   : > { %v3709_v9 = vadd.f32 %v1559_v7, %v4901_v17  ;;  %v3773_v10 = vadd.f32 %v1945_v8, %v4903_v18  ;;  %v1561_v11 = vpop.f32.mrb[26].mxu0  ;;  %v1947_v12 = vpop.f32.mrb[26].mxu1  ;;  %2569 = vmatprep.mubr.bf16.mxu0 %v2191_v1  ;;  %2730 = vmatprep.mubr.bf16.mxu1 %v2193_v2 }
 0x1d4   : > { %v3710_v13 = vadd.f32 %v1561_v11, %v4897_v15  ;;  %v3774_v14 = vadd.f32 %v1947_v12, %v4899_v16  ;;  %v1563_v19 = vpop.f32.mrb[27].mxu0  ;;  %v1949_v20 = vpop.f32.mrb[27].mxu1  ;;  %2570 = vmatmul.mubr.bf16.gmra.mrb[84].mxu0 %v2190_v63  ;;  %2731 = vmatmul.mubr.bf16.gmra.mrb[84].mxu1 %v2192_v0  ;;  %v2090_v23 = vmax.f32 %v3708_v5, 0.0  ;;  %v2092_v24 = vmax.f32 %v3772_v6, 0.0 }
 0x1d5   : > { %v3711_v21 = vadd.f32 %v1563_v19, %v4901_v17  ;;  %v3775_v22 = vadd.f32 %v1949_v20, %v4903_v18  ;;  %v2091_v27 = vmax.f32 %v3709_v9, 0.0  ;;  %v2093_v28 = vmax.f32 %v3773_v10, 0.0 }
 0x1d6   : > { %v2094_v25 = vmax.f32 %v3710_v13, 0.0  ;;  %v2096_v26 = vmax.f32 %v3774_v14, 0.0 }
 0x1d7   : > { %v2095_v29 = vmax.f32 %v3711_v21, 0.0  ;;  %v2097_v30 = vmax.f32 %v3775_v22, 0.0 }
 0x1d8   : > { %v2194_v31 = vpack.c.bf16 %v2094_v25, %v2090_v23  ;;  %v2196_v32 = vpack.c.bf16 %v2096_v26, %v2092_v24 }
 0x1d9   : > { %v2195_v33 = vpack.c.bf16 %v2095_v29, %v2091_v27  ;;  %v2197_v34 = vpack.c.bf16 %v2097_v30, %v2093_v28  ;;  %v1567_v35 = vpop.f32.mrb[28].mxu0  ;;  %v1953_v36 = vpop.f32.mrb[28].mxu1 }
 0x1da   : > { %v3712_v37 = vadd.f32 %v1567_v35, %v4897_v15  ;;  %v3776_v38 = vadd.f32 %v1953_v36, %v4899_v16  ;;  %v1569_v39 = vpop.f32.mrb[29].mxu0  ;;  %v1955_v40 = vpop.f32.mrb[29].mxu1 }
 0x1db   : > { %v3713_v41 = vadd.f32 %v1569_v39, %v4901_v17  ;;  %v3777_v42 = vadd.f32 %v1955_v40, %v4903_v18  ;;  %v1571_v43 = vpop.f32.mrb[30].mxu0  ;;  %v1957_v44 = vpop.f32.mrb[30].mxu1  ;;  %2577 = vmatprep.mubr.bf16.mxu0 %v2195_v33  ;;  %2738 = vmatprep.mubr.bf16.mxu1 %v2197_v34 }
 0x1dc   : > { %v3714_v45 = vadd.f32 %v1571_v43, %v4897_v15  ;;  %v3778_v46 = vadd.f32 %v1957_v44, %v4899_v16  ;;  %v1573_v47 = vpop.f32.mrb[31].mxu0  ;;  %v1959_v48 = vpop.f32.mrb[31].mxu1  ;;  %2578 = vmatmul.mubr.bf16.gmra.mrb[88].mxu0 %v2194_v31  ;;  %2739 = vmatmul.mubr.bf16.gmra.mrb[88].mxu1 %v2196_v32  ;;  %v2098_v51 = vmax.f32 %v3712_v37, 0.0  ;;  %v2100_v52 = vmax.f32 %v3776_v38, 0.0 }
 0x1dd   : > { %v3715_v49 = vadd.f32 %v1573_v47, %v4901_v17  ;;  %v3779_v50 = vadd.f32 %v1959_v48, %v4903_v18  ;;  %v2099_v55 = vmax.f32 %v3713_v41, 0.0  ;;  %v2101_v56 = vmax.f32 %v3777_v42, 0.0 }
 0x1de   : > { %v2102_v53 = vmax.f32 %v3714_v45, 0.0  ;;  %v2104_v54 = vmax.f32 %v3778_v46, 0.0 }
 0x1df   : > { %v2103_v57 = vmax.f32 %v3715_v49, 0.0  ;;  %v2105_v58 = vmax.f32 %v3779_v50, 0.0 }
 0x1e0   : > { %v2198_v59 = vpack.c.bf16 %v2102_v53, %v2098_v51  ;;  %v2200_v60 = vpack.c.bf16 %v2104_v54, %v2100_v52 }
 0x1e1   : > { %v2199_v61 = vpack.c.bf16 %v2103_v57, %v2099_v55  ;;  %v2201_v62 = vpack.c.bf16 %v2105_v58, %v2101_v56  ;;  %v1577_v63 = vpop.f32.mrb[32].mxu0  ;;  %v1963_v0 = vpop.f32.mrb[32].mxu1 }
 0x1e2   : > { %v3716_v1 = vadd.f32 %v1577_v63, %v4897_v15  ;;  %v3780_v2 = vadd.f32 %v1963_v0, %v4899_v16  ;;  %v1579_v3 = vpop.f32.mrb[33].mxu0  ;;  %v1965_v4 = vpop.f32.mrb[33].mxu1 }
 0x1e3   : > { %v3717_v5 = vadd.f32 %v1579_v3, %v4901_v17  ;;  %v3781_v6 = vadd.f32 %v1965_v4, %v4903_v18  ;;  %v1581_v7 = vpop.f32.mrb[34].mxu0  ;;  %v1967_v8 = vpop.f32.mrb[34].mxu1  ;;  %2585 = vmatprep.mubr.bf16.mxu0 %v2199_v61  ;;  %2746 = vmatprep.mubr.bf16.mxu1 %v2201_v62 }
 0x1e4   : > { %v3718_v9 = vadd.f32 %v1581_v7, %v4897_v15  ;;  %v3782_v10 = vadd.f32 %v1967_v8, %v4899_v16  ;;  %v1583_v11 = vpop.f32.mrb[35].mxu0  ;;  %v1969_v12 = vpop.f32.mrb[35].mxu1  ;;  %2586 = vmatmul.mubr.bf16.gmra.mrb[92].mxu0 %v2198_v59  ;;  %2747 = vmatmul.mubr.bf16.gmra.mrb[92].mxu1 %v2200_v60  ;;  %v2106_v19 = vmax.f32 %v3716_v1, 0.0  ;;  %v2108_v20 = vmax.f32 %v3780_v2, 0.0 }
 0x1e5   : > { %v3719_v13 = vadd.f32 %v1583_v11, %v4901_v17  ;;  %v3783_v14 = vadd.f32 %v1969_v12, %v4903_v18  ;;  %v2107_v23 = vmax.f32 %v3717_v5, 0.0  ;;  %v2109_v24 = vmax.f32 %v3781_v6, 0.0 }
 0x1e6   : > { %v2110_v21 = vmax.f32 %v3718_v9, 0.0  ;;  %v2112_v22 = vmax.f32 %v3782_v10, 0.0 }
 0x1e7   : > { %v2111_v25 = vmax.f32 %v3719_v13, 0.0  ;;  %v2113_v26 = vmax.f32 %v3783_v14, 0.0 }
 0x1e8   : > { %v2202_v27 = vpack.c.bf16 %v2110_v21, %v2106_v19  ;;  %v2204_v28 = vpack.c.bf16 %v2112_v22, %v2108_v20 }
 0x1e9   : > { %v2203_v29 = vpack.c.bf16 %v2111_v25, %v2107_v23  ;;  %v2205_v30 = vpack.c.bf16 %v2113_v26, %v2109_v24  ;;  %v1587_v31 = vpop.f32.mrb[36].mxu0  ;;  %v1973_v32 = vpop.f32.mrb[36].mxu1 }
 0x1ea   : > { %v3720_v33 = vadd.f32 %v1587_v31, %v4897_v15  ;;  %v3784_v34 = vadd.f32 %v1973_v32, %v4899_v16  ;;  %v1589_v35 = vpop.f32.mrb[37].mxu0  ;;  %v1975_v36 = vpop.f32.mrb[37].mxu1 }
 0x1eb   : > { %v3721_v37 = vadd.f32 %v1589_v35, %v4901_v17  ;;  %v3785_v38 = vadd.f32 %v1975_v36, %v4903_v18  ;;  %v1591_v39 = vpop.f32.mrb[38].mxu0  ;;  %v1977_v40 = vpop.f32.mrb[38].mxu1  ;;  %2593 = vmatprep.mubr.bf16.mxu0 %v2203_v29  ;;  %2754 = vmatprep.mubr.bf16.mxu1 %v2205_v30 }
 0x1ec   : > { %v3722_v41 = vadd.f32 %v1591_v39, %v4897_v15  ;;  %v3786_v42 = vadd.f32 %v1977_v40, %v4899_v16  ;;  %v1593_v43 = vpop.f32.mrb[39].mxu0  ;;  %v1979_v44 = vpop.f32.mrb[39].mxu1  ;;  %2594 = vmatmul.mubr.bf16.gmra.mrb[96].mxu0 %v2202_v27  ;;  %2755 = vmatmul.mubr.bf16.gmra.mrb[96].mxu1 %v2204_v28  ;;  %v2114_v47 = vmax.f32 %v3720_v33, 0.0  ;;  %v2116_v48 = vmax.f32 %v3784_v34, 0.0 }
 0x1ed   : > { %v3723_v45 = vadd.f32 %v1593_v43, %v4901_v17  ;;  %v3787_v46 = vadd.f32 %v1979_v44, %v4903_v18  ;;  %v2115_v51 = vmax.f32 %v3721_v37, 0.0  ;;  %v2117_v52 = vmax.f32 %v3785_v38, 0.0 }
 0x1ee   : > { %v2118_v49 = vmax.f32 %v3722_v41, 0.0  ;;  %v2120_v50 = vmax.f32 %v3786_v42, 0.0 }
 0x1ef   : > { %v2119_v53 = vmax.f32 %v3723_v45, 0.0  ;;  %v2121_v54 = vmax.f32 %v3787_v46, 0.0 }
 0x1f0   : > { %v2206_v55 = vpack.c.bf16 %v2118_v49, %v2114_v47  ;;  %v2208_v56 = vpack.c.bf16 %v2120_v50, %v2116_v48 }
 0x1f1   : > { %v2207_v57 = vpack.c.bf16 %v2119_v53, %v2115_v51  ;;  %v2209_v58 = vpack.c.bf16 %v2121_v54, %v2117_v52  ;;  %v1597_v59 = vpop.f32.mrb[40].mxu0  ;;  %v1983_v60 = vpop.f32.mrb[40].mxu1 }
 0x1f2   : > { %v3724_v61 = vadd.f32 %v1597_v59, %v4897_v15  ;;  %v3788_v62 = vadd.f32 %v1983_v60, %v4899_v16  ;;  %v1599_v63 = vpop.f32.mrb[41].mxu0  ;;  %v1985_v0 = vpop.f32.mrb[41].mxu1 }
 0x1f3   : > { %v3725_v1 = vadd.f32 %v1599_v63, %v4901_v17  ;;  %v3789_v2 = vadd.f32 %v1985_v0, %v4903_v18  ;;  %v1601_v3 = vpop.f32.mrb[42].mxu0  ;;  %v1987_v4 = vpop.f32.mrb[42].mxu1  ;;  %2601 = vmatprep.mubr.bf16.mxu0 %v2207_v57  ;;  %2762 = vmatprep.mubr.bf16.mxu1 %v2209_v58 }
 0x1f4   : > { %v3726_v5 = vadd.f32 %v1601_v3, %v4897_v15  ;;  %v3790_v6 = vadd.f32 %v1987_v4, %v4899_v16  ;;  %v1603_v7 = vpop.f32.mrb[43].mxu0  ;;  %v1989_v8 = vpop.f32.mrb[43].mxu1  ;;  %2602 = vmatmul.mubr.bf16.gmra.mrb[100].mxu0 %v2206_v55  ;;  %2763 = vmatmul.mubr.bf16.gmra.mrb[100].mxu1 %v2208_v56  ;;  %v2122_v11 = vmax.f32 %v3724_v61, 0.0  ;;  %v2124_v12 = vmax.f32 %v3788_v62, 0.0 }
 0x1f5   : > { %v3727_v9 = vadd.f32 %v1603_v7, %v4901_v17  ;;  %v3791_v10 = vadd.f32 %v1989_v8, %v4903_v18  ;;  %v2123_v19 = vmax.f32 %v3725_v1, 0.0  ;;  %v2125_v20 = vmax.f32 %v3789_v2, 0.0 }
 0x1f6   : > { %v2126_v13 = vmax.f32 %v3726_v5, 0.0  ;;  %v2128_v14 = vmax.f32 %v3790_v6, 0.0 }
 0x1f7   : > { %v2127_v21 = vmax.f32 %v3727_v9, 0.0  ;;  %v2129_v22 = vmax.f32 %v3791_v10, 0.0 }
 0x1f8   : > { %v2210_v23 = vpack.c.bf16 %v2126_v13, %v2122_v11  ;;  %v2212_v24 = vpack.c.bf16 %v2128_v14, %v2124_v12 }
 0x1f9   : > { %v2211_v25 = vpack.c.bf16 %v2127_v21, %v2123_v19  ;;  %v2213_v26 = vpack.c.bf16 %v2129_v22, %v2125_v20  ;;  %v1607_v27 = vpop.f32.mrb[44].mxu0  ;;  %v1993_v28 = vpop.f32.mrb[44].mxu1 }
 0x1fa   : > { %v3728_v29 = vadd.f32 %v1607_v27, %v4897_v15  ;;  %v3792_v30 = vadd.f32 %v1993_v28, %v4899_v16  ;;  %v1609_v31 = vpop.f32.mrb[45].mxu0  ;;  %v1995_v32 = vpop.f32.mrb[45].mxu1 }
 0x1fb   : > { %v3729_v33 = vadd.f32 %v1609_v31, %v4901_v17  ;;  %v3793_v34 = vadd.f32 %v1995_v32, %v4903_v18  ;;  %v1611_v35 = vpop.f32.mrb[46].mxu0  ;;  %v1997_v36 = vpop.f32.mrb[46].mxu1  ;;  %2609 = vmatprep.mubr.bf16.mxu0 %v2211_v25  ;;  %2770 = vmatprep.mubr.bf16.mxu1 %v2213_v26 }
 0x1fc   : > { %v3730_v37 = vadd.f32 %v1611_v35, %v4897_v15  ;;  %v3794_v38 = vadd.f32 %v1997_v36, %v4899_v16  ;;  %v1613_v39 = vpop.f32.mrb[47].mxu0  ;;  %v1999_v40 = vpop.f32.mrb[47].mxu1  ;;  %2610 = vmatmul.mubr.bf16.gmra.mrb[104].mxu0 %v2210_v23  ;;  %2771 = vmatmul.mubr.bf16.gmra.mrb[104].mxu1 %v2212_v24  ;;  %v2130_v43 = vmax.f32 %v3728_v29, 0.0  ;;  %v2132_v44 = vmax.f32 %v3792_v30, 0.0 }
 0x1fd   : > { %v3731_v41 = vadd.f32 %v1613_v39, %v4901_v17  ;;  %v3795_v42 = vadd.f32 %v1999_v40, %v4903_v18  ;;  %v2131_v47 = vmax.f32 %v3729_v33, 0.0  ;;  %v2133_v48 = vmax.f32 %v3793_v34, 0.0 }
 0x1fe   : > { %v2134_v45 = vmax.f32 %v3730_v37, 0.0  ;;  %v2136_v46 = vmax.f32 %v3794_v38, 0.0 }
 0x1ff   : > { %v2135_v49 = vmax.f32 %v3731_v41, 0.0  ;;  %v2137_v50 = vmax.f32 %v3795_v42, 0.0 }
 0x200   : > { %v2214_v51 = vpack.c.bf16 %v2134_v45, %v2130_v43  ;;  %v2216_v52 = vpack.c.bf16 %v2136_v46, %v2132_v44 }
 0x201   : > { %v2215_v53 = vpack.c.bf16 %v2135_v49, %v2131_v47  ;;  %v2217_v54 = vpack.c.bf16 %v2137_v50, %v2133_v48  ;;  %v1617_v55 = vpop.f32.mrb[48].mxu0  ;;  %v2003_v56 = vpop.f32.mrb[48].mxu1 }
 0x202   : > { %v3732_v57 = vadd.f32 %v1617_v55, %v4897_v15  ;;  %v3796_v58 = vadd.f32 %v2003_v56, %v4899_v16  ;;  %v1619_v59 = vpop.f32.mrb[49].mxu0  ;;  %v2005_v60 = vpop.f32.mrb[49].mxu1 }
 0x203   : > { %v3733_v61 = vadd.f32 %v1619_v59, %v4901_v17  ;;  %v3797_v62 = vadd.f32 %v2005_v60, %v4903_v18  ;;  %v1621_v63 = vpop.f32.mrb[50].mxu0  ;;  %v2007_v0 = vpop.f32.mrb[50].mxu1  ;;  %2617 = vmatprep.mubr.bf16.mxu0 %v2215_v53  ;;  %2778 = vmatprep.mubr.bf16.mxu1 %v2217_v54 }
 0x204   : > { %v3734_v1 = vadd.f32 %v1621_v63, %v4897_v15  ;;  %v3798_v2 = vadd.f32 %v2007_v0, %v4899_v16  ;;  %v1623_v3 = vpop.f32.mrb[51].mxu0  ;;  %v2009_v4 = vpop.f32.mrb[51].mxu1  ;;  %2618 = vmatmul.mubr.bf16.gmra.mrb[108].mxu0 %v2214_v51  ;;  %2779 = vmatmul.mubr.bf16.gmra.mrb[108].mxu1 %v2216_v52  ;;  %v2138_v7 = vmax.f32 %v3732_v57, 0.0  ;;  %v2140_v8 = vmax.f32 %v3796_v58, 0.0 }
 0x205   : > { %v3735_v5 = vadd.f32 %v1623_v3, %v4901_v17  ;;  %v3799_v6 = vadd.f32 %v2009_v4, %v4903_v18  ;;  %v2139_v11 = vmax.f32 %v3733_v61, 0.0  ;;  %v2141_v12 = vmax.f32 %v3797_v62, 0.0 }
 0x206   : > { %v2142_v9 = vmax.f32 %v3734_v1, 0.0  ;;  %v2144_v10 = vmax.f32 %v3798_v2, 0.0 }
 0x207   : > { %v2143_v13 = vmax.f32 %v3735_v5, 0.0  ;;  %v2145_v14 = vmax.f32 %v3799_v6, 0.0 }
 0x208   : > { %v2218_v19 = vpack.c.bf16 %v2142_v9, %v2138_v7  ;;  %v2220_v20 = vpack.c.bf16 %v2144_v10, %v2140_v8 }
 0x209   : > { %v2219_v21 = vpack.c.bf16 %v2143_v13, %v2139_v11  ;;  %v2221_v22 = vpack.c.bf16 %v2145_v14, %v2141_v12  ;;  %v1627_v23 = vpop.f32.mrb[52].mxu0  ;;  %v2013_v24 = vpop.f32.mrb[52].mxu1 }
 0x20a   : > { %v3736_v25 = vadd.f32 %v1627_v23, %v4897_v15  ;;  %v3800_v26 = vadd.f32 %v2013_v24, %v4899_v16  ;;  %v1629_v27 = vpop.f32.mrb[53].mxu0  ;;  %v2015_v28 = vpop.f32.mrb[53].mxu1 }
 0x20b   : > { %v3737_v29 = vadd.f32 %v1629_v27, %v4901_v17  ;;  %v3801_v30 = vadd.f32 %v2015_v28, %v4903_v18  ;;  %v1631_v31 = vpop.f32.mrb[54].mxu0  ;;  %v2017_v32 = vpop.f32.mrb[54].mxu1  ;;  %2625 = vmatprep.mubr.bf16.mxu0 %v2219_v21  ;;  %2786 = vmatprep.mubr.bf16.mxu1 %v2221_v22 }
 0x20c   : > { %v3738_v33 = vadd.f32 %v1631_v31, %v4897_v15  ;;  %v3802_v34 = vadd.f32 %v2017_v32, %v4899_v16  ;;  %v1633_v35 = vpop.f32.mrb[55].mxu0  ;;  %v2019_v36 = vpop.f32.mrb[55].mxu1  ;;  %2626 = vmatmul.mubr.bf16.gmra.mrb[112].mxu0 %v2218_v19  ;;  %2787 = vmatmul.mubr.bf16.gmra.mrb[112].mxu1 %v2220_v20  ;;  %v2146_v39 = vmax.f32 %v3736_v25, 0.0  ;;  %v2148_v40 = vmax.f32 %v3800_v26, 0.0 }
 0x20d   : > { %v3739_v37 = vadd.f32 %v1633_v35, %v4901_v17  ;;  %v3803_v38 = vadd.f32 %v2019_v36, %v4903_v18  ;;  %v2147_v43 = vmax.f32 %v3737_v29, 0.0  ;;  %v2149_v44 = vmax.f32 %v3801_v30, 0.0 }
 0x20e   : > { %v2150_v41 = vmax.f32 %v3738_v33, 0.0  ;;  %v2152_v42 = vmax.f32 %v3802_v34, 0.0 }
 0x20f   : > { %v2151_v45 = vmax.f32 %v3739_v37, 0.0  ;;  %v2153_v46 = vmax.f32 %v3803_v38, 0.0 }
 0x210   : > { %v2222_v47 = vpack.c.bf16 %v2150_v41, %v2146_v39  ;;  %v2224_v48 = vpack.c.bf16 %v2152_v42, %v2148_v40 }
 0x211   : > { %v2223_v49 = vpack.c.bf16 %v2151_v45, %v2147_v43  ;;  %v2225_v50 = vpack.c.bf16 %v2153_v46, %v2149_v44  ;;  %v1637_v51 = vpop.f32.mrb[56].mxu0  ;;  %v2023_v52 = vpop.f32.mrb[56].mxu1 }
 0x212   : > { %v3740_v53 = vadd.f32 %v1637_v51, %v4897_v15  ;;  %v3804_v54 = vadd.f32 %v2023_v52, %v4899_v16  ;;  %v1639_v55 = vpop.f32.mrb[57].mxu0  ;;  %v2025_v56 = vpop.f32.mrb[57].mxu1 }
 0x213   : > { %v3741_v57 = vadd.f32 %v1639_v55, %v4901_v17  ;;  %v3805_v58 = vadd.f32 %v2025_v56, %v4903_v18  ;;  %v1641_v59 = vpop.f32.mrb[58].mxu0  ;;  %v2027_v60 = vpop.f32.mrb[58].mxu1  ;;  %2633 = vmatprep.mubr.bf16.mxu0 %v2223_v49  ;;  %2794 = vmatprep.mubr.bf16.mxu1 %v2225_v50 }
 0x214   : > { %v3742_v61 = vadd.f32 %v1641_v59, %v4897_v15  ;;  %v3806_v62 = vadd.f32 %v2027_v60, %v4899_v16  ;;  %v1643_v63 = vpop.f32.mrb[59].mxu0  ;;  %v2029_v0 = vpop.f32.mrb[59].mxu1  ;;  %2634 = vmatmul.mubr.bf16.gmra.mrb[116].mxu0 %v2222_v47  ;;  %2795 = vmatmul.mubr.bf16.gmra.mrb[116].mxu1 %v2224_v48  ;;  %v2154_v3 = vmax.f32 %v3740_v53, 0.0  ;;  %v2156_v4 = vmax.f32 %v3804_v54, 0.0 }
 0x215   : > { %v3743_v1 = vadd.f32 %v1643_v63, %v4901_v17  ;;  %v3807_v2 = vadd.f32 %v2029_v0, %v4903_v18  ;;  %v2155_v7 = vmax.f32 %v3741_v57, 0.0  ;;  %v2157_v8 = vmax.f32 %v3805_v58, 0.0 }
 0x216   : > { %v2158_v5 = vmax.f32 %v3742_v61, 0.0  ;;  %v2160_v6 = vmax.f32 %v3806_v62, 0.0 }
 0x217   : > { %v2159_v9 = vmax.f32 %v3743_v1, 0.0  ;;  %v2161_v10 = vmax.f32 %v3807_v2, 0.0 }
 0x218   : > { %v2226_v11 = vpack.c.bf16 %v2158_v5, %v2154_v3  ;;  %v2228_v12 = vpack.c.bf16 %v2160_v6, %v2156_v4 }
 0x219   : > { %v2227_v13 = vpack.c.bf16 %v2159_v9, %v2155_v7  ;;  %v2229_v14 = vpack.c.bf16 %v2161_v10, %v2157_v8  ;;  %v1647_v19 = vpop.f32.mrb[60].mxu0  ;;  %v2033_v20 = vpop.f32.mrb[60].mxu1 }
 0x21a   : > { %v3744_v21 = vadd.f32 %v1647_v19, %v4897_v15  ;;  %v3808_v22 = vadd.f32 %v2033_v20, %v4899_v16  ;;  %v1649_v23 = vpop.f32.mrb[61].mxu0  ;;  %v2035_v24 = vpop.f32.mrb[61].mxu1 }
 0x21b   : > { %v3745_v25 = vadd.f32 %v1649_v23, %v4901_v17  ;;  %v3809_v26 = vadd.f32 %v2035_v24, %v4903_v18  ;;  %v1651_v27 = vpop.f32.mrb[62].mxu0  ;;  %v2037_v28 = vpop.f32.mrb[62].mxu1  ;;  %2641 = vmatprep.mubr.bf16.mxu0 %v2227_v13  ;;  %2802 = vmatprep.mubr.bf16.mxu1 %v2229_v14 }
 0x21c   : > { %v3746_v29 = vadd.f32 %v1651_v27, %v4897_v15  ;;  %v3810_v30 = vadd.f32 %v2037_v28, %v4899_v16  ;;  %v1653_v31 = vpop.f32.mrb[63].mxu0  ;;  %v2039_v32 = vpop.f32.mrb[63].mxu1  ;;  %2642 = vmatmul.mubr.bf16.gmra.mrb[120].mxu0 %v2226_v11  ;;  %2803 = vmatmul.mubr.bf16.gmra.mrb[120].mxu1 %v2228_v12  ;;  %v2162_v35 = vmax.f32 %v3744_v21, 0.0  ;;  %v2164_v36 = vmax.f32 %v3808_v22, 0.0 }
 0x21d   : > { %v3747_v33 = vadd.f32 %v1653_v31, %v4901_v17  ;;  %v3811_v34 = vadd.f32 %v2039_v32, %v4903_v18  ;;  %v2163_v39 = vmax.f32 %v3745_v25, 0.0  ;;  %v2165_v40 = vmax.f32 %v3809_v26, 0.0  ;;  %v5036_v18 = vld [vmem:[%s5147_s4] ss:$0 sm:$0xff] }
 0x21e   : > { %v2166_v37 = vmax.f32 %v3746_v29, 0.0  ;;  %v2168_v38 = vmax.f32 %v3810_v30, 0.0 }
 0x21f   : > { %v2167_v41 = vmax.f32 %v3747_v33, 0.0  ;;  %v2169_v42 = vmax.f32 %v3811_v34, 0.0 }
 0x220   : > { %v2230_v43 = vpack.c.bf16 %v2166_v37, %v2162_v35  ;;  %v2232_v15 = vpack.c.bf16 %v2168_v38, %v2164_v36 }
 0x221   : > { %v2231_v44 = vpack.c.bf16 %v2167_v41, %v2163_v39  ;;  %v2233_v16 = vpack.c.bf16 %v2169_v42, %v2165_v40 }
 0x223   : > { %2649 = vmatprep.mubr.bf16.mxu0 %v2231_v44  ;;  %2810 = vmatprep.mubr.bf16.mxu1 %v2233_v16 }
 0x224   : > { %2650 = vmatmul.mubr.bf16.gmra.mrb[124].mxu0 %v2230_v43  ;;  %2811 = vmatmul.mubr.bf16.gmra.mrb[124].mxu1 %v2232_v15 }
 0x27f   : > { %v3476_v17 = vpop.f32.mrb[64].mxu0  ;;  %v3588_v45 = vpop.f32.mrb[64].mxu1 }
 0x280   : > { %v3477_v46 = vpop.f32.mrb[65].mxu0  ;;  %v3589_v47 = vpop.f32.mrb[65].mxu1 }
 0x281   : > { %v3478_v48 = vadd.f32 %v3477_v46, %v3476_v17  ;;  %v3590_v49 = vadd.f32 %v3589_v47, %v3588_v45  ;;  %v3479_v50 = vpop.f32.mrb[66].mxu0  ;;  %v3591_v51 = vpop.f32.mrb[66].mxu1 }
 0x282   : > { %v3480_v52 = vpop.f32.mrb[67].mxu0  ;;  %v3592_v53 = vpop.f32.mrb[67].mxu1 }
 0x283   : > { %v2532_v54 = vadd.f32 %v3478_v48, %v5036_v18  ;;  %v3481_v55 = vadd.f32 %v3480_v52, %v3479_v50  ;;  %v3593_v56 = vadd.f32 %v3592_v53, %v3591_v51 }
 0x285   : > { %v2693_v57 = vadd.f32 %v3590_v49, %v2532_v54  ;;  %v2535_v58 = vadd.f32 %v3481_v55, %v5036_v18 }
 0x287   : > { %v2696_v59 = vadd.f32 %v3593_v56, %v2535_v58  ;;  %v3482_v60 = vpop.f32.mrb[68].mxu0  ;;  %v3594_v61 = vpop.f32.mrb[68].mxu1 }
 0x288   : > { %v3483_v62 = vpop.f32.mrb[69].mxu0  ;;  %v3595_v63 = vpop.f32.mrb[69].mxu1 }
 0x289   : > { %v3368_v0 = vpack.c.bf16 %v2696_v59, %v2693_v57  ;;  %v3484_v1 = vadd.f32 %v3483_v62, %v3482_v60  ;;  %v3596_v2 = vadd.f32 %v3595_v63, %v3594_v61  ;;  %v3485_v3 = vpop.f32.mrb[70].mxu0  ;;  %v3597_v4 = vpop.f32.mrb[70].mxu1 }
 0x28a   : > { %v3486_v5 = vpop.f32.mrb[71].mxu0  ;;  %v3598_v6 = vpop.f32.mrb[71].mxu1 }
 0x28b   : > { %3369 = vst [vmem:[%s5043_s15] sm:$0xff] %v3368_v0   ;;  %v2540_v7 = vadd.f32 %v3484_v1, %v5036_v18  ;;  %v3487_v8 = vadd.f32 %v3486_v5, %v3485_v3  ;;  %v3599_v9 = vadd.f32 %v3598_v6, %v3597_v4 }
 0x28d   : > { %v2701_v10 = vadd.f32 %v3596_v2, %v2540_v7  ;;  %v2543_v11 = vadd.f32 %v3487_v8, %v5036_v18 }
 0x28f   : > { %v2704_v12 = vadd.f32 %v3599_v9, %v2543_v11  ;;  %v3488_v13 = vpop.f32.mrb[72].mxu0  ;;  %v3600_v14 = vpop.f32.mrb[72].mxu1 }
 0x290   : > { %v3489_v19 = vpop.f32.mrb[73].mxu0  ;;  %v3601_v20 = vpop.f32.mrb[73].mxu1 }
 0x291   : > { %v3373_v21 = vpack.c.bf16 %v2704_v12, %v2701_v10  ;;  %v3490_v22 = vadd.f32 %v3489_v19, %v3488_v13  ;;  %v3602_v23 = vadd.f32 %v3601_v20, %v3600_v14  ;;  %v3491_v24 = vpop.f32.mrb[74].mxu0  ;;  %v3603_v25 = vpop.f32.mrb[74].mxu1 }
 0x292   : > { %v3492_v26 = vpop.f32.mrb[75].mxu0  ;;  %v3604_v27 = vpop.f32.mrb[75].mxu1 }
 0x293   : > { %3445 = vst [vmem:[%s5043_s15 + $0x8] sm:$0xff] %v3373_v21   ;;  %v2548_v28 = vadd.f32 %v3490_v22, %v5036_v18  ;;  %v3493_v29 = vadd.f32 %v3492_v26, %v3491_v24  ;;  %v3605_v30 = vadd.f32 %v3604_v27, %v3603_v25 }
 0x295   : > { %v2709_v31 = vadd.f32 %v3602_v23, %v2548_v28  ;;  %v2551_v32 = vadd.f32 %v3493_v29, %v5036_v18 }
 0x297   : > { %v2712_v33 = vadd.f32 %v3605_v30, %v2551_v32  ;;  %v3494_v34 = vpop.f32.mrb[76].mxu0  ;;  %v3606_v35 = vpop.f32.mrb[76].mxu1 }
 0x298   : > { %v3495_v36 = vpop.f32.mrb[77].mxu0  ;;  %v3607_v37 = vpop.f32.mrb[77].mxu1 }
 0x299   : > { %v3378_v38 = vpack.c.bf16 %v2712_v33, %v2709_v31  ;;  %v3496_v39 = vadd.f32 %v3495_v36, %v3494_v34  ;;  %v3608_v40 = vadd.f32 %v3607_v37, %v3606_v35  ;;  %v3497_v41 = vpop.f32.mrb[78].mxu0  ;;  %v3609_v42 = vpop.f32.mrb[78].mxu1 }
 0x29a   : > { %v3498_v43 = vpop.f32.mrb[79].mxu0  ;;  %v3610_v15 = vpop.f32.mrb[79].mxu1 }
 0x29b   : > { %3446 = vst [vmem:[%s5043_s15 + $0x10] sm:$0xff] %v3378_v38   ;;  %v2556_v44 = vadd.f32 %v3496_v39, %v5036_v18  ;;  %v3499_v16 = vadd.f32 %v3498_v43, %v3497_v41  ;;  %v3611_v17 = vadd.f32 %v3610_v15, %v3609_v42 }
 0x29d   : > { %v2717_v45 = vadd.f32 %v3608_v40, %v2556_v44  ;;  %v2559_v46 = vadd.f32 %v3499_v16, %v5036_v18 }
 0x29f   : > { %v2720_v47 = vadd.f32 %v3611_v17, %v2559_v46  ;;  %v3500_v48 = vpop.f32.mrb[80].mxu0  ;;  %v3612_v49 = vpop.f32.mrb[80].mxu1 }
 0x2a0   : > { %v3501_v50 = vpop.f32.mrb[81].mxu0  ;;  %v3613_v51 = vpop.f32.mrb[81].mxu1 }
 0x2a1   : > { %v3383_v52 = vpack.c.bf16 %v2720_v47, %v2717_v45  ;;  %v3502_v53 = vadd.f32 %v3501_v50, %v3500_v48  ;;  %v3614_v54 = vadd.f32 %v3613_v51, %v3612_v49  ;;  %v3503_v55 = vpop.f32.mrb[82].mxu0  ;;  %v3615_v56 = vpop.f32.mrb[82].mxu1 }
 0x2a2   : > { %v3504_v57 = vpop.f32.mrb[83].mxu0  ;;  %v3616_v58 = vpop.f32.mrb[83].mxu1 }
 0x2a3   : > { %3447 = vst [vmem:[%s5043_s15 + $0x18] sm:$0xff] %v3383_v52   ;;  %v2564_v59 = vadd.f32 %v3502_v53, %v5036_v18  ;;  %v3505_v60 = vadd.f32 %v3504_v57, %v3503_v55  ;;  %v3617_v61 = vadd.f32 %v3616_v58, %v3615_v56 }
 0x2a5   : > { %v2725_v62 = vadd.f32 %v3614_v54, %v2564_v59  ;;  %v2567_v63 = vadd.f32 %v3505_v60, %v5036_v18 }
 0x2a7   : > { %v2728_v0 = vadd.f32 %v3617_v61, %v2567_v63  ;;  %v3506_v1 = vpop.f32.mrb[84].mxu0  ;;  %v3618_v2 = vpop.f32.mrb[84].mxu1 }
 0x2a8   : > { %v3507_v3 = vpop.f32.mrb[85].mxu0  ;;  %v3619_v4 = vpop.f32.mrb[85].mxu1 }
 0x2a9   : > { %v3388_v5 = vpack.c.bf16 %v2728_v0, %v2725_v62  ;;  %v3508_v6 = vadd.f32 %v3507_v3, %v3506_v1  ;;  %v3620_v7 = vadd.f32 %v3619_v4, %v3618_v2  ;;  %v3509_v8 = vpop.f32.mrb[86].mxu0  ;;  %v3621_v9 = vpop.f32.mrb[86].mxu1 }
 0x2aa   : > { %v3510_v10 = vpop.f32.mrb[87].mxu0  ;;  %v3622_v11 = vpop.f32.mrb[87].mxu1 }
 0x2ab   : > { %3448 = vst [vmem:[%s5043_s15 + $0x20] sm:$0xff] %v3388_v5   ;;  %v2572_v12 = vadd.f32 %v3508_v6, %v5036_v18  ;;  %v3511_v13 = vadd.f32 %v3510_v10, %v3509_v8  ;;  %v3623_v14 = vadd.f32 %v3622_v11, %v3621_v9 }
 0x2ad   : > { %v2733_v19 = vadd.f32 %v3620_v7, %v2572_v12  ;;  %v2575_v20 = vadd.f32 %v3511_v13, %v5036_v18 }
 0x2af   : > { %v2736_v21 = vadd.f32 %v3623_v14, %v2575_v20  ;;  %v3512_v22 = vpop.f32.mrb[88].mxu0  ;;  %v3624_v23 = vpop.f32.mrb[88].mxu1 }
 0x2b0   : > { %v3513_v24 = vpop.f32.mrb[89].mxu0  ;;  %v3625_v25 = vpop.f32.mrb[89].mxu1 }
 0x2b1   : > { %v3393_v26 = vpack.c.bf16 %v2736_v21, %v2733_v19  ;;  %v3514_v27 = vadd.f32 %v3513_v24, %v3512_v22  ;;  %v3626_v28 = vadd.f32 %v3625_v25, %v3624_v23  ;;  %v3515_v29 = vpop.f32.mrb[90].mxu0  ;;  %v3627_v30 = vpop.f32.mrb[90].mxu1 }
 0x2b2   : > { %v3516_v31 = vpop.f32.mrb[91].mxu0  ;;  %v3628_v32 = vpop.f32.mrb[91].mxu1 }
 0x2b3   : > { %3449 = vst [vmem:[%s5043_s15 + $0x28] sm:$0xff] %v3393_v26   ;;  %v2580_v33 = vadd.f32 %v3514_v27, %v5036_v18  ;;  %v3517_v34 = vadd.f32 %v3516_v31, %v3515_v29  ;;  %v3629_v35 = vadd.f32 %v3628_v32, %v3627_v30 }
 0x2b5   : > { %v2741_v36 = vadd.f32 %v3626_v28, %v2580_v33  ;;  %v2583_v37 = vadd.f32 %v3517_v34, %v5036_v18 }
 0x2b7   : > { %v2744_v38 = vadd.f32 %v3629_v35, %v2583_v37  ;;  %v3518_v39 = vpop.f32.mrb[92].mxu0  ;;  %v3630_v40 = vpop.f32.mrb[92].mxu1 }
 0x2b8   : > { %v3519_v41 = vpop.f32.mrb[93].mxu0  ;;  %v3631_v42 = vpop.f32.mrb[93].mxu1 }
 0x2b9   : > { %v3398_v43 = vpack.c.bf16 %v2744_v38, %v2741_v36  ;;  %v3520_v15 = vadd.f32 %v3519_v41, %v3518_v39  ;;  %v3632_v44 = vadd.f32 %v3631_v42, %v3630_v40  ;;  %v3521_v16 = vpop.f32.mrb[94].mxu0  ;;  %v3633_v17 = vpop.f32.mrb[94].mxu1 }
 0x2ba   : > { %v3522_v45 = vpop.f32.mrb[95].mxu0  ;;  %v3634_v46 = vpop.f32.mrb[95].mxu1 }
 0x2bb   : > { %3450 = vst [vmem:[%s5043_s15 + $0x30] sm:$0xff] %v3398_v43   ;;  %v2588_v47 = vadd.f32 %v3520_v15, %v5036_v18  ;;  %v3523_v48 = vadd.f32 %v3522_v45, %v3521_v16  ;;  %v3635_v49 = vadd.f32 %v3634_v46, %v3633_v17 }
 0x2bd   : > { %v2749_v50 = vadd.f32 %v3632_v44, %v2588_v47  ;;  %v2591_v51 = vadd.f32 %v3523_v48, %v5036_v18 }
 0x2bf   : > { %v2752_v52 = vadd.f32 %v3635_v49, %v2591_v51  ;;  %v3524_v53 = vpop.f32.mrb[96].mxu0  ;;  %v3636_v54 = vpop.f32.mrb[96].mxu1 }
 0x2c0   : > { %v3525_v55 = vpop.f32.mrb[97].mxu0  ;;  %v3637_v56 = vpop.f32.mrb[97].mxu1 }
 0x2c1   : > { %v3403_v57 = vpack.c.bf16 %v2752_v52, %v2749_v50  ;;  %v3526_v58 = vadd.f32 %v3525_v55, %v3524_v53  ;;  %v3638_v59 = vadd.f32 %v3637_v56, %v3636_v54  ;;  %v3527_v60 = vpop.f32.mrb[98].mxu0  ;;  %v3639_v61 = vpop.f32.mrb[98].mxu1 }
 0x2c2   : > { %v3528_v62 = vpop.f32.mrb[99].mxu0  ;;  %v3640_v63 = vpop.f32.mrb[99].mxu1 }
 0x2c3   : > { %3451 = vst [vmem:[%s5043_s15 + $0x38] sm:$0xff] %v3403_v57   ;;  %v2596_v0 = vadd.f32 %v3526_v58, %v5036_v18  ;;  %v3529_v1 = vadd.f32 %v3528_v62, %v3527_v60  ;;  %v3641_v2 = vadd.f32 %v3640_v63, %v3639_v61 }
 0x2c5   : > { %v2757_v3 = vadd.f32 %v3638_v59, %v2596_v0  ;;  %v2599_v4 = vadd.f32 %v3529_v1, %v5036_v18 }
 0x2c7   : > { %v2760_v5 = vadd.f32 %v3641_v2, %v2599_v4  ;;  %v3530_v6 = vpop.f32.mrb[100].mxu0  ;;  %v3642_v7 = vpop.f32.mrb[100].mxu1 }
 0x2c8   : > { %v3531_v8 = vpop.f32.mrb[101].mxu0  ;;  %v3643_v9 = vpop.f32.mrb[101].mxu1 }
 0x2c9   : > { %v3408_v10 = vpack.c.bf16 %v2760_v5, %v2757_v3  ;;  %v3532_v11 = vadd.f32 %v3531_v8, %v3530_v6  ;;  %v3644_v12 = vadd.f32 %v3643_v9, %v3642_v7  ;;  %v3533_v13 = vpop.f32.mrb[102].mxu0  ;;  %v3645_v14 = vpop.f32.mrb[102].mxu1 }
 0x2ca   : > { %v3534_v19 = vpop.f32.mrb[103].mxu0  ;;  %v3646_v20 = vpop.f32.mrb[103].mxu1 }
 0x2cb   : > { %3452 = vst [vmem:[%s5043_s15 + $0x40] sm:$0xff] %v3408_v10   ;;  %v2604_v21 = vadd.f32 %v3532_v11, %v5036_v18  ;;  %v3535_v22 = vadd.f32 %v3534_v19, %v3533_v13  ;;  %v3647_v23 = vadd.f32 %v3646_v20, %v3645_v14 }
 0x2cd   : > { %v2765_v24 = vadd.f32 %v3644_v12, %v2604_v21  ;;  %v2607_v25 = vadd.f32 %v3535_v22, %v5036_v18 }
 0x2cf   : > { %v2768_v26 = vadd.f32 %v3647_v23, %v2607_v25  ;;  %v3536_v27 = vpop.f32.mrb[104].mxu0  ;;  %v3648_v28 = vpop.f32.mrb[104].mxu1 }
 0x2d0   : > { %v3537_v29 = vpop.f32.mrb[105].mxu0  ;;  %v3649_v30 = vpop.f32.mrb[105].mxu1 }
 0x2d1   : > { %v3413_v31 = vpack.c.bf16 %v2768_v26, %v2765_v24  ;;  %v3538_v32 = vadd.f32 %v3537_v29, %v3536_v27  ;;  %v3650_v33 = vadd.f32 %v3649_v30, %v3648_v28  ;;  %v3539_v34 = vpop.f32.mrb[106].mxu0  ;;  %v3651_v35 = vpop.f32.mrb[106].mxu1 }
 0x2d2   : > { %v3540_v36 = vpop.f32.mrb[107].mxu0  ;;  %v3652_v37 = vpop.f32.mrb[107].mxu1 }
 0x2d3   : > { %3453 = vst [vmem:[%s5043_s15 + $0x48] sm:$0xff] %v3413_v31   ;;  %v2612_v38 = vadd.f32 %v3538_v32, %v5036_v18  ;;  %v3541_v39 = vadd.f32 %v3540_v36, %v3539_v34  ;;  %v3653_v40 = vadd.f32 %v3652_v37, %v3651_v35 }
 0x2d5   : > { %v2773_v41 = vadd.f32 %v3650_v33, %v2612_v38  ;;  %v2615_v42 = vadd.f32 %v3541_v39, %v5036_v18 }
 0x2d7   : > { %v2776_v43 = vadd.f32 %v3653_v40, %v2615_v42  ;;  %v3542_v15 = vpop.f32.mrb[108].mxu0  ;;  %v3654_v44 = vpop.f32.mrb[108].mxu1 }
 0x2d8   : > { %v3543_v16 = vpop.f32.mrb[109].mxu0  ;;  %v3655_v17 = vpop.f32.mrb[109].mxu1 }
 0x2d9   : > { %v3418_v45 = vpack.c.bf16 %v2776_v43, %v2773_v41  ;;  %v3544_v46 = vadd.f32 %v3543_v16, %v3542_v15  ;;  %v3656_v47 = vadd.f32 %v3655_v17, %v3654_v44  ;;  %v3545_v48 = vpop.f32.mrb[110].mxu0  ;;  %v3657_v49 = vpop.f32.mrb[110].mxu1 }
 0x2da   : > { %v3546_v50 = vpop.f32.mrb[111].mxu0  ;;  %v3658_v51 = vpop.f32.mrb[111].mxu1 }
 0x2db   : > { %3454 = vst [vmem:[%s5043_s15 + $0x50] sm:$0xff] %v3418_v45   ;;  %v2620_v52 = vadd.f32 %v3544_v46, %v5036_v18  ;;  %v3547_v53 = vadd.f32 %v3546_v50, %v3545_v48  ;;  %v3659_v54 = vadd.f32 %v3658_v51, %v3657_v49 }
 0x2dd   : > { %v2781_v55 = vadd.f32 %v3656_v47, %v2620_v52  ;;  %v2623_v56 = vadd.f32 %v3547_v53, %v5036_v18 }
 0x2df   : > { %v2784_v57 = vadd.f32 %v3659_v54, %v2623_v56  ;;  %v3548_v58 = vpop.f32.mrb[112].mxu0  ;;  %v3660_v59 = vpop.f32.mrb[112].mxu1 }
 0x2e0   : > { %v3549_v60 = vpop.f32.mrb[113].mxu0  ;;  %v3661_v61 = vpop.f32.mrb[113].mxu1 }
 0x2e1   : > { %v3423_v62 = vpack.c.bf16 %v2784_v57, %v2781_v55  ;;  %v3550_v63 = vadd.f32 %v3549_v60, %v3548_v58  ;;  %v3662_v0 = vadd.f32 %v3661_v61, %v3660_v59  ;;  %v3551_v1 = vpop.f32.mrb[114].mxu0  ;;  %v3663_v2 = vpop.f32.mrb[114].mxu1 }
 0x2e2   : > { %v3552_v3 = vpop.f32.mrb[115].mxu0  ;;  %v3664_v4 = vpop.f32.mrb[115].mxu1 }
 0x2e3   : > { %3455 = vst [vmem:[%s5043_s15 + $0x58] sm:$0xff] %v3423_v62   ;;  %v2628_v5 = vadd.f32 %v3550_v63, %v5036_v18  ;;  %v3553_v6 = vadd.f32 %v3552_v3, %v3551_v1  ;;  %v3665_v7 = vadd.f32 %v3664_v4, %v3663_v2 }
 0x2e5   : > { %v2789_v8 = vadd.f32 %v3662_v0, %v2628_v5  ;;  %v2631_v9 = vadd.f32 %v3553_v6, %v5036_v18 }
 0x2e7   : > { %v2792_v10 = vadd.f32 %v3665_v7, %v2631_v9  ;;  %v3554_v11 = vpop.f32.mrb[116].mxu0  ;;  %v3666_v12 = vpop.f32.mrb[116].mxu1 }
 0x2e8   : > { %v3555_v13 = vpop.f32.mrb[117].mxu0  ;;  %v3667_v14 = vpop.f32.mrb[117].mxu1 }
 0x2e9   : > { %v3428_v19 = vpack.c.bf16 %v2792_v10, %v2789_v8  ;;  %v3556_v20 = vadd.f32 %v3555_v13, %v3554_v11  ;;  %v3668_v21 = vadd.f32 %v3667_v14, %v3666_v12  ;;  %v3557_v22 = vpop.f32.mrb[118].mxu0  ;;  %v3669_v23 = vpop.f32.mrb[118].mxu1 }
 0x2ea   : > { %v3558_v24 = vpop.f32.mrb[119].mxu0  ;;  %v3670_v25 = vpop.f32.mrb[119].mxu1 }
 0x2eb   : > { %3456 = vst [vmem:[%s5043_s15 + $0x60] sm:$0xff] %v3428_v19   ;;  %v2636_v26 = vadd.f32 %v3556_v20, %v5036_v18  ;;  %v3559_v27 = vadd.f32 %v3558_v24, %v3557_v22  ;;  %v3671_v28 = vadd.f32 %v3670_v25, %v3669_v23 }
 0x2ed   : > { %v2797_v29 = vadd.f32 %v3668_v21, %v2636_v26  ;;  %v2639_v30 = vadd.f32 %v3559_v27, %v5036_v18 }
 0x2ef   : > { %v2800_v31 = vadd.f32 %v3671_v28, %v2639_v30  ;;  %v3560_v32 = vpop.f32.mrb[120].mxu0  ;;  %v3672_v33 = vpop.f32.mrb[120].mxu1 }
 0x2f0   : > { %v3561_v34 = vpop.f32.mrb[121].mxu0  ;;  %v3673_v35 = vpop.f32.mrb[121].mxu1 }
 0x2f1   : > { %v3433_v36 = vpack.c.bf16 %v2800_v31, %v2797_v29  ;;  %v3562_v37 = vadd.f32 %v3561_v34, %v3560_v32  ;;  %v3674_v38 = vadd.f32 %v3673_v35, %v3672_v33  ;;  %v3563_v39 = vpop.f32.mrb[122].mxu0  ;;  %v3675_v40 = vpop.f32.mrb[122].mxu1 }
 0x2f2   : > { %v3564_v41 = vpop.f32.mrb[123].mxu0  ;;  %v3676_v42 = vpop.f32.mrb[123].mxu1 }
 0x2f3   : > { %3457 = vst [vmem:[%s5043_s15 + $0x68] sm:$0xff] %v3433_v36   ;;  %v2644_v43 = vadd.f32 %v3562_v37, %v5036_v18  ;;  %v3565_v15 = vadd.f32 %v3564_v41, %v3563_v39  ;;  %v3677_v44 = vadd.f32 %v3676_v42, %v3675_v40 }
 0x2f5   : > { %v2805_v16 = vadd.f32 %v3674_v38, %v2644_v43  ;;  %v2647_v17 = vadd.f32 %v3565_v15, %v5036_v18 }
 0x2f7   : > { %v2808_v45 = vadd.f32 %v3677_v44, %v2647_v17  ;;  %v3566_v46 = vpop.f32.mrb[124].mxu0  ;;  %v3678_v47 = vpop.f32.mrb[124].mxu1 }
 0x2f8   : > { %v3567_v48 = vpop.f32.mrb[125].mxu0  ;;  %v3679_v49 = vpop.f32.mrb[125].mxu1 }
 0x2f9   : > { %v3438_v50 = vpack.c.bf16 %v2808_v45, %v2805_v16  ;;  %v3568_v51 = vadd.f32 %v3567_v48, %v3566_v46  ;;  %v3680_v52 = vadd.f32 %v3679_v49, %v3678_v47  ;;  %v3569_v53 = vpop.f32.mrb[126].mxu0  ;;  %v3681_v54 = vpop.f32.mrb[126].mxu1 }
 0x2fa   : > { %v3570_v55 = vpop.f32.mrb[127].mxu0  ;;  %v3682_v56 = vpop.f32.mrb[127].mxu1 }
 0x2fb   : > { %3458 = vst [vmem:[%s5043_s15 + $0x70] sm:$0xff] %v3438_v50   ;;  %v2652_v57 = vadd.f32 %v3568_v51, %v5036_v18  ;;  %v3571_v58 = vadd.f32 %v3570_v55, %v3569_v53  ;;  %v3683_v59 = vadd.f32 %v3682_v56, %v3681_v54 }
 0x2fd   : > { %v2813_v60 = vadd.f32 %v3680_v52, %v2652_v57  ;;  %v2655_v61 = vadd.f32 %v3571_v58, %v5036_v18 }
 0x2ff   : > { %v2816_v62 = vadd.f32 %v3683_v59, %v2655_v61 }
 0x301   : > { %v3443_v63 = vpack.c.bf16 %v2816_v62, %v2813_v60 }
 0x303   : > { %3459 = vst [vmem:[%s5043_s15 + $0x78] sm:$0xff] %v3443_v63  }
 0x304   : > { %4270 = shalt.err (!%p4267_p3)
}
 0x305   : > { %s4271_s10 = scalar_lea.hbm %s5095_s17, 2048  ;;  %s4275_s12 = scalar_lea.hbm %s5148_s5, 4096 }
 0x306   : > { %p4272_p4 = scmp.ne.s32.totalorder %s5095_s17, %s4271_s10  ;;  %p4276_p9 = scmp.lt.u32.totalorder %s5095_s17, %s5148_s5 }
 0x307   : > { %p4277_p10 = scmp.lt.u32.totalorder %s4275_s12, %s4271_s10  ;;  %p4279_p12 = scmp.lt.u32.totalorder %s4271_s10, %s5095_s17 }
 0x308   : > { %p4273_p7 = pnand %p4272_p4, %p4392_p5 }
 0x309   : > { %p4278_p11 = por %p4277_p10, %p4276_p9 }
 0x30a   : > { %p4274_p8 = pneg %p4273_p7 }
 0x30b   : > { %p4280_p13 = por %p4279_p12, %p4278_p11 }
 0x30d   : > { %p4281_p0 = pnand %p4280_p13, %p4274_p8 }
 0x30f   : > { %4284 = shalt.err (!%p4281_p0)
}
 0x310   : > { %s4322_s15 = smov 64   ;;  %s4323_s16 = smov 4  }
 0x311   : > { %3940 = dma.vmem_to_hbm [thread:$0]  (%p4392_p5), %s5097_s23, 2048, %s5095_s17, %s5102_s6, %s4322_s15, %s4322_s15, %s4323_s16  }
 0x312 PF: > { %p3946_p1 = scmp.ge.s32.totalorder %s4319_s21, 2  ;;  %s3008_s25 = sand.u32 1, %s4307_s18  }
 0x313   : > { %s3009_s26 = scalar_lea.sflag [#allocation3], %s3008_s25 }
 0x314   : > { %p3943_p2 = pnand %p3946_p1, %p4396_p6 }
 0x316   : > { %4302 = dma.done.wait (!%p3943_p2), %s3009_s26, 2048  }
 0x317   : > { %4304 = vsyncadd (!%p3943_p2), %s3009_s26, 4294965248  ;;  %p15_p3 = scmp.ge.s32.totalorder %s4379_s24, 4   ;;  %s5151_s18 = smov %s4311_s19 }
 0x318   : > { %s5152_s19 = smov %s4315_s20  ;;  %s5153_s20 = smov %s4390_s27 }
 0x319   : > { %s5154_s21 = smov %s4379_s24  ;;  %17 = sbr.rel (!%p15_p3) target bundleno = 3 (0x3), region = 75 }
 0x320   :  { %3014 = vsyncpa [#allocation3], 1 }
 0x321   :  { %3016 = vsyncpa [#allocation3 + $0x1], 1 }

// kernel: tpu_custom_call.1
= control target key start
LH: loop header
LB: loop body
LE: loop exit
PB: predicated region body
PF: predicated region fallthrough
CT: control target
= control target key end

     0   :  { %10 = vsyncpa [#allocation3], 0  ;;  %s5143_s0 = inlined_call_operand.vmem [shape: bf16[512,392], index: 0, kind: input, shape index: {}]   ;;  %s5144_s1 = inlined_call_operand.vmem [shape: bf16[392,512], index: 1, kind: input, shape index: {}]   ;;  %s5145_s2 = inlined_call_operand.vmem [shape: f32[1,512], index: 2, kind: input, shape index: {}]   ;;  %s5146_s3 = inlined_call_operand.vmem [shape: bf16[512,128], index: 3, kind: input, shape index: {}]   ;;  %s5147_s4 = inlined_call_operand.vmem [shape: f32[1,128], index: 4, kind: input, shape index: {}]   ;;  %s5148_s5 = inlined_call_operand.hbm [shape: bf16[512,128], index: 5, kind: output, shape index: {}]  }
   0x1   :  { %12 = vsyncpa [#allocation3 + $0x1], 0  ;;  %s4354_s18 = smov 0   ;;  %s4356_s19 = smov 0  }
   0x2   :  { %s4358_s20 = smov 0   ;;  %s4360_s21 = smov 0  }
   0x3 LB: > { %s4375_s22 = sadd.s32 4294967295, %s4319_s21   ;;  %s3055_s23 = sadd.s32 4294967294, %s4319_s21   ;;  %s4319_s21 = sphi %s4360_s21, %s5154_s21   ;;  %s4315_s20 = sphi %s4358_s20, %s5153_s20   ;;  %s4311_s19 = sphi %s4356_s19, %s5152_s19   ;;  %s4307_s18 = sphi %s4354_s18, %s5151_s18  }
   0x4   : > { %s4379_s24 = sadd.s32 1, %s4319_s21   ;;  %s135_s25 = sadd.s32 1, %s4315_s20 }
   0x5   : > { %s132_s26 = ssub.s32 %s4319_s21, %s4379_s24  ;;  %p145_p0 = scmp.ne.s32.totalorder %s4315_s20, %s4311_s19 }
   0x6   : > { %p133_p1 = scmp.eq.s32.totalorder %s132_s26, 0  ;;  %p146_p2 = scmp.eq.s32.totalorder %s4375_s22, 1 }
   0x7   : > { %p151_p3 = scmp.ne.s32.totalorder %s4311_s19, %s4307_s18  ;;  %p152_p4 = scmp.eq.s32.totalorder %s3055_s23, 1 }
   0x8   : > { %s4390_s27 = scalar_select %p133_p1, %s4315_s20, %s135_s25  }
   0x9   : > { %p4392_p5 = por %p146_p2, %p145_p0  ;;  %p4396_p6 = por %p152_p4, %p151_p3 }
   0xa   : > { %p3058_p7 = scmp.ge.s32.totalorder %s4319_s21, 1  ;;  %p192_p8 = scmp.lt.s32.totalorder %s4319_s21, 3 }
   0xc   : > { %p193_p9 = pnand %p3058_p7, %p192_p8 }
   0xd   : > { %v3981_v0 = vld [vmem:[%s5144_s1 + $0x4] ss:$16 sps:$4 sm:$0xff] (!%p193_p9)   ;;  %v3983_v1 = vld [vmem:[%s5144_s1 + $0xc] ss:$16 sps:$4 sm:$0xff] (!%p193_p9)   ;;  %v3985_v2 = vld [vmem:[%s5144_s1] ss:$16 sps:$4 sm:$0xff] (!%p193_p9)  }
   0xe   : > { %196 = sbr.rel (%p193_p9) target bundleno = 786 (0x312), region = 40  ;;  %1270 = vmatprep.subr.bf16.mxu0 (!%p193_p9), %v3981_v0  ;;  %v3986_v3 = vld [vmem:[%s5144_s1 + $0x8] ss:$16 sps:$4 sm:$0xff] (!%p193_p9)   ;;  %1656 = vmatprep.subr.bf16.mxu1 (!%p193_p9), %v3983_v1  ;;  %v3987_v4 = vld [vmem:[%s5144_s1 + $0x24] ss:$16 sps:$4 sm:$0xff] (!%p193_p9)   ;;  %s3060_s17 = sshll.u32 (!%p193_p9), %s4375_s22, 5 }
   0xf   : > { %1271 = vmatpush1.bf16.msra.mxu0 (!%p193_p9), %v3985_v2  ;;  %1657 = vmatpush1.bf16.msra.mxu1 (!%p193_p9), %v3986_v3  ;;  %v3989_v5 = vld [vmem:[%s5144_s1 + $0x2c] ss:$16 sps:$4 sm:$0xff] (!%p193_p9)   ;;  %v3991_v6 = vld [vmem:[%s5144_s1 + $0x20] ss:$16 sps:$4 sm:$0xff] (!%p193_p9)   ;;  %v3992_v7 = vld [vmem:[%s5144_s1 + $0x28] ss:$16 sps:$4 sm:$0xff] (!%p193_p9)  }
  0x10   : > { %1272 = vmatprep.subr.bf16.mxu0 (!%p193_p9), %v3987_v4  ;;  %1658 = vmatprep.subr.bf16.mxu1 (!%p193_p9), %v3989_v5  ;;  %v3993_v8 = vld [vmem:[%s5144_s1 + $0x44] ss:$16 sps:$4 sm:$0xff] (!%p193_p9)   ;;  %v3995_v9 = vld [vmem:[%s5144_s1 + $0x4c] ss:$16 sps:$4 sm:$0xff] (!%p193_p9)   ;;  %v3997_v10 = vld [vmem:[%s5144_s1 + $0x40] ss:$16 sps:$4 sm:$0xff] (!%p193_p9)  }
  0x11   : > { %v3998_v11 = vld [vmem:[%s5144_s1 + $0x48] ss:$16 sps:$4 sm:$0xff] (!%p193_p9)   ;;  %v3999_v12 = vld [vmem:[%s5144_s1 + $0x64] ss:$16 sps:$4 sm:$0xff] (!%p193_p9)   ;;  %v4001_v13 = vld [vmem:[%s5144_s1 + $0x6c] ss:$16 sps:$4 sm:$0xff] (!%p193_p9)  }
  0x12   : > { %v4003_v14 = vld [vmem:[%s5144_s1 + $0x60] ss:$16 sps:$4 sm:$0xff] (!%p193_p9)   ;;  %v4004_v15 = vld [vmem:[%s5144_s1 + $0x68] ss:$16 sps:$4 sm:$0xff] (!%p193_p9)   ;;  %v4005_v16 = vld [vmem:[%s5144_s1 + $0x84] ss:$16 sps:$4 sm:$0xff] (!%p193_p9)  }
  0x13   : > { %1273 = vmatpush1.bf16.msra.mxu0 (!%p193_p9), %v3991_v6  ;;  %1659 = vmatpush1.bf16.msra.mxu1 (!%p193_p9), %v3992_v7  ;;  %v4007_v17 = vld [vmem:[%s5144_s1 + $0x8c] ss:$16 sps:$4 sm:$0xff] (!%p193_p9)   ;;  %v4009_v18 = vld [vmem:[%s5144_s1 + $0x80] ss:$16 sps:$4 sm:$0xff] (!%p193_p9)   ;;  %v4010_v19 = vld [vmem:[%s5144_s1 + $0x88] ss:$16 sps:$4 sm:$0xff] (!%p193_p9)  }
  0x14   : > { %1274 = vmatprep.subr.bf16.mxu0 (!%p193_p9), %v3993_v8  ;;  %1660 = vmatprep.subr.bf16.mxu1 (!%p193_p9), %v3995_v9  ;;  %v4011_v20 = vld [vmem:[%s5144_s1 + $0xa4] ss:$16 sps:$4 sm:$0xff] (!%p193_p9)   ;;  %v4013_v21 = vld [vmem:[%s5144_s1 + $0xac] ss:$16 sps:$4 sm:$0xff] (!%p193_p9)   ;;  %v4015_v22 = vld [vmem:[%s5144_s1 + $0xa0] ss:$16 sps:$4 sm:$0xff] (!%p193_p9)  }
  0x15   : > { %v4016_v23 = vld [vmem:[%s5144_s1 + $0xa8] ss:$16 sps:$4 sm:$0xff]   ;;  %v4017_v24 = vld [vmem:[%s5144_s1 + $0xc4] ss:$16 sps:$4 sm:$0xff]   ;;  %v4019_v25 = vld [vmem:[%s5144_s1 + $0xcc] ss:$16 sps:$4 sm:$0xff]  }
  0x16   : > { %v4021_v26 = vld [vmem:[%s5144_s1 + $0xc0] ss:$16 sps:$4 sm:$0xff]   ;;  %v4022_v27 = vld [vmem:[%s5144_s1 + $0xc8] ss:$16 sps:$4 sm:$0xff]   ;;  %v4023_v28 = vld [vmem:[%s5144_s1 + $0xe4] ss:$16 sps:$4 sm:$0xff]  }
  0x17   : > { %1275 = vmatpush1.bf16.msra.mxu0 %v3997_v10  ;;  %1661 = vmatpush1.bf16.msra.mxu1 %v3998_v11  ;;  %v4025_v29 = vld [vmem:[%s5144_s1 + $0xec] ss:$16 sps:$4 sm:$0xff]   ;;  %v4027_v30 = vld [vmem:[%s5144_s1 + $0xe0] ss:$16 sps:$4 sm:$0xff]   ;;  %v4028_v31 = vld [vmem:[%s5144_s1 + $0xe8] ss:$16 sps:$4 sm:$0xff]  }
  0x18   : > { %1276 = vmatprep.subr.bf16.mxu0 %v3999_v12  ;;  %1662 = vmatprep.subr.bf16.mxu1 %v4001_v13  ;;  %v4029_v32 = vld [vmem:[%s5144_s1 + $0x104] ss:$16 sps:$4 sm:$0xff]   ;;  %v4031_v33 = vld [vmem:[%s5144_s1 + $0x10c] ss:$16 sps:$4 sm:$0xff]   ;;  %p222_p10 = scmp.lt.s32.totalorder %s3060_s17, 63  ;;  %vm1257_vm0 = vcmask 1043456  }
  0x19   : > { %v4033_v34 = vld [vmem:[%s5144_s1 + $0x100] ss:$16 sps:$4 sm:$0xff]   ;;  %v4034_v35 = vld [vmem:[%s5144_s1 + $0x108] ss:$16 sps:$4 sm:$0xff]   ;;  %v4035_v36 = vld [vmem:[%s5144_s1 + $0x124] ss:$16 sps:$4 sm:$0xff]  }
  0x1a   : > { %v4037_v37 = vld [vmem:[%s5144_s1 + $0x12c] ss:$16 sps:$4 sm:$0xff]   ;;  %s5156_s17 = smov (!%p222_p10, %s3060_s17), 63  ;;  %v4039_v38 = vld [vmem:[%s5144_s1 + $0x120] ss:$16 sps:$4 sm:$0xff]   ;;  %vm1208_vm1 = vcmask 64512  }
  0x1b   : > { %1277 = vmatpush1.bf16.msra.mxu0 %v4003_v14  ;;  %1663 = vmatpush1.bf16.msra.mxu1 %v4004_v15  ;;  %v4040_v39 = vld [vmem:[%s5144_s1 + $0x128] ss:$16 sps:$4 sm:$0xff]   ;;  %v4041_v40 = vld [vmem:[%s5144_s1 + $0x144] ss:$16 sps:$4 sm:$0xff]   ;;  %v4043_v41 = vld [vmem:[%s5144_s1 + $0x14c] ss:$16 sps:$4 sm:$0xff]  }
  0x1c   : > { %1278 = vmatprep.subr.bf16.mxu0 %v4005_v16  ;;  %1664 = vmatprep.subr.bf16.mxu1 %v4007_v17  ;;  %s3331_s11 = sshll.u32 %s5156_s17, 4  ;;  %v4045_v42 = vld [vmem:[%s5144_s1 + $0x140] ss:$16 sps:$4 sm:$0xff]   ;;  %v4046_v43 = vld [vmem:[%s5144_s1 + $0x148] ss:$16 sps:$4 sm:$0xff]   ;;  %s218_s13 = sand.u32 1, %s4311_s19  }
  0x1d   : > { %v4047_v44 = vld [vmem:[%s5144_s1 + $0x164] ss:$16 sps:$4 sm:$0xff]   ;;  %s4541_s30 = scalar_lea.vmem %s5143_s0, %s3331_s11  ;;  %v4049_v45 = vld [vmem:[%s5144_s1 + $0x16c] ss:$16 sps:$4 sm:$0xff]   ;;  %v4051_v46 = vld [vmem:[%s5144_s1 + $0x160] ss:$16 sps:$4 sm:$0xff]  }
  0x1e   : > { %v4052_v47 = vld [vmem:[%s5144_s1 + $0x168] ss:$16 sps:$4 sm:$0xff]   ;;  %v4079_v48 = vld [vmem:[%s4541_s30 + $0x4] ss:$16 sps:$4 sm:$0xff]   ;;  %v4055_v50 = vld [vmem:[%s5144_s1 + $0x18c] ss:$16 sps:$4 sm:$0xff]  }
  0x1f   : > { %1279 = vmatpush1.bf16.msra.mxu0 %v4009_v18  ;;  %1665 = vmatpush1.bf16.msra.mxu1 %v4010_v19  ;;  %v4053_v49 = vld [vmem:[%s5144_s1 + $0x184] ss:$16 sps:$4 sm:$0xff]   ;;  %v4057_v51 = vld [vmem:[%s5144_s1 + $0x180] ss:$16 sps:$4 sm:$0xff]   ;;  %v4058_v52 = vld [vmem:[%s5144_s1 + $0x188] ss:$16 sps:$4 sm:$0xff]  }
  0x20   : > { %1280 = vmatprep.subr.bf16.mxu0 %v4011_v20  ;;  %1666 = vmatprep.subr.bf16.mxu1 %v4013_v21  ;;  %v4059_v53 = vld [vmem:[%s5144_s1 + $0x1a4] ss:$16 sps:$4 sm:$0xff]   ;;  %v4061_v54 = vld [vmem:[%s5144_s1 + $0x1ac] ss:$16 sps:$4 sm:$0xff]   ;;  %v4063_v55 = vld [vmem:[%s5144_s1 + $0x1a0] ss:$16 sps:$4 sm:$0xff]  }
  0x21   : > { %1302 = vmatprep.mubr.bf16.mxu0 %v4079_v48  ;;  %1688 = vmatprep.mubr.bf16.mxu1 %v4079_v48  ;;  %v4064_v56 = vld [vmem:[%s5144_s1 + $0x1a8] ss:$16 sps:$4 sm:$0xff]   ;;  %v4065_v57 = vld [vmem:[%s5144_s1 + $0x1c4] ss:$16 sps:$4 sm:$0xff]   ;;  %v4067_v58 = vld [vmem:[%s5144_s1 + $0x1cc] ss:$16 sps:$4 sm:$0xff]  }
  0x22   : > { %v4069_v59 = vld [vmem:[%s5144_s1 + $0x1c0] ss:$16 sps:$4 sm:$0xff]   ;;  %v4070_v60 = vld [vmem:[%s5144_s1 + $0x1c8] ss:$16 sps:$4 sm:$0xff]   ;;  %v4071_v61 = vld [vmem:[%s5144_s1 + $0x1e4] ss:$16 sps:$4 sm:$0xff]  }
  0x23   : > { %1281 = vmatpush1.bf16.msra.mxu0 %v4015_v22  ;;  %1667 = vmatpush1.bf16.msra.mxu1 %v4016_v23  ;;  %v4073_v62 = vld [vmem:[%s5144_s1 + $0x1ec] ss:$16 sps:$4 sm:$0xff]   ;;  %v4075_v63 = vld [vmem:[%s5144_s1 + $0x1e0] ss:$16 sps:$4 sm:$0xff]   ;;  %v4076_v0 = vld [vmem:[%s5144_s1 + $0x1e8] ss:$16 sps:$4 sm:$0xff]  }
  0x24   : > { %1282 = vmatprep.subr.bf16.mxu0 %v4017_v24  ;;  %1668 = vmatprep.subr.bf16.mxu1 %v4019_v25  ;;  %v4082_v1 = vld [vmem:[%s5144_s1 + $0x204] ss:$16 sps:$4 sm:$0xff]   ;;  %v4085_v2 = vld [vmem:[%s5144_s1 + $0x20c] ss:$16 sps:$4 sm:$0xff]   ;;  %v4077_v3 = vld [vmem:[%s4541_s30] ss:$16 sps:$4 sm:$0xff]  }
  0x25   : > { %v4080_v4 = vld [vmem:[%s5144_s1 + $0x200] ss:$16 sps:$4 sm:$0xff]   ;;  %v4083_v5 = vld [vmem:[%s5144_s1 + $0x208] ss:$16 sps:$4 sm:$0xff]   ;;  %v4086_v6 = vld [vmem:[%s4541_s30 + $0x24] ss:$16 sps:$4 sm:$0xff]  }
  0x26   : > { %v4093_v7 = vld [vmem:[%s5144_s1 + $0x224] ss:$16 sps:$4 sm:$0xff]   ;;  %v4097_v8 = vld [vmem:[%s5144_s1 + $0x22c] ss:$16 sps:$4 sm:$0xff]   ;;  %v4091_v9 = vld [vmem:[%s5144_s1 + $0x220] ss:$16 sps:$4 sm:$0xff]  }
  0x27   : > { %1283 = vmatpush1.bf16.msra.mxu0 %v4021_v26  ;;  %1669 = vmatpush1.bf16.msra.mxu1 %v4022_v27  ;;  %v4095_v10 = vld [vmem:[%s5144_s1 + $0x228] ss:$16 sps:$4 sm:$0xff]   ;;  %v4103_v11 = vld [vmem:[%s5144_s1 + $0x244] ss:$16 sps:$4 sm:$0xff]   ;;  %v4108_v12 = vld [vmem:[%s5144_s1 + $0x24c] ss:$16 sps:$4 sm:$0xff]  }
  0x28   : > { %1284 = vmatprep.subr.bf16.mxu0 %v4023_v28  ;;  %1670 = vmatprep.subr.bf16.mxu1 %v4025_v29  ;;  %v4088_v13 = vld [vmem:[%s4541_s30 + $0x20] ss:$16 sps:$4 sm:$0xff]   ;;  %v4089_v14 = vld [vmem:[%s4541_s30 + $0x44] ss:$16 sps:$4 sm:$0xff]   ;;  %v4106_v16 = vld [vmem:[%s5144_s1 + $0x248] ss:$16 sps:$4 sm:$0xff]  }
  0x29   : > { %v4101_v15 = vld [vmem:[%s5144_s1 + $0x240] ss:$16 sps:$4 sm:$0xff]   ;;  %v4115_v17 = vld [vmem:[%s5144_s1 + $0x264] ss:$16 sps:$4 sm:$0xff]   ;;  %v4118_v18 = vld [vmem:[%s5144_s1 + $0x26c] ss:$16 sps:$4 sm:$0xff]  }
  0x2a   : > { %v4113_v19 = vld [vmem:[%s5144_s1 + $0x260] ss:$16 sps:$4 sm:$0xff]   ;;  %v4116_v20 = vld [vmem:[%s5144_s1 + $0x268] ss:$16 sps:$4 sm:$0xff]   ;;  %v4127_v21 = vld [vmem:[%s5144_s1 + $0x284] ss:$16 sps:$4 sm:$0xff]  }
  0x2b   : > { %1285 = vmatpush1.bf16.msra.mxu0 %v4027_v30  ;;  %1671 = vmatpush1.bf16.msra.mxu1 %v4028_v31  ;;  %v4130_v22 = vld [vmem:[%s5144_s1 + $0x28c] ss:$16 sps:$4 sm:$0xff]   ;;  %v4094_v23 = vld [vmem:[%s4541_s30 + $0x40] ss:$16 sps:$4 sm:$0xff]   ;;  %v4098_v24 = vld [vmem:[%s4541_s30 + $0x64] ss:$16 sps:$4 sm:$0xff]  }
  0x2c   : > { %1286 = vmatprep.subr.bf16.mxu0 %v4029_v32  ;;  %1672 = vmatprep.subr.bf16.mxu1 %v4031_v33  ;;  %v4125_v25 = vld [vmem:[%s5144_s1 + $0x280] ss:$16 sps:$4 sm:$0xff]   ;;  %v4128_v26 = vld [vmem:[%s5144_s1 + $0x288] ss:$16 sps:$4 sm:$0xff]   ;;  %v4139_v27 = vld [vmem:[%s5144_s1 + $0x2a4] ss:$16 sps:$4 sm:$0xff]  }
  0x2d   : > { %v4142_v28 = vld [vmem:[%s5144_s1 + $0x2ac] ss:$16 sps:$4 sm:$0xff]   ;;  %v4137_v29 = vld [vmem:[%s5144_s1 + $0x2a0] ss:$16 sps:$4 sm:$0xff]   ;;  %v4140_v31 = vld [vmem:[%s5144_s1 + $0x2a8] ss:$16 sps:$4 sm:$0xff]  }
  0x2e   : > { %v4100_v30 = vld [vmem:[%s4541_s30 + $0x60] ss:$16 sps:$4 sm:$0xff]   ;;  %v4148_v32 = vld [vmem:[%s5144_s1 + $0x2c4] ss:$16 sps:$4 sm:$0xff]   ;;  %v4154_v33 = vld [vmem:[%s5144_s1 + $0x2cc] ss:$16 sps:$4 sm:$0xff]  }
  0x2f   : > { %1287 = vmatpush1.bf16.msra.mxu0 %v4033_v34  ;;  %1673 = vmatpush1.bf16.msra.mxu1 %v4034_v35  ;;  %v4104_v34 = vld [vmem:[%s4541_s30 + $0x84] ss:$16 sps:$4 sm:$0xff]   ;;  %v4146_v35 = vld [vmem:[%s5144_s1 + $0x2c0] ss:$16 sps:$4 sm:$0xff]   ;;  %s3059_s14 = sshll.u32 %s218_s13, 7  ;;  %s3364_s16 = sshll.u32 %s4375_s22, 11 }
  0x30   : > { %1288 = vmatprep.subr.bf16.mxu0 %v4035_v36  ;;  %1674 = vmatprep.subr.bf16.mxu1 %v4037_v37  ;;  %v4152_v36 = vld [vmem:[%s5144_s1 + $0x2c8] ss:$16 sps:$4 sm:$0xff]   ;;  %v4160_v37 = vld [vmem:[%s5144_s1 + $0x2e4] ss:$16 sps:$4 sm:$0xff]   ;;  %s5043_s15 = scalar_lea.vmem [#allocation2], %s3059_s14  ;;  %s5095_s17 = scalar_lea.hbm %s5148_s5, %s3364_s16 }
  0x31   : > { %s2993_s23 = sshll.u32 %s5043_s15, 4  ;;  %s5102_s6 = scalar_lea.sflag [#allocation3], %s218_s13  ;;  %s5097_s23 = int_to_ptr.vmem [resolvable:$true] %s2993_s23 }
  0x32   : > { %s4257_s7 = scalar_lea.vmem %s5097_s23, 2048  ;;  %s4321_s22 = smov [#allocation2]  }
  0x33   : > { %1289 = vmatpush1.bf16.msra.mxu0 %v4039_v38  ;;  %1675 = vmatpush1.bf16.msra.mxu1 %v4040_v39  ;;  %v4163_v38 = vld [vmem:[%s5144_s1 + $0x2ec] ss:$16 sps:$4 sm:$0xff]   ;;  %v390_v39 = vld [vmem:[%s5144_s1 + $0x300] sm:$0xff]  ;;  %p4258_p11 = scmp.ne.s32.totalorder %s5097_s23, %s4257_s7  ;;  %s4261_s8 = sshll.u32 %s4321_s22, 4  ;;  %s4262_s8 = int_to_ptr.vmem [resolvable:$false] %s4261_s8 }
  0x34   : > { %1290 = vmatprep.subr.bf16.mxu0 %v4041_v40  ;;  %1676 = vmatprep.subr.bf16.mxu1 %v4043_v41  ;;  %v391_v40 = vld [vmem:[%s5144_s1 + $0x308] sm:$0xff]  ;;  %v4158_v41 = vld [vmem:[%s5144_s1 + $0x2e0] ss:$16 sps:$4 sm:$0xff]   ;;  %s4263_s9 = scalar_lea.vmem %s4262_s8, 4096  ;;  %p4264_p0 = scmp.lt.s32.totalorder %s5097_s23, %s4262_s8 }
  0x35   : > { %v3225_v48 = vcombine.low %v391_v40, %v391_v40  ;;  %p4259_p12 = pnand %p4258_p11, %p4392_p5  ;;  %p4265_p1 = scmp.lt.s32.totalorder %s4263_s9, %s4257_s7 }
  0x37   : > { %1291 = vmatpush1.bf16.msra.mxu0 %v4045_v42  ;;  %1677 = vmatpush1.bf16.msra.mxu1 %v4046_v43  ;;  %v4161_v42 = vld [vmem:[%s5144_s1 + $0x2e8] ss:$16 sps:$4 sm:$0xff]   ;;  %v4109_v43 = vld [vmem:[%s4541_s30 + $0x80] ss:$16 sps:$4 sm:$0xff]   ;;  %p4260_p13 = pneg %p4259_p12  ;;  %p4266_p2 = por %p4265_p1, %p4264_p0 }
  0x38   : > { %1292 = vmatprep.subr.bf16.mxu0 %v4047_v44  ;;  %1678 = vmatprep.subr.bf16.mxu1 %v4049_v45  ;;  %v3224_v44 = vcombine.high %v390_v39, %v390_v39  ;;  %v4110_v45 = vld [vmem:[%s4541_s30 + $0xa4] ss:$16 sps:$4 sm:$0xff]  }
  0x39   : > { %p4267_p3 = pnand %p4266_p2, %p4260_p13 }
  0x3b   : > { %1293 = vmatpush1.bf16.msra.mxu0 %v4051_v46  ;;  %1679 = vmatpush1.bf16.msra.mxu1 %v4052_v47  ;;  %v3223_v46 = vcombine.low %v390_v39, %v390_v39  ;;  %v3226_v47 = vcombine.high %v391_v40, %v391_v40  ;;  %v4249_v39 = vld [vmem:[%s5146_s3 + $0x70] sm:$0xff]  }
  0x3c   : > { %1294 = vmatprep.subr.bf16.mxu0 %v4053_v49  ;;  %1680 = vmatprep.subr.bf16.mxu1 %v4055_v50  ;;  %v1265_v50 = vsel %vm1257_vm0, %v3225_v48, 0  ;;  %v4251_v40 = vld [vmem:[%s5146_s3 + $0xf0] sm:$0xff]   ;;  %v4256_v48 = vld [vmem:[%s5146_s3 + $0xb8] sm:$0xff]  }
  0x3d   : > { %v1259_v49 = vsel %vm1257_vm0, %v3223_v46, 0  ;;  %v4255_v46 = vld [vmem:[%s5146_s3 + $0xf8] sm:$0xff]  }
  0x3f   : > { %1295 = vmatpush1.bf16.msra.mxu0 %v4057_v51  ;;  %1681 = vmatpush1.bf16.msra.mxu1 %v4058_v52  ;;  %v4112_v51 = vld [vmem:[%s4541_s30 + $0xa0] ss:$16 sps:$4 sm:$0xff]   ;;  %v4119_v52 = vld [vmem:[%s4541_s30 + $0xc4] ss:$16 sps:$4 sm:$0xff]  }
  0x40   : > { %1296 = vmatprep.subr.bf16.mxu0 %v4059_v53  ;;  %1682 = vmatprep.subr.bf16.mxu1 %v4061_v54  ;;  %v4121_v53 = vld [vmem:[%s4541_s30 + $0xc0] ss:$16 sps:$4 sm:$0xff]   ;;  %v4122_v54 = vld [vmem:[%s4541_s30 + $0xe4] ss:$16 sps:$4 sm:$0xff]  }
  0x43   : > { %1297 = vmatpush1.bf16.msra.mxu0 %v4063_v55  ;;  %1683 = vmatpush1.bf16.msra.mxu1 %v4064_v56  ;;  %v4124_v55 = vld [vmem:[%s4541_s30 + $0xe0] ss:$16 sps:$4 sm:$0xff]   ;;  %v4131_v56 = vld [vmem:[%s4541_s30 + $0x104] ss:$16 sps:$4 sm:$0xff]  }
  0x44   : > { %1298 = vmatprep.subr.bf16.mxu0 %v4065_v57  ;;  %1684 = vmatprep.subr.bf16.mxu1 %v4067_v58  ;;  %v4133_v57 = vld [vmem:[%s4541_s30 + $0x100] ss:$16 sps:$4 sm:$0xff]   ;;  %v4134_v58 = vld [vmem:[%s4541_s30 + $0x124] ss:$16 sps:$4 sm:$0xff]  }
  0x47   : > { %1299 = vmatpush1.bf16.msra.mxu0 %v4069_v59  ;;  %1685 = vmatpush1.bf16.msra.mxu1 %v4070_v60  ;;  %v4136_v59 = vld [vmem:[%s4541_s30 + $0x120] ss:$16 sps:$4 sm:$0xff]   ;;  %v4143_v60 = vld [vmem:[%s4541_s30 + $0x144] ss:$16 sps:$4 sm:$0xff]  }
  0x48   : > { %1300 = vmatprep.subr.bf16.mxu0 %v4071_v61  ;;  %1686 = vmatprep.subr.bf16.mxu1 %v4073_v62  ;;  %v4145_v61 = vld [vmem:[%s4541_s30 + $0x140] ss:$16 sps:$4 sm:$0xff]   ;;  %v4149_v62 = vld [vmem:[%s4541_s30 + $0x164] ss:$16 sps:$4 sm:$0xff]  }
  0x4b   : > { %1301 = vmatpush1.bf16.msra.mxu0 %v4075_v63  ;;  %1687 = vmatpush1.bf16.msra.mxu1 %v4076_v0  ;;  %v4151_v63 = vld [vmem:[%s4541_s30 + $0x160] ss:$16 sps:$4 sm:$0xff]   ;;  %v4155_v0 = vld [vmem:[%s4541_s30 + $0x184] ss:$16 sps:$4 sm:$0xff]  }
  0x4c   : > { %1463 = vmatprep.subr.bf16.mxu0 %v4082_v1  ;;  %1849 = vmatprep.subr.bf16.mxu1 %v4085_v2  ;;  %v4213_v1 = vld [vmem:[%s5146_s3 + $0x40] sm:$0xff]  }
  0x4d   : > { %v4157_v2 = vld [vmem:[%s4541_s30 + $0x180] ss:$16 sps:$4 sm:$0xff]  }
  0x4e   : > { %1303 = vmatmul.mubr.bf16.vlgmr.msra.gmra.mrb[0].mxu0 %v4077_v3  ;;  %1689 = vmatmul.mubr.bf16.vlgmr.msra.gmra.mrb[0].mxu1 %v4077_v3  ;;  %v4164_v3 = vld [vmem:[%s4541_s30 + $0x1a4] ss:$16 sps:$4 sm:$0xff]  }
  0x4f   : > { %1464 = vmatpush1.bf16.msra.mxu0 %v4080_v4  ;;  %1850 = vmatpush1.bf16.msra.mxu1 %v4083_v5  ;;  %v4218_v4 = vld [vmem:[%s5146_s3 + $0xc0] sm:$0xff]  }
  0x50   : > { %1312 = vmatprep.mubr.bf16.mxu0 %v4086_v6  ;;  %1698 = vmatprep.mubr.bf16.mxu1 %v4086_v6  ;;  %v4166_v5 = vld [vmem:[%s4541_s30 + $0x1a0] ss:$16 sps:$4 sm:$0xff]   ;;  %v4167_v6 = vld [vmem:[%s4541_s30 + $0x1c4] ss:$16 sps:$4 sm:$0xff]  }
  0x51   : > { %1465 = vmatprep.subr.bf16.mxu0 %v4093_v7  ;;  %1851 = vmatprep.subr.bf16.mxu1 %v4097_v8  ;;  %v4169_v7 = vld [vmem:[%s4541_s30 + $0x1c0] ss:$16 sps:$4 sm:$0xff]   ;;  %v4174_v8 = vld [vmem:[%s4541_s30 + $0x1e4] ss:$16 sps:$4 sm:$0xff]  }
  0x53   : > { %1466 = vmatpush1.bf16.msra.mxu0 %v4091_v9  ;;  %1852 = vmatpush1.bf16.msra.mxu1 %v4095_v10  ;;  %v4176_v9 = vld [vmem:[%s4541_s30 + $0x1e0] ss:$16 sps:$4 sm:$0xff]   ;;  %v4179_v10 = vld [vmem:[%s4541_s30 + $0xc] ss:$16 sps:$4 sm:$0xff]  }
  0x54   : > { %1467 = vmatprep.subr.bf16.mxu0 %v4103_v11  ;;  %1853 = vmatprep.subr.bf16.mxu1 %v4108_v12  ;;  %v4177_v11 = vld [vmem:[%s4541_s30 + $0x8] ss:$16 sps:$4 sm:$0xff]   ;;  %v4180_v12 = vld [vmem:[%s4541_s30 + $0x2c] ss:$16 sps:$4 sm:$0xff]  }
  0x56   : > { %1313 = vmatmul.mubr.bf16.gmra.mrb[4].mxu0 %v4088_v13  ;;  %1699 = vmatmul.mubr.bf16.gmra.mrb[4].mxu1 %v4088_v13  ;;  %v4216_v13 = vld [vmem:[%s5146_s3] sm:$0xff]  }
  0x57   : > { %1322 = vmatprep.mubr.bf16.mxu0 %v4089_v14  ;;  %1708 = vmatprep.mubr.bf16.mxu1 %v4089_v14  ;;  %v4219_v14 = vld [vmem:[%s5146_s3 + $0x80] sm:$0xff]  }
  0x58   : > { %1468 = vmatpush1.bf16.msra.mxu0 %v4101_v15  ;;  %1854 = vmatpush1.bf16.msra.mxu1 %v4106_v16  ;;  %v4223_v15 = vld [vmem:[%s5146_s3 + $0x48] sm:$0xff]  }
  0x59   : > { %1469 = vmatprep.subr.bf16.mxu0 %v4115_v17  ;;  %1855 = vmatprep.subr.bf16.mxu1 %v4118_v18  ;;  %v4228_v16 = vld [vmem:[%s5146_s3 + $0xc8] sm:$0xff]  }
  0x5a   : > { %v4226_v17 = vld [vmem:[%s5146_s3 + $0x8] sm:$0xff]  }
  0x5b   : > { %v4229_v18 = vld [vmem:[%s5146_s3 + $0x88] sm:$0xff]  }
  0x5c   : > { %1470 = vmatpush1.bf16.msra.mxu0 %v4113_v19  ;;  %1856 = vmatpush1.bf16.msra.mxu1 %v4116_v20  ;;  %v4233_v19 = vld [vmem:[%s5146_s3 + $0x50] sm:$0xff]  }
  0x5d   : > { %1471 = vmatprep.subr.bf16.mxu0 %v4127_v21  ;;  %1857 = vmatprep.subr.bf16.mxu1 %v4130_v22  ;;  %v4235_v20 = vld [vmem:[%s5146_s3 + $0xd0] sm:$0xff]   ;;  %v4182_v21 = vld [vmem:[%s4541_s30 + $0x28] ss:$16 sps:$4 sm:$0xff]   ;;  %v4183_v22 = vld [vmem:[%s4541_s30 + $0x4c] ss:$16 sps:$4 sm:$0xff]  }
  0x5e   : > { %1323 = vmatmul.mubr.bf16.gmra.mrb[8].mxu0 %v4094_v23  ;;  %1709 = vmatmul.mubr.bf16.gmra.mrb[8].mxu1 %v4094_v23  ;;  %v4234_v23 = vld [vmem:[%s5146_s3 + $0x10] sm:$0xff]  }
  0x5f   : > { %1332 = vmatprep.mubr.bf16.mxu0 %v4098_v24  ;;  %1718 = vmatprep.mubr.bf16.mxu1 %v4098_v24  ;;  %v4236_v24 = vld [vmem:[%s5146_s3 + $0x90] sm:$0xff]  }
  0x60   : > { %1472 = vmatpush1.bf16.msra.mxu0 %v4125_v25  ;;  %1858 = vmatpush1.bf16.msra.mxu1 %v4128_v26  ;;  %v4237_v25 = vld [vmem:[%s5146_s3 + $0x58] sm:$0xff]  }
  0x61   : > { %1473 = vmatprep.subr.bf16.mxu0 %v4139_v27  ;;  %1859 = vmatprep.subr.bf16.mxu1 %v4142_v28  ;;  %v4239_v26 = vld [vmem:[%s5146_s3 + $0xd8] sm:$0xff]  }
  0x62   : > { %v4238_v27 = vld [vmem:[%s5146_s3 + $0x18] sm:$0xff]  }
  0x63   : > { %v4240_v28 = vld [vmem:[%s5146_s3 + $0x98] sm:$0xff]  }
  0x64   : > { %1474 = vmatpush1.bf16.msra.mxu0 %v4137_v29  ;;  %1860 = vmatpush1.bf16.msra.mxu1 %v4140_v31  ;;  %v4241_v29 = vld [vmem:[%s5146_s3 + $0x60] sm:$0xff]   ;;  %v4185_v31 = vld [vmem:[%s4541_s30 + $0x48] ss:$16 sps:$4 sm:$0xff]  }
  0x65   : > { %1475 = vmatprep.subr.bf16.mxu0 %v4148_v32  ;;  %1861 = vmatprep.subr.bf16.mxu1 %v4154_v33  ;;  %v4186_v32 = vld [vmem:[%s4541_s30 + $0x6c] ss:$16 sps:$4 sm:$0xff]   ;;  %v4242_v33 = vld [vmem:[%s5146_s3 + $0x20] sm:$0xff]  }
  0x66   : > { %1333 = vmatmul.mubr.bf16.gmra.mrb[12].mxu0 %v4100_v30  ;;  %1719 = vmatmul.mubr.bf16.gmra.mrb[12].mxu1 %v4100_v30  ;;  %v4243_v30 = vld [vmem:[%s5146_s3 + $0xe0] sm:$0xff]  }
  0x67   : > { %1342 = vmatprep.mubr.bf16.mxu0 %v4104_v34  ;;  %1728 = vmatprep.mubr.bf16.mxu1 %v4104_v34  ;;  %v4244_v34 = vld [vmem:[%s5146_s3 + $0xa0] sm:$0xff]  }
  0x68   : > { %1476 = vmatpush1.bf16.msra.mxu0 %v4146_v35  ;;  %1862 = vmatpush1.bf16.msra.mxu1 %v4152_v36  ;;  %v4245_v35 = vld [vmem:[%s5146_s3 + $0x68] sm:$0xff]  }
  0x69   : > { %1477 = vmatprep.subr.bf16.mxu0 %v4160_v37  ;;  %1863 = vmatprep.subr.bf16.mxu1 %v4163_v38  ;;  %v4247_v36 = vld [vmem:[%s5146_s3 + $0xe8] sm:$0xff]  }
  0x6a   : > { %v4246_v37 = vld [vmem:[%s5146_s3 + $0x28] sm:$0xff]  }
  0x6b   : > { %v4248_v38 = vld [vmem:[%s5146_s3 + $0xa8] sm:$0xff]  }
  0x6c   : > { %1478 = vmatpush1.bf16.msra.mxu0 %v4158_v41  ;;  %1864 = vmatpush1.bf16.msra.mxu1 %v4161_v42  ;;  %v4188_v41 = vld [vmem:[%s4541_s30 + $0x68] ss:$16 sps:$4 sm:$0xff]   ;;  %v4189_v42 = vld [vmem:[%s4541_s30 + $0x8c] ss:$16 sps:$4 sm:$0xff]  }
  0x6d   : > { %3227 = vmatprep.subr.msk.bf16.mxu0 %vm1257_vm0, %v3224_v44  ;;  %3244 = vmatprep.subr.msk.bf16.mxu1 %vm1257_vm0, %v3226_v47  ;;  %v4252_v44 = vld [vmem:[%s5146_s3 + $0xb0] sm:$0xff]   ;;  %v4254_v47 = vld [vmem:[%s5146_s3 + $0x38] sm:$0xff]  }
  0x6e   : > { %1343 = vmatmul.mubr.bf16.gmra.mrb[16].mxu0 %v4109_v43  ;;  %1729 = vmatmul.mubr.bf16.gmra.mrb[16].mxu1 %v4109_v43  ;;  %v4250_v43 = vld [vmem:[%s5146_s3 + $0x30] sm:$0xff]  }
  0x6f   : > { %1352 = vmatprep.mubr.bf16.mxu0 %v4110_v45  ;;  %1738 = vmatprep.mubr.bf16.mxu1 %v4110_v45  ;;  %v4253_v45 = vld [vmem:[%s5146_s3 + $0x78] sm:$0xff]  }
  0x70   : > { %1480 = vmatpush1.bf16.msra.mxu0 %v1259_v49  ;;  %1866 = vmatpush1.bf16.msra.mxu1 %v1265_v50  ;;  %v4191_v49 = vld [vmem:[%s4541_s30 + $0x88] ss:$16 sps:$4 sm:$0xff]   ;;  %v4192_v50 = vld [vmem:[%s4541_s30 + $0xac] ss:$16 sps:$4 sm:$0xff]  }
  0x71   : > { %3460 = vmatprep.subr.bf16.mxu0 %v4213_v1  ;;  %3572 = vmatprep.subr.bf16.mxu1 %v4218_v4  ;;  %v4217_v1 = vld [vmem:[%s4541_s30 + $0x188] ss:$16 sps:$4 sm:$0xff]   ;;  %v4224_v4 = vld [vmem:[%s4541_s30 + $0x1cc] ss:$16 sps:$4 sm:$0xff]  }
  0x76   : > { %1353 = vmatmul.mubr.bf16.gmra.mrb[20].mxu0 %v4112_v51  ;;  %1739 = vmatmul.mubr.bf16.gmra.mrb[20].mxu1 %v4112_v51  ;;  %v4194_v51 = vld [vmem:[%s4541_s30 + $0xa8] ss:$16 sps:$4 sm:$0xff]  }
  0x77   : > { %1362 = vmatprep.mubr.bf16.mxu0 %v4119_v52  ;;  %1748 = vmatprep.mubr.bf16.mxu1 %v4119_v52  ;;  %v4195_v52 = vld [vmem:[%s4541_s30 + $0xcc] ss:$16 sps:$4 sm:$0xff]  }
  0x7e   : > { %1363 = vmatmul.mubr.bf16.gmra.mrb[24].mxu0 %v4121_v53  ;;  %1749 = vmatmul.mubr.bf16.gmra.mrb[24].mxu1 %v4121_v53  ;;  %v4197_v53 = vld [vmem:[%s4541_s30 + $0xc8] ss:$16 sps:$4 sm:$0xff]  }
  0x7f   : > { %1372 = vmatprep.mubr.bf16.mxu0 %v4122_v54  ;;  %1758 = vmatprep.mubr.bf16.mxu1 %v4122_v54  ;;  %v4198_v54 = vld [vmem:[%s4541_s30 + $0xec] ss:$16 sps:$4 sm:$0xff]  }
  0x86   : > { %1373 = vmatmul.mubr.bf16.gmra.mrb[28].mxu0 %v4124_v55  ;;  %1759 = vmatmul.mubr.bf16.gmra.mrb[28].mxu1 %v4124_v55  ;;  %v4200_v55 = vld [vmem:[%s4541_s30 + $0xe8] ss:$16 sps:$4 sm:$0xff]  }
  0x87   : > { %1382 = vmatprep.mubr.bf16.mxu0 %v4131_v56  ;;  %1768 = vmatprep.mubr.bf16.mxu1 %v4131_v56  ;;  %v4201_v56 = vld [vmem:[%s4541_s30 + $0x10c] ss:$16 sps:$4 sm:$0xff]  }
  0x8e   : > { %1383 = vmatmul.mubr.bf16.gmra.mrb[32].mxu0 %v4133_v57  ;;  %1769 = vmatmul.mubr.bf16.gmra.mrb[32].mxu1 %v4133_v57  ;;  %v4203_v57 = vld [vmem:[%s4541_s30 + $0x108] ss:$16 sps:$4 sm:$0xff]  }
  0x8f   : > { %1392 = vmatprep.mubr.bf16.mxu0 %v4134_v58  ;;  %1778 = vmatprep.mubr.bf16.mxu1 %v4134_v58  ;;  %v4204_v58 = vld [vmem:[%s4541_s30 + $0x12c] ss:$16 sps:$4 sm:$0xff]  }
  0x96   : > { %1393 = vmatmul.mubr.bf16.gmra.mrb[36].mxu0 %v4136_v59  ;;  %1779 = vmatmul.mubr.bf16.gmra.mrb[36].mxu1 %v4136_v59  ;;  %v4206_v59 = vld [vmem:[%s4541_s30 + $0x128] ss:$16 sps:$4 sm:$0xff]  }
  0x97   : > { %1402 = vmatprep.mubr.bf16.mxu0 %v4143_v60  ;;  %1788 = vmatprep.mubr.bf16.mxu1 %v4143_v60  ;;  %v4207_v60 = vld [vmem:[%s4541_s30 + $0x14c] ss:$16 sps:$4 sm:$0xff]  }
  0x9e   : > { %1403 = vmatmul.mubr.bf16.gmra.mrb[40].mxu0 %v4145_v61  ;;  %1789 = vmatmul.mubr.bf16.gmra.mrb[40].mxu1 %v4145_v61  ;;  %v4209_v61 = vld [vmem:[%s4541_s30 + $0x148] ss:$16 sps:$4 sm:$0xff]  }
  0x9f   : > { %1412 = vmatprep.mubr.bf16.mxu0 %v4149_v62  ;;  %1798 = vmatprep.mubr.bf16.mxu1 %v4149_v62  ;;  %v4210_v62 = vld [vmem:[%s4541_s30 + $0x16c] ss:$16 sps:$4 sm:$0xff]  }
  0xa6   : > { %1413 = vmatmul.mubr.bf16.gmra.mrb[44].mxu0 %v4151_v63  ;;  %1799 = vmatmul.mubr.bf16.gmra.mrb[44].mxu1 %v4151_v63  ;;  %v4212_v63 = vld [vmem:[%s4541_s30 + $0x168] ss:$16 sps:$4 sm:$0xff]  }
  0xa7   : > { %1422 = vmatprep.mubr.bf16.mxu0 %v4155_v0  ;;  %1808 = vmatprep.mubr.bf16.mxu1 %v4155_v0  ;;  %v4214_v0 = vld [vmem:[%s4541_s30 + $0x18c] ss:$16 sps:$4 sm:$0xff]  }
  0xae   : > { %1423 = vmatmul.mubr.bf16.gmra.mrb[48].mxu0 %v4157_v2  ;;  %1809 = vmatmul.mubr.bf16.gmra.mrb[48].mxu1 %v4157_v2  ;;  %v4220_v2 = vld [vmem:[%s4541_s30 + $0x1ac] ss:$16 sps:$4 sm:$0xff]  }
  0xaf   : > { %1432 = vmatprep.mubr.bf16.mxu0 %v4164_v3  ;;  %1818 = vmatprep.mubr.bf16.mxu1 %v4164_v3  ;;  %v4222_v3 = vld [vmem:[%s4541_s30 + $0x1a8] ss:$16 sps:$4 sm:$0xff]  }
  0xb6   : > { %1433 = vmatmul.mubr.bf16.gmra.mrb[52].mxu0 %v4166_v5  ;;  %1819 = vmatmul.mubr.bf16.gmra.mrb[52].mxu1 %v4166_v5  ;;  %v4227_v5 = vld [vmem:[%s4541_s30 + $0x1c8] ss:$16 sps:$4 sm:$0xff]  }
  0xb7   : > { %1442 = vmatprep.mubr.bf16.mxu0 %v4167_v6  ;;  %1828 = vmatprep.mubr.bf16.mxu1 %v4167_v6  ;;  %v4230_v6 = vld [vmem:[%s4541_s30 + $0x1ec] ss:$16 sps:$4 sm:$0xff]  }
  0xbe   : > { %1443 = vmatmul.mubr.bf16.gmra.mrb[56].mxu0 %v4169_v7  ;;  %1829 = vmatmul.mubr.bf16.gmra.mrb[56].mxu1 %v4169_v7  ;;  %v4232_v7 = vld [vmem:[%s4541_s30 + $0x1e8] ss:$16 sps:$4 sm:$0xff]  }
  0xbf   : > { %1452 = vmatprep.mubr.bf16.mxu0 %v4174_v8  ;;  %1838 = vmatprep.mubr.bf16.mxu1 %v4174_v8  ;;  %v394_v8 = vlaneseq }
  0xc6   : > { %1453 = vmatmul.mubr.bf16.gmra.mrb[60].mxu0 %v4176_v9  ;;  %1839 = vmatmul.mubr.bf16.gmra.mrb[60].mxu1 %v4176_v9  ;;  %v395_v9 = vshrl.u32 %v394_v8, 7 }
  0xc7   : > { %3228 = vmatprep.mubr.msk.bf16.mxu0 %vm1208_vm1, %v4179_v10  ;;  %3245 = vmatprep.mubr.msk.bf16.mxu1 %vm1208_vm1, %v4179_v10 }
  0xc8   : > { %v396_v10 = vsub.s32 0, %v395_v9 }
  0xce   : > { %1496 = vmatmul.mubr.bf16.vlgmr.msra.gmra.mrb[0].mxu0 %v4177_v11  ;;  %1882 = vmatmul.mubr.bf16.vlgmr.msra.gmra.mrb[0].mxu1 %v4177_v11  ;;  %v404_v11 = vsub.s32 2, %v395_v9 }
  0xcf   : > { %3229 = vmatprep.mubr.msk.bf16.mxu0 %vm1208_vm1, %v4180_v12  ;;  %3246 = vmatprep.mubr.msk.bf16.mxu1 %vm1208_vm1, %v4180_v12  ;;  %v392_v12 = vld [vmem:[%s5145_s2] sm:$0xf] }
  0xd0   : > { %3461 = vmatpush3.bf16.msra.mxu0 %v4216_v13  ;;  %3573 = vmatpush3.bf16.msra.mxu1 %v4219_v14  ;;  %v400_v13 = vsub.s32 1, %v395_v9  ;;  %v408_v14 = vsub.s32 3, %v395_v9 }
  0xd1   : > { %3462 = vmatprep.subr.bf16.mxu0 %v4223_v15  ;;  %3574 = vmatprep.subr.bf16.mxu1 %v4228_v16  ;;  %v4897_v15 = vrot.slane %v392_v12, %v396_v10  ;;  %v4899_v16 = vrot.slane %v392_v12, %v404_v11 }
  0xd4   : > { %3463 = vmatpush3.bf16.msra.mxu0 %v4226_v17  ;;  %3575 = vmatpush3.bf16.msra.mxu1 %v4229_v18  ;;  %v4901_v17 = vrot.slane %v392_v12, %v400_v13  ;;  %v4903_v18 = vrot.slane %v392_v12, %v408_v14 }
  0xd5   : > { %3464 = vmatprep.subr.bf16.mxu0 %v4233_v19  ;;  %3576 = vmatprep.subr.bf16.mxu1 %v4235_v20 }
  0xd6   : > { %1506 = vmatmul.mubr.bf16.gmra.mrb[4].mxu0 %v4182_v21  ;;  %1892 = vmatmul.mubr.bf16.gmra.mrb[4].mxu1 %v4182_v21 }
  0xd7   : > { %3230 = vmatprep.mubr.msk.bf16.mxu0 %vm1208_vm1, %v4183_v22  ;;  %3247 = vmatprep.mubr.msk.bf16.mxu1 %vm1208_vm1, %v4183_v22 }
  0xd8   : > { %3465 = vmatpush3.bf16.msra.mxu0 %v4234_v23  ;;  %3577 = vmatpush3.bf16.msra.mxu1 %v4236_v24 }
  0xd9   : > { %3466 = vmatprep.subr.bf16.mxu0 %v4237_v25  ;;  %3578 = vmatprep.subr.bf16.mxu1 %v4239_v26 }
  0xdc   : > { %3467 = vmatpush3.bf16.msra.mxu0 %v4238_v27  ;;  %3579 = vmatpush3.bf16.msra.mxu1 %v4240_v28 }
  0xdd   : > { %3468 = vmatprep.subr.bf16.mxu0 %v4241_v29  ;;  %3580 = vmatprep.subr.bf16.mxu1 %v4243_v30 }
  0xde   : > { %1516 = vmatmul.mubr.bf16.gmra.mrb[8].mxu0 %v4185_v31  ;;  %1902 = vmatmul.mubr.bf16.gmra.mrb[8].mxu1 %v4185_v31 }
  0xdf   : > { %3231 = vmatprep.mubr.msk.bf16.mxu0 %vm1208_vm1, %v4186_v32  ;;  %3248 = vmatprep.mubr.msk.bf16.mxu1 %vm1208_vm1, %v4186_v32 }
  0xe0   : > { %3469 = vmatpush3.bf16.msra.mxu0 %v4242_v33  ;;  %3581 = vmatpush3.bf16.msra.mxu1 %v4244_v34 }
  0xe1   : > { %3470 = vmatprep.subr.bf16.mxu0 %v4245_v35  ;;  %3582 = vmatprep.subr.bf16.mxu1 %v4247_v36 }
  0xe4   : > { %3471 = vmatpush3.bf16.msra.mxu0 %v4246_v37  ;;  %3583 = vmatpush3.bf16.msra.mxu1 %v4248_v38 }
  0xe5   : > { %3472 = vmatprep.subr.bf16.mxu0 %v4249_v39  ;;  %3584 = vmatprep.subr.bf16.mxu1 %v4251_v40 }
  0xe6   : > { %1526 = vmatmul.mubr.bf16.gmra.mrb[12].mxu0 %v4188_v41  ;;  %1912 = vmatmul.mubr.bf16.gmra.mrb[12].mxu1 %v4188_v41 }
  0xe7   : > { %3232 = vmatprep.mubr.msk.bf16.mxu0 %vm1208_vm1, %v4189_v42  ;;  %3249 = vmatprep.mubr.msk.bf16.mxu1 %vm1208_vm1, %v4189_v42 }
  0xe8   : > { %3473 = vmatpush3.bf16.msra.mxu0 %v4250_v43  ;;  %3585 = vmatpush3.bf16.msra.mxu1 %v4252_v44 }
  0xe9   : > { %3474 = vmatprep.subr.bf16.mxu0 %v4253_v45  ;;  %3586 = vmatprep.subr.bf16.mxu1 %v4255_v46 }
  0xec   : > { %3475 = vmatpush3.bf16.msra.mxu0 %v4254_v47  ;;  %3587 = vmatpush3.bf16.msra.mxu1 %v4256_v48 }
  0xee   : > { %1536 = vmatmul.mubr.bf16.gmra.mrb[16].mxu0 %v4191_v49  ;;  %1922 = vmatmul.mubr.bf16.gmra.mrb[16].mxu1 %v4191_v49 }
  0xef   : > { %3233 = vmatprep.mubr.msk.bf16.mxu0 %vm1208_vm1, %v4192_v50  ;;  %3250 = vmatprep.mubr.msk.bf16.mxu1 %vm1208_vm1, %v4192_v50 }
  0xf6   : > { %1546 = vmatmul.mubr.bf16.gmra.mrb[20].mxu0 %v4194_v51  ;;  %1932 = vmatmul.mubr.bf16.gmra.mrb[20].mxu1 %v4194_v51 }
  0xf7   : > { %3234 = vmatprep.mubr.msk.bf16.mxu0 %vm1208_vm1, %v4195_v52  ;;  %3251 = vmatprep.mubr.msk.bf16.mxu1 %vm1208_vm1, %v4195_v52 }
  0xfe   : > { %1556 = vmatmul.mubr.bf16.gmra.mrb[24].mxu0 %v4197_v53  ;;  %1942 = vmatmul.mubr.bf16.gmra.mrb[24].mxu1 %v4197_v53 }
  0xff   : > { %3235 = vmatprep.mubr.msk.bf16.mxu0 %vm1208_vm1, %v4198_v54  ;;  %3252 = vmatprep.mubr.msk.bf16.mxu1 %vm1208_vm1, %v4198_v54 }
 0x106   : > { %1566 = vmatmul.mubr.bf16.gmra.mrb[28].mxu0 %v4200_v55  ;;  %1952 = vmatmul.mubr.bf16.gmra.mrb[28].mxu1 %v4200_v55 }
 0x107   : > { %3236 = vmatprep.mubr.msk.bf16.mxu0 %vm1208_vm1, %v4201_v56  ;;  %3253 = vmatprep.mubr.msk.bf16.mxu1 %vm1208_vm1, %v4201_v56 }
 0x10e   : > { %1576 = vmatmul.mubr.bf16.gmra.mrb[32].mxu0 %v4203_v57  ;;  %1962 = vmatmul.mubr.bf16.gmra.mrb[32].mxu1 %v4203_v57 }
 0x10f   : > { %3237 = vmatprep.mubr.msk.bf16.mxu0 %vm1208_vm1, %v4204_v58  ;;  %3254 = vmatprep.mubr.msk.bf16.mxu1 %vm1208_vm1, %v4204_v58 }
 0x116   : > { %1586 = vmatmul.mubr.bf16.gmra.mrb[36].mxu0 %v4206_v59  ;;  %1972 = vmatmul.mubr.bf16.gmra.mrb[36].mxu1 %v4206_v59 }
 0x117   : > { %3238 = vmatprep.mubr.msk.bf16.mxu0 %vm1208_vm1, %v4207_v60  ;;  %3255 = vmatprep.mubr.msk.bf16.mxu1 %vm1208_vm1, %v4207_v60 }
 0x11e   : > { %1596 = vmatmul.mubr.bf16.gmra.mrb[40].mxu0 %v4209_v61  ;;  %1982 = vmatmul.mubr.bf16.gmra.mrb[40].mxu1 %v4209_v61 }
 0x11f   : > { %3239 = vmatprep.mubr.msk.bf16.mxu0 %vm1208_vm1, %v4210_v62  ;;  %3256 = vmatprep.mubr.msk.bf16.mxu1 %vm1208_vm1, %v4210_v62 }
 0x126   : > { %1606 = vmatmul.mubr.bf16.gmra.mrb[44].mxu0 %v4212_v63  ;;  %1992 = vmatmul.mubr.bf16.gmra.mrb[44].mxu1 %v4212_v63 }
 0x127   : > { %3240 = vmatprep.mubr.msk.bf16.mxu0 %vm1208_vm1, %v4214_v0  ;;  %3257 = vmatprep.mubr.msk.bf16.mxu1 %vm1208_vm1, %v4214_v0 }
 0x12e   : > { %1616 = vmatmul.mubr.bf16.gmra.mrb[48].mxu0 %v4217_v1  ;;  %2002 = vmatmul.mubr.bf16.gmra.mrb[48].mxu1 %v4217_v1 }
 0x12f   : > { %3241 = vmatprep.mubr.msk.bf16.mxu0 %vm1208_vm1, %v4220_v2  ;;  %3258 = vmatprep.mubr.msk.bf16.mxu1 %vm1208_vm1, %v4220_v2 }
 0x136   : > { %1626 = vmatmul.mubr.bf16.gmra.mrb[52].mxu0 %v4222_v3  ;;  %2012 = vmatmul.mubr.bf16.gmra.mrb[52].mxu1 %v4222_v3 }
 0x137   : > { %3242 = vmatprep.mubr.msk.bf16.mxu0 %vm1208_vm1, %v4224_v4  ;;  %3259 = vmatprep.mubr.msk.bf16.mxu1 %vm1208_vm1, %v4224_v4 }
 0x13e   : > { %1636 = vmatmul.mubr.bf16.gmra.mrb[56].mxu0 %v4227_v5  ;;  %2022 = vmatmul.mubr.bf16.gmra.mrb[56].mxu1 %v4227_v5 }
 0x13f   : > { %3243 = vmatprep.mubr.msk.bf16.mxu0 %vm1208_vm1, %v4230_v6  ;;  %3260 = vmatprep.mubr.msk.bf16.mxu1 %vm1208_vm1, %v4230_v6 }
 0x146   : > { %1646 = vmatmul.mubr.bf16.gmra.mrb[60].mxu0 %v4232_v7  ;;  %2032 = vmatmul.mubr.bf16.gmra.mrb[60].mxu1 %v4232_v7 }
 0x1a1   : > { %v1497_v19 = vpop.f32.mrb[0].mxu0  ;;  %v1883_v20 = vpop.f32.mrb[0].mxu1 }
 0x1a2   : > { %v3684_v21 = vadd.f32 %v1497_v19, %v4897_v15  ;;  %v3748_v22 = vadd.f32 %v1883_v20, %v4899_v16  ;;  %v1499_v23 = vpop.f32.mrb[1].mxu0  ;;  %v1885_v24 = vpop.f32.mrb[1].mxu1 }
 0x1a3   : > { %v3685_v25 = vadd.f32 %v1499_v23, %v4901_v17  ;;  %v3749_v26 = vadd.f32 %v1885_v24, %v4903_v18  ;;  %v1501_v27 = vpop.f32.mrb[2].mxu0  ;;  %v1887_v28 = vpop.f32.mrb[2].mxu1 }
 0x1a4   : > { %v3686_v29 = vadd.f32 %v1501_v27, %v4897_v15  ;;  %v3750_v30 = vadd.f32 %v1887_v28, %v4899_v16  ;;  %v1503_v31 = vpop.f32.mrb[3].mxu0  ;;  %v1889_v32 = vpop.f32.mrb[3].mxu1  ;;  %v2042_v35 = vmax.f32 %v3684_v21, 0.0  ;;  %v2044_v36 = vmax.f32 %v3748_v22, 0.0 }
 0x1a5   : > { %v3687_v33 = vadd.f32 %v1503_v31, %v4901_v17  ;;  %v3751_v34 = vadd.f32 %v1889_v32, %v4903_v18  ;;  %v2043_v39 = vmax.f32 %v3685_v25, 0.0  ;;  %v2045_v40 = vmax.f32 %v3749_v26, 0.0 }
 0x1a6   : > { %v2046_v37 = vmax.f32 %v3686_v29, 0.0  ;;  %v2048_v38 = vmax.f32 %v3750_v30, 0.0 }
 0x1a7   : > { %v2047_v41 = vmax.f32 %v3687_v33, 0.0  ;;  %v2049_v42 = vmax.f32 %v3751_v34, 0.0 }
 0x1a8   : > { %v2170_v43 = vpack.c.bf16 %v2046_v37, %v2042_v35  ;;  %v2172_v44 = vpack.c.bf16 %v2048_v38, %v2044_v36 }
 0x1a9   : > { %v2171_v45 = vpack.c.bf16 %v2047_v41, %v2043_v39  ;;  %v2173_v46 = vpack.c.bf16 %v2049_v42, %v2045_v40  ;;  %v1507_v47 = vpop.f32.mrb[4].mxu0  ;;  %v1893_v48 = vpop.f32.mrb[4].mxu1 }
 0x1aa   : > { %v3688_v49 = vadd.f32 %v1507_v47, %v4897_v15  ;;  %v3752_v50 = vadd.f32 %v1893_v48, %v4899_v16  ;;  %v1509_v51 = vpop.f32.mrb[5].mxu0  ;;  %v1895_v52 = vpop.f32.mrb[5].mxu1 }
 0x1ab   : > { %v3689_v53 = vadd.f32 %v1509_v51, %v4901_v17  ;;  %v3753_v54 = vadd.f32 %v1895_v52, %v4903_v18  ;;  %v1511_v55 = vpop.f32.mrb[6].mxu0  ;;  %v1897_v56 = vpop.f32.mrb[6].mxu1  ;;  %2529 = vmatprep.mubr.bf16.mxu0 %v2171_v45  ;;  %2690 = vmatprep.mubr.bf16.mxu1 %v2173_v46 }
 0x1ac   : > { %v3690_v57 = vadd.f32 %v1511_v55, %v4897_v15  ;;  %v3754_v58 = vadd.f32 %v1897_v56, %v4899_v16  ;;  %v1513_v59 = vpop.f32.mrb[7].mxu0  ;;  %v1899_v60 = vpop.f32.mrb[7].mxu1  ;;  %2530 = vmatmul.mubr.bf16.vlgmr.msra.gmra.mrb[64].mxu0 %v2170_v43  ;;  %2691 = vmatmul.mubr.bf16.vlgmr.msra.gmra.mrb[64].mxu1 %v2172_v44  ;;  %v2050_v63 = vmax.f32 %v3688_v49, 0.0  ;;  %v2052_v0 = vmax.f32 %v3752_v50, 0.0 }
 0x1ad   : > { %v3691_v61 = vadd.f32 %v1513_v59, %v4901_v17  ;;  %v3755_v62 = vadd.f32 %v1899_v60, %v4903_v18  ;;  %v2051_v3 = vmax.f32 %v3689_v53, 0.0  ;;  %v2053_v4 = vmax.f32 %v3753_v54, 0.0 }
 0x1ae   : > { %v2054_v1 = vmax.f32 %v3690_v57, 0.0  ;;  %v2056_v2 = vmax.f32 %v3754_v58, 0.0 }
 0x1af   : > { %v2055_v5 = vmax.f32 %v3691_v61, 0.0  ;;  %v2057_v6 = vmax.f32 %v3755_v62, 0.0 }
 0x1b0   : > { %v2174_v7 = vpack.c.bf16 %v2054_v1, %v2050_v63  ;;  %v2176_v8 = vpack.c.bf16 %v2056_v2, %v2052_v0 }
 0x1b1   : > { %v2175_v9 = vpack.c.bf16 %v2055_v5, %v2051_v3  ;;  %v2177_v10 = vpack.c.bf16 %v2057_v6, %v2053_v4  ;;  %v1517_v11 = vpop.f32.mrb[8].mxu0  ;;  %v1903_v12 = vpop.f32.mrb[8].mxu1 }
 0x1b2   : > { %v3692_v13 = vadd.f32 %v1517_v11, %v4897_v15  ;;  %v3756_v14 = vadd.f32 %v1903_v12, %v4899_v16  ;;  %v1519_v19 = vpop.f32.mrb[9].mxu0  ;;  %v1905_v20 = vpop.f32.mrb[9].mxu1 }
 0x1b3   : > { %v3693_v21 = vadd.f32 %v1519_v19, %v4901_v17  ;;  %v3757_v22 = vadd.f32 %v1905_v20, %v4903_v18  ;;  %v1521_v23 = vpop.f32.mrb[10].mxu0  ;;  %v1907_v24 = vpop.f32.mrb[10].mxu1  ;;  %2537 = vmatprep.mubr.bf16.mxu0 %v2175_v9  ;;  %2698 = vmatprep.mubr.bf16.mxu1 %v2177_v10 }
 0x1b4   : > { %v3694_v25 = vadd.f32 %v1521_v23, %v4897_v15  ;;  %v3758_v26 = vadd.f32 %v1907_v24, %v4899_v16  ;;  %v1523_v27 = vpop.f32.mrb[11].mxu0  ;;  %v1909_v28 = vpop.f32.mrb[11].mxu1  ;;  %2538 = vmatmul.mubr.bf16.gmra.mrb[68].mxu0 %v2174_v7  ;;  %2699 = vmatmul.mubr.bf16.gmra.mrb[68].mxu1 %v2176_v8  ;;  %v2058_v31 = vmax.f32 %v3692_v13, 0.0  ;;  %v2060_v32 = vmax.f32 %v3756_v14, 0.0 }
 0x1b5   : > { %v3695_v29 = vadd.f32 %v1523_v27, %v4901_v17  ;;  %v3759_v30 = vadd.f32 %v1909_v28, %v4903_v18  ;;  %v2059_v35 = vmax.f32 %v3693_v21, 0.0  ;;  %v2061_v36 = vmax.f32 %v3757_v22, 0.0 }
 0x1b6   : > { %v2062_v33 = vmax.f32 %v3694_v25, 0.0  ;;  %v2064_v34 = vmax.f32 %v3758_v26, 0.0 }
 0x1b7   : > { %v2063_v37 = vmax.f32 %v3695_v29, 0.0  ;;  %v2065_v38 = vmax.f32 %v3759_v30, 0.0 }
 0x1b8   : > { %v2178_v39 = vpack.c.bf16 %v2062_v33, %v2058_v31  ;;  %v2180_v40 = vpack.c.bf16 %v2064_v34, %v2060_v32 }
 0x1b9   : > { %v2179_v41 = vpack.c.bf16 %v2063_v37, %v2059_v35  ;;  %v2181_v42 = vpack.c.bf16 %v2065_v38, %v2061_v36  ;;  %v1527_v43 = vpop.f32.mrb[12].mxu0  ;;  %v1913_v44 = vpop.f32.mrb[12].mxu1 }
 0x1ba   : > { %v3696_v45 = vadd.f32 %v1527_v43, %v4897_v15  ;;  %v3760_v46 = vadd.f32 %v1913_v44, %v4899_v16  ;;  %v1529_v47 = vpop.f32.mrb[13].mxu0  ;;  %v1915_v48 = vpop.f32.mrb[13].mxu1 }
 0x1bb   : > { %v3697_v49 = vadd.f32 %v1529_v47, %v4901_v17  ;;  %v3761_v50 = vadd.f32 %v1915_v48, %v4903_v18  ;;  %v1531_v51 = vpop.f32.mrb[14].mxu0  ;;  %v1917_v52 = vpop.f32.mrb[14].mxu1  ;;  %2545 = vmatprep.mubr.bf16.mxu0 %v2179_v41  ;;  %2706 = vmatprep.mubr.bf16.mxu1 %v2181_v42 }
 0x1bc   : > { %v3698_v53 = vadd.f32 %v1531_v51, %v4897_v15  ;;  %v3762_v54 = vadd.f32 %v1917_v52, %v4899_v16  ;;  %v1533_v55 = vpop.f32.mrb[15].mxu0  ;;  %v1919_v56 = vpop.f32.mrb[15].mxu1  ;;  %2546 = vmatmul.mubr.bf16.gmra.mrb[72].mxu0 %v2178_v39  ;;  %2707 = vmatmul.mubr.bf16.gmra.mrb[72].mxu1 %v2180_v40  ;;  %v2066_v59 = vmax.f32 %v3696_v45, 0.0  ;;  %v2068_v60 = vmax.f32 %v3760_v46, 0.0 }
 0x1bd   : > { %v3699_v57 = vadd.f32 %v1533_v55, %v4901_v17  ;;  %v3763_v58 = vadd.f32 %v1919_v56, %v4903_v18  ;;  %v2067_v63 = vmax.f32 %v3697_v49, 0.0  ;;  %v2069_v0 = vmax.f32 %v3761_v50, 0.0 }
 0x1be   : > { %v2070_v61 = vmax.f32 %v3698_v53, 0.0  ;;  %v2072_v62 = vmax.f32 %v3762_v54, 0.0 }
 0x1bf   : > { %v2071_v1 = vmax.f32 %v3699_v57, 0.0  ;;  %v2073_v2 = vmax.f32 %v3763_v58, 0.0 }
 0x1c0   : > { %v2182_v3 = vpack.c.bf16 %v2070_v61, %v2066_v59  ;;  %v2184_v4 = vpack.c.bf16 %v2072_v62, %v2068_v60 }
 0x1c1   : > { %v2183_v5 = vpack.c.bf16 %v2071_v1, %v2067_v63  ;;  %v2185_v6 = vpack.c.bf16 %v2073_v2, %v2069_v0  ;;  %v1537_v7 = vpop.f32.mrb[16].mxu0  ;;  %v1923_v8 = vpop.f32.mrb[16].mxu1 }
 0x1c2   : > { %v3700_v9 = vadd.f32 %v1537_v7, %v4897_v15  ;;  %v3764_v10 = vadd.f32 %v1923_v8, %v4899_v16  ;;  %v1539_v11 = vpop.f32.mrb[17].mxu0  ;;  %v1925_v12 = vpop.f32.mrb[17].mxu1 }
 0x1c3   : > { %v3701_v13 = vadd.f32 %v1539_v11, %v4901_v17  ;;  %v3765_v14 = vadd.f32 %v1925_v12, %v4903_v18  ;;  %v1541_v19 = vpop.f32.mrb[18].mxu0  ;;  %v1927_v20 = vpop.f32.mrb[18].mxu1  ;;  %2553 = vmatprep.mubr.bf16.mxu0 %v2183_v5  ;;  %2714 = vmatprep.mubr.bf16.mxu1 %v2185_v6 }
 0x1c4   : > { %v3702_v21 = vadd.f32 %v1541_v19, %v4897_v15  ;;  %v3766_v22 = vadd.f32 %v1927_v20, %v4899_v16  ;;  %v1543_v23 = vpop.f32.mrb[19].mxu0  ;;  %v1929_v24 = vpop.f32.mrb[19].mxu1  ;;  %2554 = vmatmul.mubr.bf16.gmra.mrb[76].mxu0 %v2182_v3  ;;  %2715 = vmatmul.mubr.bf16.gmra.mrb[76].mxu1 %v2184_v4  ;;  %v2074_v27 = vmax.f32 %v3700_v9, 0.0  ;;  %v2076_v28 = vmax.f32 %v3764_v10, 0.0 }
 0x1c5   : > { %v3703_v25 = vadd.f32 %v1543_v23, %v4901_v17  ;;  %v3767_v26 = vadd.f32 %v1929_v24, %v4903_v18  ;;  %v2075_v31 = vmax.f32 %v3701_v13, 0.0  ;;  %v2077_v32 = vmax.f32 %v3765_v14, 0.0 }
 0x1c6   : > { %v2078_v29 = vmax.f32 %v3702_v21, 0.0  ;;  %v2080_v30 = vmax.f32 %v3766_v22, 0.0 }
 0x1c7   : > { %v2079_v33 = vmax.f32 %v3703_v25, 0.0  ;;  %v2081_v34 = vmax.f32 %v3767_v26, 0.0 }
 0x1c8   : > { %v2186_v35 = vpack.c.bf16 %v2078_v29, %v2074_v27  ;;  %v2188_v36 = vpack.c.bf16 %v2080_v30, %v2076_v28 }
 0x1c9   : > { %v2187_v37 = vpack.c.bf16 %v2079_v33, %v2075_v31  ;;  %v2189_v38 = vpack.c.bf16 %v2081_v34, %v2077_v32  ;;  %v1547_v39 = vpop.f32.mrb[20].mxu0  ;;  %v1933_v40 = vpop.f32.mrb[20].mxu1 }
 0x1ca   : > { %v3704_v41 = vadd.f32 %v1547_v39, %v4897_v15  ;;  %v3768_v42 = vadd.f32 %v1933_v40, %v4899_v16  ;;  %v1549_v43 = vpop.f32.mrb[21].mxu0  ;;  %v1935_v44 = vpop.f32.mrb[21].mxu1 }
 0x1cb   : > { %v3705_v45 = vadd.f32 %v1549_v43, %v4901_v17  ;;  %v3769_v46 = vadd.f32 %v1935_v44, %v4903_v18  ;;  %v1551_v47 = vpop.f32.mrb[22].mxu0  ;;  %v1937_v48 = vpop.f32.mrb[22].mxu1  ;;  %2561 = vmatprep.mubr.bf16.mxu0 %v2187_v37  ;;  %2722 = vmatprep.mubr.bf16.mxu1 %v2189_v38 }
 0x1cc   : > { %v3706_v49 = vadd.f32 %v1551_v47, %v4897_v15  ;;  %v3770_v50 = vadd.f32 %v1937_v48, %v4899_v16  ;;  %v1553_v51 = vpop.f32.mrb[23].mxu0  ;;  %v1939_v52 = vpop.f32.mrb[23].mxu1  ;;  %2562 = vmatmul.mubr.bf16.gmra.mrb[80].mxu0 %v2186_v35  ;;  %2723 = vmatmul.mubr.bf16.gmra.mrb[80].mxu1 %v2188_v36  ;;  %v2082_v55 = vmax.f32 %v3704_v41, 0.0  ;;  %v2084_v56 = vmax.f32 %v3768_v42, 0.0 }
 0x1cd   : > { %v3707_v53 = vadd.f32 %v1553_v51, %v4901_v17  ;;  %v3771_v54 = vadd.f32 %v1939_v52, %v4903_v18  ;;  %v2083_v59 = vmax.f32 %v3705_v45, 0.0  ;;  %v2085_v60 = vmax.f32 %v3769_v46, 0.0 }
 0x1ce   : > { %v2086_v57 = vmax.f32 %v3706_v49, 0.0  ;;  %v2088_v58 = vmax.f32 %v3770_v50, 0.0 }
 0x1cf   : > { %v2087_v61 = vmax.f32 %v3707_v53, 0.0  ;;  %v2089_v62 = vmax.f32 %v3771_v54, 0.0 }
 0x1d0   : > { %v2190_v63 = vpack.c.bf16 %v2086_v57, %v2082_v55  ;;  %v2192_v0 = vpack.c.bf16 %v2088_v58, %v2084_v56 }
 0x1d1   : > { %v2191_v1 = vpack.c.bf16 %v2087_v61, %v2083_v59  ;;  %v2193_v2 = vpack.c.bf16 %v2089_v62, %v2085_v60  ;;  %v1557_v3 = vpop.f32.mrb[24].mxu0  ;;  %v1943_v4 = vpop.f32.mrb[24].mxu1 }
 0x1d2   : > { %v3708_v5 = vadd.f32 %v1557_v3, %v4897_v15  ;;  %v3772_v6 = vadd.f32 %v1943_v4, %v4899_v16  ;;  %v1559_v7 = vpop.f32.mrb[25].mxu0  ;;  %v1945_v8 = vpop.f32.mrb[25].mxu1 }
 0x1d3   : > { %v3709_v9 = vadd.f32 %v1559_v7, %v4901_v17  ;;  %v3773_v10 = vadd.f32 %v1945_v8, %v4903_v18  ;;  %v1561_v11 = vpop.f32.mrb[26].mxu0  ;;  %v1947_v12 = vpop.f32.mrb[26].mxu1  ;;  %2569 = vmatprep.mubr.bf16.mxu0 %v2191_v1  ;;  %2730 = vmatprep.mubr.bf16.mxu1 %v2193_v2 }
 0x1d4   : > { %v3710_v13 = vadd.f32 %v1561_v11, %v4897_v15  ;;  %v3774_v14 = vadd.f32 %v1947_v12, %v4899_v16  ;;  %v1563_v19 = vpop.f32.mrb[27].mxu0  ;;  %v1949_v20 = vpop.f32.mrb[27].mxu1  ;;  %2570 = vmatmul.mubr.bf16.gmra.mrb[84].mxu0 %v2190_v63  ;;  %2731 = vmatmul.mubr.bf16.gmra.mrb[84].mxu1 %v2192_v0  ;;  %v2090_v23 = vmax.f32 %v3708_v5, 0.0  ;;  %v2092_v24 = vmax.f32 %v3772_v6, 0.0 }
 0x1d5   : > { %v3711_v21 = vadd.f32 %v1563_v19, %v4901_v17  ;;  %v3775_v22 = vadd.f32 %v1949_v20, %v4903_v18  ;;  %v2091_v27 = vmax.f32 %v3709_v9, 0.0  ;;  %v2093_v28 = vmax.f32 %v3773_v10, 0.0 }
 0x1d6   : > { %v2094_v25 = vmax.f32 %v3710_v13, 0.0  ;;  %v2096_v26 = vmax.f32 %v3774_v14, 0.0 }
 0x1d7   : > { %v2095_v29 = vmax.f32 %v3711_v21, 0.0  ;;  %v2097_v30 = vmax.f32 %v3775_v22, 0.0 }
 0x1d8   : > { %v2194_v31 = vpack.c.bf16 %v2094_v25, %v2090_v23  ;;  %v2196_v32 = vpack.c.bf16 %v2096_v26, %v2092_v24 }
 0x1d9   : > { %v2195_v33 = vpack.c.bf16 %v2095_v29, %v2091_v27  ;;  %v2197_v34 = vpack.c.bf16 %v2097_v30, %v2093_v28  ;;  %v1567_v35 = vpop.f32.mrb[28].mxu0  ;;  %v1953_v36 = vpop.f32.mrb[28].mxu1 }
 0x1da   : > { %v3712_v37 = vadd.f32 %v1567_v35, %v4897_v15  ;;  %v3776_v38 = vadd.f32 %v1953_v36, %v4899_v16  ;;  %v1569_v39 = vpop.f32.mrb[29].mxu0  ;;  %v1955_v40 = vpop.f32.mrb[29].mxu1 }
 0x1db   : > { %v3713_v41 = vadd.f32 %v1569_v39, %v4901_v17  ;;  %v3777_v42 = vadd.f32 %v1955_v40, %v4903_v18  ;;  %v1571_v43 = vpop.f32.mrb[30].mxu0  ;;  %v1957_v44 = vpop.f32.mrb[30].mxu1  ;;  %2577 = vmatprep.mubr.bf16.mxu0 %v2195_v33  ;;  %2738 = vmatprep.mubr.bf16.mxu1 %v2197_v34 }
 0x1dc   : > { %v3714_v45 = vadd.f32 %v1571_v43, %v4897_v15  ;;  %v3778_v46 = vadd.f32 %v1957_v44, %v4899_v16  ;;  %v1573_v47 = vpop.f32.mrb[31].mxu0  ;;  %v1959_v48 = vpop.f32.mrb[31].mxu1  ;;  %2578 = vmatmul.mubr.bf16.gmra.mrb[88].mxu0 %v2194_v31  ;;  %2739 = vmatmul.mubr.bf16.gmra.mrb[88].mxu1 %v2196_v32  ;;  %v2098_v51 = vmax.f32 %v3712_v37, 0.0  ;;  %v2100_v52 = vmax.f32 %v3776_v38, 0.0 }
 0x1dd   : > { %v3715_v49 = vadd.f32 %v1573_v47, %v4901_v17  ;;  %v3779_v50 = vadd.f32 %v1959_v48, %v4903_v18  ;;  %v2099_v55 = vmax.f32 %v3713_v41, 0.0  ;;  %v2101_v56 = vmax.f32 %v3777_v42, 0.0 }
 0x1de   : > { %v2102_v53 = vmax.f32 %v3714_v45, 0.0  ;;  %v2104_v54 = vmax.f32 %v3778_v46, 0.0 }
 0x1df   : > { %v2103_v57 = vmax.f32 %v3715_v49, 0.0  ;;  %v2105_v58 = vmax.f32 %v3779_v50, 0.0 }
 0x1e0   : > { %v2198_v59 = vpack.c.bf16 %v2102_v53, %v2098_v51  ;;  %v2200_v60 = vpack.c.bf16 %v2104_v54, %v2100_v52 }
 0x1e1   : > { %v2199_v61 = vpack.c.bf16 %v2103_v57, %v2099_v55  ;;  %v2201_v62 = vpack.c.bf16 %v2105_v58, %v2101_v56  ;;  %v1577_v63 = vpop.f32.mrb[32].mxu0  ;;  %v1963_v0 = vpop.f32.mrb[32].mxu1 }
 0x1e2   : > { %v3716_v1 = vadd.f32 %v1577_v63, %v4897_v15  ;;  %v3780_v2 = vadd.f32 %v1963_v0, %v4899_v16  ;;  %v1579_v3 = vpop.f32.mrb[33].mxu0  ;;  %v1965_v4 = vpop.f32.mrb[33].mxu1 }
 0x1e3   : > { %v3717_v5 = vadd.f32 %v1579_v3, %v4901_v17  ;;  %v3781_v6 = vadd.f32 %v1965_v4, %v4903_v18  ;;  %v1581_v7 = vpop.f32.mrb[34].mxu0  ;;  %v1967_v8 = vpop.f32.mrb[34].mxu1  ;;  %2585 = vmatprep.mubr.bf16.mxu0 %v2199_v61  ;;  %2746 = vmatprep.mubr.bf16.mxu1 %v2201_v62 }
 0x1e4   : > { %v3718_v9 = vadd.f32 %v1581_v7, %v4897_v15  ;;  %v3782_v10 = vadd.f32 %v1967_v8, %v4899_v16  ;;  %v1583_v11 = vpop.f32.mrb[35].mxu0  ;;  %v1969_v12 = vpop.f32.mrb[35].mxu1  ;;  %2586 = vmatmul.mubr.bf16.gmra.mrb[92].mxu0 %v2198_v59  ;;  %2747 = vmatmul.mubr.bf16.gmra.mrb[92].mxu1 %v2200_v60  ;;  %v2106_v19 = vmax.f32 %v3716_v1, 0.0  ;;  %v2108_v20 = vmax.f32 %v3780_v2, 0.0 }
 0x1e5   : > { %v3719_v13 = vadd.f32 %v1583_v11, %v4901_v17  ;;  %v3783_v14 = vadd.f32 %v1969_v12, %v4903_v18  ;;  %v2107_v23 = vmax.f32 %v3717_v5, 0.0  ;;  %v2109_v24 = vmax.f32 %v3781_v6, 0.0 }
 0x1e6   : > { %v2110_v21 = vmax.f32 %v3718_v9, 0.0  ;;  %v2112_v22 = vmax.f32 %v3782_v10, 0.0 }
 0x1e7   : > { %v2111_v25 = vmax.f32 %v3719_v13, 0.0  ;;  %v2113_v26 = vmax.f32 %v3783_v14, 0.0 }
 0x1e8   : > { %v2202_v27 = vpack.c.bf16 %v2110_v21, %v2106_v19  ;;  %v2204_v28 = vpack.c.bf16 %v2112_v22, %v2108_v20 }
 0x1e9   : > { %v2203_v29 = vpack.c.bf16 %v2111_v25, %v2107_v23  ;;  %v2205_v30 = vpack.c.bf16 %v2113_v26, %v2109_v24  ;;  %v1587_v31 = vpop.f32.mrb[36].mxu0  ;;  %v1973_v32 = vpop.f32.mrb[36].mxu1 }
 0x1ea   : > { %v3720_v33 = vadd.f32 %v1587_v31, %v4897_v15  ;;  %v3784_v34 = vadd.f32 %v1973_v32, %v4899_v16  ;;  %v1589_v35 = vpop.f32.mrb[37].mxu0  ;;  %v1975_v36 = vpop.f32.mrb[37].mxu1 }
 0x1eb   : > { %v3721_v37 = vadd.f32 %v1589_v35, %v4901_v17  ;;  %v3785_v38 = vadd.f32 %v1975_v36, %v4903_v18  ;;  %v1591_v39 = vpop.f32.mrb[38].mxu0  ;;  %v1977_v40 = vpop.f32.mrb[38].mxu1  ;;  %2593 = vmatprep.mubr.bf16.mxu0 %v2203_v29  ;;  %2754 = vmatprep.mubr.bf16.mxu1 %v2205_v30 }
 0x1ec   : > { %v3722_v41 = vadd.f32 %v1591_v39, %v4897_v15  ;;  %v3786_v42 = vadd.f32 %v1977_v40, %v4899_v16  ;;  %v1593_v43 = vpop.f32.mrb[39].mxu0  ;;  %v1979_v44 = vpop.f32.mrb[39].mxu1  ;;  %2594 = vmatmul.mubr.bf16.gmra.mrb[96].mxu0 %v2202_v27  ;;  %2755 = vmatmul.mubr.bf16.gmra.mrb[96].mxu1 %v2204_v28  ;;  %v2114_v47 = vmax.f32 %v3720_v33, 0.0  ;;  %v2116_v48 = vmax.f32 %v3784_v34, 0.0 }
 0x1ed   : > { %v3723_v45 = vadd.f32 %v1593_v43, %v4901_v17  ;;  %v3787_v46 = vadd.f32 %v1979_v44, %v4903_v18  ;;  %v2115_v51 = vmax.f32 %v3721_v37, 0.0  ;;  %v2117_v52 = vmax.f32 %v3785_v38, 0.0 }
 0x1ee   : > { %v2118_v49 = vmax.f32 %v3722_v41, 0.0  ;;  %v2120_v50 = vmax.f32 %v3786_v42, 0.0 }
 0x1ef   : > { %v2119_v53 = vmax.f32 %v3723_v45, 0.0  ;;  %v2121_v54 = vmax.f32 %v3787_v46, 0.0 }
 0x1f0   : > { %v2206_v55 = vpack.c.bf16 %v2118_v49, %v2114_v47  ;;  %v2208_v56 = vpack.c.bf16 %v2120_v50, %v2116_v48 }
 0x1f1   : > { %v2207_v57 = vpack.c.bf16 %v2119_v53, %v2115_v51  ;;  %v2209_v58 = vpack.c.bf16 %v2121_v54, %v2117_v52  ;;  %v1597_v59 = vpop.f32.mrb[40].mxu0  ;;  %v1983_v60 = vpop.f32.mrb[40].mxu1 }
 0x1f2   : > { %v3724_v61 = vadd.f32 %v1597_v59, %v4897_v15  ;;  %v3788_v62 = vadd.f32 %v1983_v60, %v4899_v16  ;;  %v1599_v63 = vpop.f32.mrb[41].mxu0  ;;  %v1985_v0 = vpop.f32.mrb[41].mxu1 }
 0x1f3   : > { %v3725_v1 = vadd.f32 %v1599_v63, %v4901_v17  ;;  %v3789_v2 = vadd.f32 %v1985_v0, %v4903_v18  ;;  %v1601_v3 = vpop.f32.mrb[42].mxu0  ;;  %v1987_v4 = vpop.f32.mrb[42].mxu1  ;;  %2601 = vmatprep.mubr.bf16.mxu0 %v2207_v57  ;;  %2762 = vmatprep.mubr.bf16.mxu1 %v2209_v58 }
 0x1f4   : > { %v3726_v5 = vadd.f32 %v1601_v3, %v4897_v15  ;;  %v3790_v6 = vadd.f32 %v1987_v4, %v4899_v16  ;;  %v1603_v7 = vpop.f32.mrb[43].mxu0  ;;  %v1989_v8 = vpop.f32.mrb[43].mxu1  ;;  %2602 = vmatmul.mubr.bf16.gmra.mrb[100].mxu0 %v2206_v55  ;;  %2763 = vmatmul.mubr.bf16.gmra.mrb[100].mxu1 %v2208_v56  ;;  %v2122_v11 = vmax.f32 %v3724_v61, 0.0  ;;  %v2124_v12 = vmax.f32 %v3788_v62, 0.0 }
 0x1f5   : > { %v3727_v9 = vadd.f32 %v1603_v7, %v4901_v17  ;;  %v3791_v10 = vadd.f32 %v1989_v8, %v4903_v18  ;;  %v2123_v19 = vmax.f32 %v3725_v1, 0.0  ;;  %v2125_v20 = vmax.f32 %v3789_v2, 0.0 }
 0x1f6   : > { %v2126_v13 = vmax.f32 %v3726_v5, 0.0  ;;  %v2128_v14 = vmax.f32 %v3790_v6, 0.0 }
 0x1f7   : > { %v2127_v21 = vmax.f32 %v3727_v9, 0.0  ;;  %v2129_v22 = vmax.f32 %v3791_v10, 0.0 }
 0x1f8   : > { %v2210_v23 = vpack.c.bf16 %v2126_v13, %v2122_v11  ;;  %v2212_v24 = vpack.c.bf16 %v2128_v14, %v2124_v12 }
 0x1f9   : > { %v2211_v25 = vpack.c.bf16 %v2127_v21, %v2123_v19  ;;  %v2213_v26 = vpack.c.bf16 %v2129_v22, %v2125_v20  ;;  %v1607_v27 = vpop.f32.mrb[44].mxu0  ;;  %v1993_v28 = vpop.f32.mrb[44].mxu1 }
 0x1fa   : > { %v3728_v29 = vadd.f32 %v1607_v27, %v4897_v15  ;;  %v3792_v30 = vadd.f32 %v1993_v28, %v4899_v16  ;;  %v1609_v31 = vpop.f32.mrb[45].mxu0  ;;  %v1995_v32 = vpop.f32.mrb[45].mxu1 }
 0x1fb   : > { %v3729_v33 = vadd.f32 %v1609_v31, %v4901_v17  ;;  %v3793_v34 = vadd.f32 %v1995_v32, %v4903_v18  ;;  %v1611_v35 = vpop.f32.mrb[46].mxu0  ;;  %v1997_v36 = vpop.f32.mrb[46].mxu1  ;;  %2609 = vmatprep.mubr.bf16.mxu0 %v2211_v25  ;;  %2770 = vmatprep.mubr.bf16.mxu1 %v2213_v26 }
 0x1fc   : > { %v3730_v37 = vadd.f32 %v1611_v35, %v4897_v15  ;;  %v3794_v38 = vadd.f32 %v1997_v36, %v4899_v16  ;;  %v1613_v39 = vpop.f32.mrb[47].mxu0  ;;  %v1999_v40 = vpop.f32.mrb[47].mxu1  ;;  %2610 = vmatmul.mubr.bf16.gmra.mrb[104].mxu0 %v2210_v23  ;;  %2771 = vmatmul.mubr.bf16.gmra.mrb[104].mxu1 %v2212_v24  ;;  %v2130_v43 = vmax.f32 %v3728_v29, 0.0  ;;  %v2132_v44 = vmax.f32 %v3792_v30, 0.0 }
 0x1fd   : > { %v3731_v41 = vadd.f32 %v1613_v39, %v4901_v17  ;;  %v3795_v42 = vadd.f32 %v1999_v40, %v4903_v18  ;;  %v2131_v47 = vmax.f32 %v3729_v33, 0.0  ;;  %v2133_v48 = vmax.f32 %v3793_v34, 0.0 }
 0x1fe   : > { %v2134_v45 = vmax.f32 %v3730_v37, 0.0  ;;  %v2136_v46 = vmax.f32 %v3794_v38, 0.0 }
 0x1ff   : > { %v2135_v49 = vmax.f32 %v3731_v41, 0.0  ;;  %v2137_v50 = vmax.f32 %v3795_v42, 0.0 }
 0x200   : > { %v2214_v51 = vpack.c.bf16 %v2134_v45, %v2130_v43  ;;  %v2216_v52 = vpack.c.bf16 %v2136_v46, %v2132_v44 }
 0x201   : > { %v2215_v53 = vpack.c.bf16 %v2135_v49, %v2131_v47  ;;  %v2217_v54 = vpack.c.bf16 %v2137_v50, %v2133_v48  ;;  %v1617_v55 = vpop.f32.mrb[48].mxu0  ;;  %v2003_v56 = vpop.f32.mrb[48].mxu1 }
 0x202   : > { %v3732_v57 = vadd.f32 %v1617_v55, %v4897_v15  ;;  %v3796_v58 = vadd.f32 %v2003_v56, %v4899_v16  ;;  %v1619_v59 = vpop.f32.mrb[49].mxu0  ;;  %v2005_v60 = vpop.f32.mrb[49].mxu1 }
 0x203   : > { %v3733_v61 = vadd.f32 %v1619_v59, %v4901_v17  ;;  %v3797_v62 = vadd.f32 %v2005_v60, %v4903_v18  ;;  %v1621_v63 = vpop.f32.mrb[50].mxu0  ;;  %v2007_v0 = vpop.f32.mrb[50].mxu1  ;;  %2617 = vmatprep.mubr.bf16.mxu0 %v2215_v53  ;;  %2778 = vmatprep.mubr.bf16.mxu1 %v2217_v54 }
 0x204   : > { %v3734_v1 = vadd.f32 %v1621_v63, %v4897_v15  ;;  %v3798_v2 = vadd.f32 %v2007_v0, %v4899_v16  ;;  %v1623_v3 = vpop.f32.mrb[51].mxu0  ;;  %v2009_v4 = vpop.f32.mrb[51].mxu1  ;;  %2618 = vmatmul.mubr.bf16.gmra.mrb[108].mxu0 %v2214_v51  ;;  %2779 = vmatmul.mubr.bf16.gmra.mrb[108].mxu1 %v2216_v52  ;;  %v2138_v7 = vmax.f32 %v3732_v57, 0.0  ;;  %v2140_v8 = vmax.f32 %v3796_v58, 0.0 }
 0x205   : > { %v3735_v5 = vadd.f32 %v1623_v3, %v4901_v17  ;;  %v3799_v6 = vadd.f32 %v2009_v4, %v4903_v18  ;;  %v2139_v11 = vmax.f32 %v3733_v61, 0.0  ;;  %v2141_v12 = vmax.f32 %v3797_v62, 0.0 }
 0x206   : > { %v2142_v9 = vmax.f32 %v3734_v1, 0.0  ;;  %v2144_v10 = vmax.f32 %v3798_v2, 0.0 }
 0x207   : > { %v2143_v13 = vmax.f32 %v3735_v5, 0.0  ;;  %v2145_v14 = vmax.f32 %v3799_v6, 0.0 }
 0x208   : > { %v2218_v19 = vpack.c.bf16 %v2142_v9, %v2138_v7  ;;  %v2220_v20 = vpack.c.bf16 %v2144_v10, %v2140_v8 }
 0x209   : > { %v2219_v21 = vpack.c.bf16 %v2143_v13, %v2139_v11  ;;  %v2221_v22 = vpack.c.bf16 %v2145_v14, %v2141_v12  ;;  %v1627_v23 = vpop.f32.mrb[52].mxu0  ;;  %v2013_v24 = vpop.f32.mrb[52].mxu1 }
 0x20a   : > { %v3736_v25 = vadd.f32 %v1627_v23, %v4897_v15  ;;  %v3800_v26 = vadd.f32 %v2013_v24, %v4899_v16  ;;  %v1629_v27 = vpop.f32.mrb[53].mxu0  ;;  %v2015_v28 = vpop.f32.mrb[53].mxu1 }
 0x20b   : > { %v3737_v29 = vadd.f32 %v1629_v27, %v4901_v17  ;;  %v3801_v30 = vadd.f32 %v2015_v28, %v4903_v18  ;;  %v1631_v31 = vpop.f32.mrb[54].mxu0  ;;  %v2017_v32 = vpop.f32.mrb[54].mxu1  ;;  %2625 = vmatprep.mubr.bf16.mxu0 %v2219_v21  ;;  %2786 = vmatprep.mubr.bf16.mxu1 %v2221_v22 }
 0x20c   : > { %v3738_v33 = vadd.f32 %v1631_v31, %v4897_v15  ;;  %v3802_v34 = vadd.f32 %v2017_v32, %v4899_v16  ;;  %v1633_v35 = vpop.f32.mrb[55].mxu0  ;;  %v2019_v36 = vpop.f32.mrb[55].mxu1  ;;  %2626 = vmatmul.mubr.bf16.gmra.mrb[112].mxu0 %v2218_v19  ;;  %2787 = vmatmul.mubr.bf16.gmra.mrb[112].mxu1 %v2220_v20  ;;  %v2146_v39 = vmax.f32 %v3736_v25, 0.0  ;;  %v2148_v40 = vmax.f32 %v3800_v26, 0.0 }
 0x20d   : > { %v3739_v37 = vadd.f32 %v1633_v35, %v4901_v17  ;;  %v3803_v38 = vadd.f32 %v2019_v36, %v4903_v18  ;;  %v2147_v43 = vmax.f32 %v3737_v29, 0.0  ;;  %v2149_v44 = vmax.f32 %v3801_v30, 0.0 }
 0x20e   : > { %v2150_v41 = vmax.f32 %v3738_v33, 0.0  ;;  %v2152_v42 = vmax.f32 %v3802_v34, 0.0 }
 0x20f   : > { %v2151_v45 = vmax.f32 %v3739_v37, 0.0  ;;  %v2153_v46 = vmax.f32 %v3803_v38, 0.0 }
 0x210   : > { %v2222_v47 = vpack.c.bf16 %v2150_v41, %v2146_v39  ;;  %v2224_v48 = vpack.c.bf16 %v2152_v42, %v2148_v40 }
 0x211   : > { %v2223_v49 = vpack.c.bf16 %v2151_v45, %v2147_v43  ;;  %v2225_v50 = vpack.c.bf16 %v2153_v46, %v2149_v44  ;;  %v1637_v51 = vpop.f32.mrb[56].mxu0  ;;  %v2023_v52 = vpop.f32.mrb[56].mxu1 }
 0x212   : > { %v3740_v53 = vadd.f32 %v1637_v51, %v4897_v15  ;;  %v3804_v54 = vadd.f32 %v2023_v52, %v4899_v16  ;;  %v1639_v55 = vpop.f32.mrb[57].mxu0  ;;  %v2025_v56 = vpop.f32.mrb[57].mxu1 }
 0x213   : > { %v3741_v57 = vadd.f32 %v1639_v55, %v4901_v17  ;;  %v3805_v58 = vadd.f32 %v2025_v56, %v4903_v18  ;;  %v1641_v59 = vpop.f32.mrb[58].mxu0  ;;  %v2027_v60 = vpop.f32.mrb[58].mxu1  ;;  %2633 = vmatprep.mubr.bf16.mxu0 %v2223_v49  ;;  %2794 = vmatprep.mubr.bf16.mxu1 %v2225_v50 }
 0x214   : > { %v3742_v61 = vadd.f32 %v1641_v59, %v4897_v15  ;;  %v3806_v62 = vadd.f32 %v2027_v60, %v4899_v16  ;;  %v1643_v63 = vpop.f32.mrb[59].mxu0  ;;  %v2029_v0 = vpop.f32.mrb[59].mxu1  ;;  %2634 = vmatmul.mubr.bf16.gmra.mrb[116].mxu0 %v2222_v47  ;;  %2795 = vmatmul.mubr.bf16.gmra.mrb[116].mxu1 %v2224_v48  ;;  %v2154_v3 = vmax.f32 %v3740_v53, 0.0  ;;  %v2156_v4 = vmax.f32 %v3804_v54, 0.0 }
 0x215   : > { %v3743_v1 = vadd.f32 %v1643_v63, %v4901_v17  ;;  %v3807_v2 = vadd.f32 %v2029_v0, %v4903_v18  ;;  %v2155_v7 = vmax.f32 %v3741_v57, 0.0  ;;  %v2157_v8 = vmax.f32 %v3805_v58, 0.0 }
 0x216   : > { %v2158_v5 = vmax.f32 %v3742_v61, 0.0  ;;  %v2160_v6 = vmax.f32 %v3806_v62, 0.0 }
 0x217   : > { %v2159_v9 = vmax.f32 %v3743_v1, 0.0  ;;  %v2161_v10 = vmax.f32 %v3807_v2, 0.0 }
 0x218   : > { %v2226_v11 = vpack.c.bf16 %v2158_v5, %v2154_v3  ;;  %v2228_v12 = vpack.c.bf16 %v2160_v6, %v2156_v4 }
 0x219   : > { %v2227_v13 = vpack.c.bf16 %v2159_v9, %v2155_v7  ;;  %v2229_v14 = vpack.c.bf16 %v2161_v10, %v2157_v8  ;;  %v1647_v19 = vpop.f32.mrb[60].mxu0  ;;  %v2033_v20 = vpop.f32.mrb[60].mxu1 }
 0x21a   : > { %v3744_v21 = vadd.f32 %v1647_v19, %v4897_v15  ;;  %v3808_v22 = vadd.f32 %v2033_v20, %v4899_v16  ;;  %v1649_v23 = vpop.f32.mrb[61].mxu0  ;;  %v2035_v24 = vpop.f32.mrb[61].mxu1 }
 0x21b   : > { %v3745_v25 = vadd.f32 %v1649_v23, %v4901_v17  ;;  %v3809_v26 = vadd.f32 %v2035_v24, %v4903_v18  ;;  %v1651_v27 = vpop.f32.mrb[62].mxu0  ;;  %v2037_v28 = vpop.f32.mrb[62].mxu1  ;;  %2641 = vmatprep.mubr.bf16.mxu0 %v2227_v13  ;;  %2802 = vmatprep.mubr.bf16.mxu1 %v2229_v14 }
 0x21c   : > { %v3746_v29 = vadd.f32 %v1651_v27, %v4897_v15  ;;  %v3810_v30 = vadd.f32 %v2037_v28, %v4899_v16  ;;  %v1653_v31 = vpop.f32.mrb[63].mxu0  ;;  %v2039_v32 = vpop.f32.mrb[63].mxu1  ;;  %2642 = vmatmul.mubr.bf16.gmra.mrb[120].mxu0 %v2226_v11  ;;  %2803 = vmatmul.mubr.bf16.gmra.mrb[120].mxu1 %v2228_v12  ;;  %v2162_v35 = vmax.f32 %v3744_v21, 0.0  ;;  %v2164_v36 = vmax.f32 %v3808_v22, 0.0 }
 0x21d   : > { %v3747_v33 = vadd.f32 %v1653_v31, %v4901_v17  ;;  %v3811_v34 = vadd.f32 %v2039_v32, %v4903_v18  ;;  %v2163_v39 = vmax.f32 %v3745_v25, 0.0  ;;  %v2165_v40 = vmax.f32 %v3809_v26, 0.0  ;;  %v5036_v18 = vld [vmem:[%s5147_s4] ss:$0 sm:$0xff] }
 0x21e   : > { %v2166_v37 = vmax.f32 %v3746_v29, 0.0  ;;  %v2168_v38 = vmax.f32 %v3810_v30, 0.0 }
 0x21f   : > { %v2167_v41 = vmax.f32 %v3747_v33, 0.0  ;;  %v2169_v42 = vmax.f32 %v3811_v34, 0.0 }
 0x220   : > { %v2230_v43 = vpack.c.bf16 %v2166_v37, %v2162_v35  ;;  %v2232_v15 = vpack.c.bf16 %v2168_v38, %v2164_v36 }
 0x221   : > { %v2231_v44 = vpack.c.bf16 %v2167_v41, %v2163_v39  ;;  %v2233_v16 = vpack.c.bf16 %v2169_v42, %v2165_v40 }
 0x223   : > { %2649 = vmatprep.mubr.bf16.mxu0 %v2231_v44  ;;  %2810 = vmatprep.mubr.bf16.mxu1 %v2233_v16 }
 0x224   : > { %2650 = vmatmul.mubr.bf16.gmra.mrb[124].mxu0 %v2230_v43  ;;  %2811 = vmatmul.mubr.bf16.gmra.mrb[124].mxu1 %v2232_v15 }
 0x27f   : > { %v3476_v17 = vpop.f32.mrb[64].mxu0  ;;  %v3588_v45 = vpop.f32.mrb[64].mxu1 }
 0x280   : > { %v3477_v46 = vpop.f32.mrb[65].mxu0  ;;  %v3589_v47 = vpop.f32.mrb[65].mxu1 }
 0x281   : > { %v3478_v48 = vadd.f32 %v3477_v46, %v3476_v17  ;;  %v3590_v49 = vadd.f32 %v3589_v47, %v3588_v45  ;;  %v3479_v50 = vpop.f32.mrb[66].mxu0  ;;  %v3591_v51 = vpop.f32.mrb[66].mxu1 }
 0x282   : > { %v3480_v52 = vpop.f32.mrb[67].mxu0  ;;  %v3592_v53 = vpop.f32.mrb[67].mxu1 }
 0x283   : > { %v2532_v54 = vadd.f32 %v3478_v48, %v5036_v18  ;;  %v3481_v55 = vadd.f32 %v3480_v52, %v3479_v50  ;;  %v3593_v56 = vadd.f32 %v3592_v53, %v3591_v51 }
 0x285   : > { %v2693_v57 = vadd.f32 %v3590_v49, %v2532_v54  ;;  %v2535_v58 = vadd.f32 %v3481_v55, %v5036_v18 }
 0x287   : > { %v2696_v59 = vadd.f32 %v3593_v56, %v2535_v58  ;;  %v3482_v60 = vpop.f32.mrb[68].mxu0  ;;  %v3594_v61 = vpop.f32.mrb[68].mxu1 }
 0x288   : > { %v3483_v62 = vpop.f32.mrb[69].mxu0  ;;  %v3595_v63 = vpop.f32.mrb[69].mxu1 }
 0x289   : > { %v3368_v0 = vpack.c.bf16 %v2696_v59, %v2693_v57  ;;  %v3484_v1 = vadd.f32 %v3483_v62, %v3482_v60  ;;  %v3596_v2 = vadd.f32 %v3595_v63, %v3594_v61  ;;  %v3485_v3 = vpop.f32.mrb[70].mxu0  ;;  %v3597_v4 = vpop.f32.mrb[70].mxu1 }
 0x28a   : > { %v3486_v5 = vpop.f32.mrb[71].mxu0  ;;  %v3598_v6 = vpop.f32.mrb[71].mxu1 }
 0x28b   : > { %3369 = vst [vmem:[%s5043_s15] sm:$0xff] %v3368_v0   ;;  %v2540_v7 = vadd.f32 %v3484_v1, %v5036_v18  ;;  %v3487_v8 = vadd.f32 %v3486_v5, %v3485_v3  ;;  %v3599_v9 = vadd.f32 %v3598_v6, %v3597_v4 }
 0x28d   : > { %v2701_v10 = vadd.f32 %v3596_v2, %v2540_v7  ;;  %v2543_v11 = vadd.f32 %v3487_v8, %v5036_v18 }
 0x28f   : > { %v2704_v12 = vadd.f32 %v3599_v9, %v2543_v11  ;;  %v3488_v13 = vpop.f32.mrb[72].mxu0  ;;  %v3600_v14 = vpop.f32.mrb[72].mxu1 }
 0x290   : > { %v3489_v19 = vpop.f32.mrb[73].mxu0  ;;  %v3601_v20 = vpop.f32.mrb[73].mxu1 }
 0x291   : > { %v3373_v21 = vpack.c.bf16 %v2704_v12, %v2701_v10  ;;  %v3490_v22 = vadd.f32 %v3489_v19, %v3488_v13  ;;  %v3602_v23 = vadd.f32 %v3601_v20, %v3600_v14  ;;  %v3491_v24 = vpop.f32.mrb[74].mxu0  ;;  %v3603_v25 = vpop.f32.mrb[74].mxu1 }
 0x292   : > { %v3492_v26 = vpop.f32.mrb[75].mxu0  ;;  %v3604_v27 = vpop.f32.mrb[75].mxu1 }
 0x293   : > { %3445 = vst [vmem:[%s5043_s15 + $0x8] sm:$0xff] %v3373_v21   ;;  %v2548_v28 = vadd.f32 %v3490_v22, %v5036_v18  ;;  %v3493_v29 = vadd.f32 %v3492_v26, %v3491_v24  ;;  %v3605_v30 = vadd.f32 %v3604_v27, %v3603_v25 }
 0x295   : > { %v2709_v31 = vadd.f32 %v3602_v23, %v2548_v28  ;;  %v2551_v32 = vadd.f32 %v3493_v29, %v5036_v18 }
 0x297   : > { %v2712_v33 = vadd.f32 %v3605_v30, %v2551_v32  ;;  %v3494_v34 = vpop.f32.mrb[76].mxu0  ;;  %v3606_v35 = vpop.f32.mrb[76].mxu1 }
 0x298   : > { %v3495_v36 = vpop.f32.mrb[77].mxu0  ;;  %v3607_v37 = vpop.f32.mrb[77].mxu1 }
 0x299   : > { %v3378_v38 = vpack.c.bf16 %v2712_v33, %v2709_v31  ;;  %v3496_v39 = vadd.f32 %v3495_v36, %v3494_v34  ;;  %v3608_v40 = vadd.f32 %v3607_v37, %v3606_v35  ;;  %v3497_v41 = vpop.f32.mrb[78].mxu0  ;;  %v3609_v42 = vpop.f32.mrb[78].mxu1 }
 0x29a   : > { %v3498_v43 = vpop.f32.mrb[79].mxu0  ;;  %v3610_v15 = vpop.f32.mrb[79].mxu1 }
 0x29b   : > { %3446 = vst [vmem:[%s5043_s15 + $0x10] sm:$0xff] %v3378_v38   ;;  %v2556_v44 = vadd.f32 %v3496_v39, %v5036_v18  ;;  %v3499_v16 = vadd.f32 %v3498_v43, %v3497_v41  ;;  %v3611_v17 = vadd.f32 %v3610_v15, %v3609_v42 }
 0x29d   : > { %v2717_v45 = vadd.f32 %v3608_v40, %v2556_v44  ;;  %v2559_v46 = vadd.f32 %v3499_v16, %v5036_v18 }
 0x29f   : > { %v2720_v47 = vadd.f32 %v3611_v17, %v2559_v46  ;;  %v3500_v48 = vpop.f32.mrb[80].mxu0  ;;  %v3612_v49 = vpop.f32.mrb[80].mxu1 }
 0x2a0   : > { %v3501_v50 = vpop.f32.mrb[81].mxu0  ;;  %v3613_v51 = vpop.f32.mrb[81].mxu1 }
 0x2a1   : > { %v3383_v52 = vpack.c.bf16 %v2720_v47, %v2717_v45  ;;  %v3502_v53 = vadd.f32 %v3501_v50, %v3500_v48  ;;  %v3614_v54 = vadd.f32 %v3613_v51, %v3612_v49  ;;  %v3503_v55 = vpop.f32.mrb[82].mxu0  ;;  %v3615_v56 = vpop.f32.mrb[82].mxu1 }
 0x2a2   : > { %v3504_v57 = vpop.f32.mrb[83].mxu0  ;;  %v3616_v58 = vpop.f32.mrb[83].mxu1 }
 0x2a3   : > { %3447 = vst [vmem:[%s5043_s15 + $0x18] sm:$0xff] %v3383_v52   ;;  %v2564_v59 = vadd.f32 %v3502_v53, %v5036_v18  ;;  %v3505_v60 = vadd.f32 %v3504_v57, %v3503_v55  ;;  %v3617_v61 = vadd.f32 %v3616_v58, %v3615_v56 }
 0x2a5   : > { %v2725_v62 = vadd.f32 %v3614_v54, %v2564_v59  ;;  %v2567_v63 = vadd.f32 %v3505_v60, %v5036_v18 }
 0x2a7   : > { %v2728_v0 = vadd.f32 %v3617_v61, %v2567_v63  ;;  %v3506_v1 = vpop.f32.mrb[84].mxu0  ;;  %v3618_v2 = vpop.f32.mrb[84].mxu1 }
 0x2a8   : > { %v3507_v3 = vpop.f32.mrb[85].mxu0  ;;  %v3619_v4 = vpop.f32.mrb[85].mxu1 }
 0x2a9   : > { %v3388_v5 = vpack.c.bf16 %v2728_v0, %v2725_v62  ;;  %v3508_v6 = vadd.f32 %v3507_v3, %v3506_v1  ;;  %v3620_v7 = vadd.f32 %v3619_v4, %v3618_v2  ;;  %v3509_v8 = vpop.f32.mrb[86].mxu0  ;;  %v3621_v9 = vpop.f32.mrb[86].mxu1 }
 0x2aa   : > { %v3510_v10 = vpop.f32.mrb[87].mxu0  ;;  %v3622_v11 = vpop.f32.mrb[87].mxu1 }
 0x2ab   : > { %3448 = vst [vmem:[%s5043_s15 + $0x20] sm:$0xff] %v3388_v5   ;;  %v2572_v12 = vadd.f32 %v3508_v6, %v5036_v18  ;;  %v3511_v13 = vadd.f32 %v3510_v10, %v3509_v8  ;;  %v3623_v14 = vadd.f32 %v3622_v11, %v3621_v9 }
 0x2ad   : > { %v2733_v19 = vadd.f32 %v3620_v7, %v2572_v12  ;;  %v2575_v20 = vadd.f32 %v3511_v13, %v5036_v18 }
 0x2af   : > { %v2736_v21 = vadd.f32 %v3623_v14, %v2575_v20  ;;  %v3512_v22 = vpop.f32.mrb[88].mxu0  ;;  %v3624_v23 = vpop.f32.mrb[88].mxu1 }
 0x2b0   : > { %v3513_v24 = vpop.f32.mrb[89].mxu0  ;;  %v3625_v25 = vpop.f32.mrb[89].mxu1 }
 0x2b1   : > { %v3393_v26 = vpack.c.bf16 %v2736_v21, %v2733_v19  ;;  %v3514_v27 = vadd.f32 %v3513_v24, %v3512_v22  ;;  %v3626_v28 = vadd.f32 %v3625_v25, %v3624_v23  ;;  %v3515_v29 = vpop.f32.mrb[90].mxu0  ;;  %v3627_v30 = vpop.f32.mrb[90].mxu1 }
 0x2b2   : > { %v3516_v31 = vpop.f32.mrb[91].mxu0  ;;  %v3628_v32 = vpop.f32.mrb[91].mxu1 }
 0x2b3   : > { %3449 = vst [vmem:[%s5043_s15 + $0x28] sm:$0xff] %v3393_v26   ;;  %v2580_v33 = vadd.f32 %v3514_v27, %v5036_v18  ;;  %v3517_v34 = vadd.f32 %v3516_v31, %v3515_v29  ;;  %v3629_v35 = vadd.f32 %v3628_v32, %v3627_v30 }
 0x2b5   : > { %v2741_v36 = vadd.f32 %v3626_v28, %v2580_v33  ;;  %v2583_v37 = vadd.f32 %v3517_v34, %v5036_v18 }
 0x2b7   : > { %v2744_v38 = vadd.f32 %v3629_v35, %v2583_v37  ;;  %v3518_v39 = vpop.f32.mrb[92].mxu0  ;;  %v3630_v40 = vpop.f32.mrb[92].mxu1 }
 0x2b8   : > { %v3519_v41 = vpop.f32.mrb[93].mxu0  ;;  %v3631_v42 = vpop.f32.mrb[93].mxu1 }
 0x2b9   : > { %v3398_v43 = vpack.c.bf16 %v2744_v38, %v2741_v36  ;;  %v3520_v15 = vadd.f32 %v3519_v41, %v3518_v39  ;;  %v3632_v44 = vadd.f32 %v3631_v42, %v3630_v40  ;;  %v3521_v16 = vpop.f32.mrb[94].mxu0  ;;  %v3633_v17 = vpop.f32.mrb[94].mxu1 }
 0x2ba   : > { %v3522_v45 = vpop.f32.mrb[95].mxu0  ;;  %v3634_v46 = vpop.f32.mrb[95].mxu1 }
 0x2bb   : > { %3450 = vst [vmem:[%s5043_s15 + $0x30] sm:$0xff] %v3398_v43   ;;  %v2588_v47 = vadd.f32 %v3520_v15, %v5036_v18  ;;  %v3523_v48 = vadd.f32 %v3522_v45, %v3521_v16  ;;  %v3635_v49 = vadd.f32 %v3634_v46, %v3633_v17 }
 0x2bd   : > { %v2749_v50 = vadd.f32 %v3632_v44, %v2588_v47  ;;  %v2591_v51 = vadd.f32 %v3523_v48, %v5036_v18 }
 0x2bf   : > { %v2752_v52 = vadd.f32 %v3635_v49, %v2591_v51  ;;  %v3524_v53 = vpop.f32.mrb[96].mxu0  ;;  %v3636_v54 = vpop.f32.mrb[96].mxu1 }
 0x2c0   : > { %v3525_v55 = vpop.f32.mrb[97].mxu0  ;;  %v3637_v56 = vpop.f32.mrb[97].mxu1 }
 0x2c1   : > { %v3403_v57 = vpack.c.bf16 %v2752_v52, %v2749_v50  ;;  %v3526_v58 = vadd.f32 %v3525_v55, %v3524_v53  ;;  %v3638_v59 = vadd.f32 %v3637_v56, %v3636_v54  ;;  %v3527_v60 = vpop.f32.mrb[98].mxu0  ;;  %v3639_v61 = vpop.f32.mrb[98].mxu1 }
 0x2c2   : > { %v3528_v62 = vpop.f32.mrb[99].mxu0  ;;  %v3640_v63 = vpop.f32.mrb[99].mxu1 }
 0x2c3   : > { %3451 = vst [vmem:[%s5043_s15 + $0x38] sm:$0xff] %v3403_v57   ;;  %v2596_v0 = vadd.f32 %v3526_v58, %v5036_v18  ;;  %v3529_v1 = vadd.f32 %v3528_v62, %v3527_v60  ;;  %v3641_v2 = vadd.f32 %v3640_v63, %v3639_v61 }
 0x2c5   : > { %v2757_v3 = vadd.f32 %v3638_v59, %v2596_v0  ;;  %v2599_v4 = vadd.f32 %v3529_v1, %v5036_v18 }
 0x2c7   : > { %v2760_v5 = vadd.f32 %v3641_v2, %v2599_v4  ;;  %v3530_v6 = vpop.f32.mrb[100].mxu0  ;;  %v3642_v7 = vpop.f32.mrb[100].mxu1 }
 0x2c8   : > { %v3531_v8 = vpop.f32.mrb[101].mxu0  ;;  %v3643_v9 = vpop.f32.mrb[101].mxu1 }
 0x2c9   : > { %v3408_v10 = vpack.c.bf16 %v2760_v5, %v2757_v3  ;;  %v3532_v11 = vadd.f32 %v3531_v8, %v3530_v6  ;;  %v3644_v12 = vadd.f32 %v3643_v9, %v3642_v7  ;;  %v3533_v13 = vpop.f32.mrb[102].mxu0  ;;  %v3645_v14 = vpop.f32.mrb[102].mxu1 }
 0x2ca   : > { %v3534_v19 = vpop.f32.mrb[103].mxu0  ;;  %v3646_v20 = vpop.f32.mrb[103].mxu1 }
 0x2cb   : > { %3452 = vst [vmem:[%s5043_s15 + $0x40] sm:$0xff] %v3408_v10   ;;  %v2604_v21 = vadd.f32 %v3532_v11, %v5036_v18  ;;  %v3535_v22 = vadd.f32 %v3534_v19, %v3533_v13  ;;  %v3647_v23 = vadd.f32 %v3646_v20, %v3645_v14 }
 0x2cd   : > { %v2765_v24 = vadd.f32 %v3644_v12, %v2604_v21  ;;  %v2607_v25 = vadd.f32 %v3535_v22, %v5036_v18 }
 0x2cf   : > { %v2768_v26 = vadd.f32 %v3647_v23, %v2607_v25  ;;  %v3536_v27 = vpop.f32.mrb[104].mxu0  ;;  %v3648_v28 = vpop.f32.mrb[104].mxu1 }
 0x2d0   : > { %v3537_v29 = vpop.f32.mrb[105].mxu0  ;;  %v3649_v30 = vpop.f32.mrb[105].mxu1 }
 0x2d1   : > { %v3413_v31 = vpack.c.bf16 %v2768_v26, %v2765_v24  ;;  %v3538_v32 = vadd.f32 %v3537_v29, %v3536_v27  ;;  %v3650_v33 = vadd.f32 %v3649_v30, %v3648_v28  ;;  %v3539_v34 = vpop.f32.mrb[106].mxu0  ;;  %v3651_v35 = vpop.f32.mrb[106].mxu1 }
 0x2d2   : > { %v3540_v36 = vpop.f32.mrb[107].mxu0  ;;  %v3652_v37 = vpop.f32.mrb[107].mxu1 }
 0x2d3   : > { %3453 = vst [vmem:[%s5043_s15 + $0x48] sm:$0xff] %v3413_v31   ;;  %v2612_v38 = vadd.f32 %v3538_v32, %v5036_v18  ;;  %v3541_v39 = vadd.f32 %v3540_v36, %v3539_v34  ;;  %v3653_v40 = vadd.f32 %v3652_v37, %v3651_v35 }
 0x2d5   : > { %v2773_v41 = vadd.f32 %v3650_v33, %v2612_v38  ;;  %v2615_v42 = vadd.f32 %v3541_v39, %v5036_v18 }
 0x2d7   : > { %v2776_v43 = vadd.f32 %v3653_v40, %v2615_v42  ;;  %v3542_v15 = vpop.f32.mrb[108].mxu0  ;;  %v3654_v44 = vpop.f32.mrb[108].mxu1 }
 0x2d8   : > { %v3543_v16 = vpop.f32.mrb[109].mxu0  ;;  %v3655_v17 = vpop.f32.mrb[109].mxu1 }
 0x2d9   : > { %v3418_v45 = vpack.c.bf16 %v2776_v43, %v2773_v41  ;;  %v3544_v46 = vadd.f32 %v3543_v16, %v3542_v15  ;;  %v3656_v47 = vadd.f32 %v3655_v17, %v3654_v44  ;;  %v3545_v48 = vpop.f32.mrb[110].mxu0  ;;  %v3657_v49 = vpop.f32.mrb[110].mxu1 }
 0x2da   : > { %v3546_v50 = vpop.f32.mrb[111].mxu0  ;;  %v3658_v51 = vpop.f32.mrb[111].mxu1 }
 0x2db   : > { %3454 = vst [vmem:[%s5043_s15 + $0x50] sm:$0xff] %v3418_v45   ;;  %v2620_v52 = vadd.f32 %v3544_v46, %v5036_v18  ;;  %v3547_v53 = vadd.f32 %v3546_v50, %v3545_v48  ;;  %v3659_v54 = vadd.f32 %v3658_v51, %v3657_v49 }
 0x2dd   : > { %v2781_v55 = vadd.f32 %v3656_v47, %v2620_v52  ;;  %v2623_v56 = vadd.f32 %v3547_v53, %v5036_v18 }
 0x2df   : > { %v2784_v57 = vadd.f32 %v3659_v54, %v2623_v56  ;;  %v3548_v58 = vpop.f32.mrb[112].mxu0  ;;  %v3660_v59 = vpop.f32.mrb[112].mxu1 }
 0x2e0   : > { %v3549_v60 = vpop.f32.mrb[113].mxu0  ;;  %v3661_v61 = vpop.f32.mrb[113].mxu1 }
 0x2e1   : > { %v3423_v62 = vpack.c.bf16 %v2784_v57, %v2781_v55  ;;  %v3550_v63 = vadd.f32 %v3549_v60, %v3548_v58  ;;  %v3662_v0 = vadd.f32 %v3661_v61, %v3660_v59  ;;  %v3551_v1 = vpop.f32.mrb[114].mxu0  ;;  %v3663_v2 = vpop.f32.mrb[114].mxu1 }
 0x2e2   : > { %v3552_v3 = vpop.f32.mrb[115].mxu0  ;;  %v3664_v4 = vpop.f32.mrb[115].mxu1 }
 0x2e3   : > { %3455 = vst [vmem:[%s5043_s15 + $0x58] sm:$0xff] %v3423_v62   ;;  %v2628_v5 = vadd.f32 %v3550_v63, %v5036_v18  ;;  %v3553_v6 = vadd.f32 %v3552_v3, %v3551_v1  ;;  %v3665_v7 = vadd.f32 %v3664_v4, %v3663_v2 }
 0x2e5   : > { %v2789_v8 = vadd.f32 %v3662_v0, %v2628_v5  ;;  %v2631_v9 = vadd.f32 %v3553_v6, %v5036_v18 }
 0x2e7   : > { %v2792_v10 = vadd.f32 %v3665_v7, %v2631_v9  ;;  %v3554_v11 = vpop.f32.mrb[116].mxu0  ;;  %v3666_v12 = vpop.f32.mrb[116].mxu1 }
 0x2e8   : > { %v3555_v13 = vpop.f32.mrb[117].mxu0  ;;  %v3667_v14 = vpop.f32.mrb[117].mxu1 }
 0x2e9   : > { %v3428_v19 = vpack.c.bf16 %v2792_v10, %v2789_v8  ;;  %v3556_v20 = vadd.f32 %v3555_v13, %v3554_v11  ;;  %v3668_v21 = vadd.f32 %v3667_v14, %v3666_v12  ;;  %v3557_v22 = vpop.f32.mrb[118].mxu0  ;;  %v3669_v23 = vpop.f32.mrb[118].mxu1 }
 0x2ea   : > { %v3558_v24 = vpop.f32.mrb[119].mxu0  ;;  %v3670_v25 = vpop.f32.mrb[119].mxu1 }
 0x2eb   : > { %3456 = vst [vmem:[%s5043_s15 + $0x60] sm:$0xff] %v3428_v19   ;;  %v2636_v26 = vadd.f32 %v3556_v20, %v5036_v18  ;;  %v3559_v27 = vadd.f32 %v3558_v24, %v3557_v22  ;;  %v3671_v28 = vadd.f32 %v3670_v25, %v3669_v23 }
 0x2ed   : > { %v2797_v29 = vadd.f32 %v3668_v21, %v2636_v26  ;;  %v2639_v30 = vadd.f32 %v3559_v27, %v5036_v18 }
 0x2ef   : > { %v2800_v31 = vadd.f32 %v3671_v28, %v2639_v30  ;;  %v3560_v32 = vpop.f32.mrb[120].mxu0  ;;  %v3672_v33 = vpop.f32.mrb[120].mxu1 }
 0x2f0   : > { %v3561_v34 = vpop.f32.mrb[121].mxu0  ;;  %v3673_v35 = vpop.f32.mrb[121].mxu1 }
 0x2f1   : > { %v3433_v36 = vpack.c.bf16 %v2800_v31, %v2797_v29  ;;  %v3562_v37 = vadd.f32 %v3561_v34, %v3560_v32  ;;  %v3674_v38 = vadd.f32 %v3673_v35, %v3672_v33  ;;  %v3563_v39 = vpop.f32.mrb[122].mxu0  ;;  %v3675_v40 = vpop.f32.mrb[122].mxu1 }
 0x2f2   : > { %v3564_v41 = vpop.f32.mrb[123].mxu0  ;;  %v3676_v42 = vpop.f32.mrb[123].mxu1 }
 0x2f3   : > { %3457 = vst [vmem:[%s5043_s15 + $0x68] sm:$0xff] %v3433_v36   ;;  %v2644_v43 = vadd.f32 %v3562_v37, %v5036_v18  ;;  %v3565_v15 = vadd.f32 %v3564_v41, %v3563_v39  ;;  %v3677_v44 = vadd.f32 %v3676_v42, %v3675_v40 }
 0x2f5   : > { %v2805_v16 = vadd.f32 %v3674_v38, %v2644_v43  ;;  %v2647_v17 = vadd.f32 %v3565_v15, %v5036_v18 }
 0x2f7   : > { %v2808_v45 = vadd.f32 %v3677_v44, %v2647_v17  ;;  %v3566_v46 = vpop.f32.mrb[124].mxu0  ;;  %v3678_v47 = vpop.f32.mrb[124].mxu1 }
 0x2f8   : > { %v3567_v48 = vpop.f32.mrb[125].mxu0  ;;  %v3679_v49 = vpop.f32.mrb[125].mxu1 }
 0x2f9   : > { %v3438_v50 = vpack.c.bf16 %v2808_v45, %v2805_v16  ;;  %v3568_v51 = vadd.f32 %v3567_v48, %v3566_v46  ;;  %v3680_v52 = vadd.f32 %v3679_v49, %v3678_v47  ;;  %v3569_v53 = vpop.f32.mrb[126].mxu0  ;;  %v3681_v54 = vpop.f32.mrb[126].mxu1 }
 0x2fa   : > { %v3570_v55 = vpop.f32.mrb[127].mxu0  ;;  %v3682_v56 = vpop.f32.mrb[127].mxu1 }
 0x2fb   : > { %3458 = vst [vmem:[%s5043_s15 + $0x70] sm:$0xff] %v3438_v50   ;;  %v2652_v57 = vadd.f32 %v3568_v51, %v5036_v18  ;;  %v3571_v58 = vadd.f32 %v3570_v55, %v3569_v53  ;;  %v3683_v59 = vadd.f32 %v3682_v56, %v3681_v54 }
 0x2fd   : > { %v2813_v60 = vadd.f32 %v3680_v52, %v2652_v57  ;;  %v2655_v61 = vadd.f32 %v3571_v58, %v5036_v18 }
 0x2ff   : > { %v2816_v62 = vadd.f32 %v3683_v59, %v2655_v61 }
 0x301   : > { %v3443_v63 = vpack.c.bf16 %v2816_v62, %v2813_v60 }
 0x303   : > { %3459 = vst [vmem:[%s5043_s15 + $0x78] sm:$0xff] %v3443_v63  }
 0x304   : > { %4270 = shalt.err (!%p4267_p3)
}
 0x305   : > { %s4271_s10 = scalar_lea.hbm %s5095_s17, 2048  ;;  %s4275_s12 = scalar_lea.hbm %s5148_s5, 4096 }
 0x306   : > { %p4272_p4 = scmp.ne.s32.totalorder %s5095_s17, %s4271_s10  ;;  %p4276_p9 = scmp.lt.u32.totalorder %s5095_s17, %s5148_s5 }
 0x307   : > { %p4277_p10 = scmp.lt.u32.totalorder %s4275_s12, %s4271_s10  ;;  %p4279_p12 = scmp.lt.u32.totalorder %s4271_s10, %s5095_s17 }
 0x308   : > { %p4273_p7 = pnand %p4272_p4, %p4392_p5 }
 0x309   : > { %p4278_p11 = por %p4277_p10, %p4276_p9 }
 0x30a   : > { %p4274_p8 = pneg %p4273_p7 }
 0x30b   : > { %p4280_p13 = por %p4279_p12, %p4278_p11 }
 0x30d   : > { %p4281_p0 = pnand %p4280_p13, %p4274_p8 }
 0x30f   : > { %4284 = shalt.err (!%p4281_p0)
}
 0x310   : > { %s4322_s15 = smov 64   ;;  %s4323_s16 = smov 4  }
 0x311   : > { %3940 = dma.vmem_to_hbm [thread:$0]  (%p4392_p5), %s5097_s23, 2048, %s5095_s17, %s5102_s6, %s4322_s15, %s4322_s15, %s4323_s16  }
 0x312 PF: > { %p3946_p1 = scmp.ge.s32.totalorder %s4319_s21, 2  ;;  %s3008_s25 = sand.u32 1, %s4307_s18  }
 0x313   : > { %s3009_s26 = scalar_lea.sflag [#allocation3], %s3008_s25 }
 0x314   : > { %p3943_p2 = pnand %p3946_p1, %p4396_p6 }
 0x316   : > { %4302 = dma.done.wait (!%p3943_p2), %s3009_s26, 2048  }
 0x317   : > { %4304 = vsyncadd (!%p3943_p2), %s3009_s26, 4294965248  ;;  %p15_p3 = scmp.ge.s32.totalorder %s4379_s24, 4   ;;  %s5151_s18 = smov %s4311_s19 }
 0x318   : > { %s5152_s19 = smov %s4315_s20  ;;  %s5153_s20 = smov %s4390_s27 }
 0x319   : > { %s5154_s21 = smov %s4379_s24  ;;  %17 = sbr.rel (!%p15_p3) target bundleno = 3 (0x3), region = 75 }
 0x320   :  { %3014 = vsyncpa [#allocation3], 1 }
 0x321   :  { %3016 = vsyncpa [#allocation3 + $0x1], 1 }

</bundles_post_ra>
